<compile_context>
chip_gen: v7x
topology: tpu7x:2x2x1
jax: 0.10.0
libtpu: 0.0.40
codegen_flags: <defaults>
</compile_context>

<pallas_src>
import functools

import jax
import jax.numpy as jnp
from jax import lax
from jax.experimental import pallas as pl
from jax.experimental.pallas import tpu as pltpu

NEG_SLOPE = 0.01          # PyTorch LeakyReLU default
BIG = 1e30                # "infinite" distance for masked pairs
CH = 128                  # source-axis (lane) chunk
TGT_CHUNK = 8             # target-row chunk inside the edge kernels
_VMEM_SOFT_CAP = 48 * 1024 * 1024   # stay under v7x's 64 MiB physical VMEM


def _leaky(x):
    return jnp.where(x > 0, x, NEG_SLOPE * x)


def _round_up(n, m):
    return ((n + m - 1) // m) * m


def _row_tile(n, max_tile=128):
    """Row tile + padded row count.  Prefer >=2 grid steps (so 'parallel' can
    shard across the 2 TensorCores on v7x) while keeping per-step work large."""
    n8 = _round_up(max(n, 8), 8)
    if n8 <= max_tile // 2:
        return n8, n8
    if n8 <= max_tile:
        half = _round_up((n8 + 1) // 2, 8)
        return half, 2 * half
    return max_tile, _round_up(n, max_tile)


def _pad_rows(x, n_pad, value=0):
    n = x.shape[0]
    if n_pad == n:
        return x
    pad = [(0, n_pad - n)] + [(0, 0)] * (x.ndim - 1)
    return jnp.pad(x, pad, constant_values=value)


def _mosaic_params(est_bytes=0):
    kwargs = dict(dimension_semantics=("parallel",))
    # Explicit VMEM budgeting only matters for large graphs; the scoped default
    # (32 MiB) is plenty at small N and we never exceed v7x's physical 64 MiB.
    if est_bytes > 24 * 1024 * 1024:
        kwargs["vmem_limit_bytes"] = int(
            min(_round_up(est_bytes + (8 << 20), 1 << 20), _VMEM_SOFT_CAP))
    return pltpu.CompilerParams(**kwargs)


# --------------------------------------------------------------- MLP bodies
def _mlp2_body(x, w1, b1, w2, b2):
    h = _leaky(jnp.dot(x, w1, preferred_element_type=jnp.float32) + b1)
    return jnp.dot(h, w2, preferred_element_type=jnp.float32) + b2


def _mlp4_body(x, w1, b1, w2, b2, w3, b3, w4, b4):
    h = _leaky(jnp.dot(x, w1, preferred_element_type=jnp.float32) + b1)
    h = _leaky(jnp.dot(h, w2, preferred_element_type=jnp.float32) + b2)
    h = _leaky(jnp.dot(h, w3, preferred_element_type=jnp.float32) + b3)
    return jnp.dot(h, w4, preferred_element_type=jnp.float32) + b4


# ----------------------------------------------------------- vertex encoders
def _mlp2_kernel(x_ref, w1_ref, b1_ref, w2_ref, b2_ref, o_ref):
    o_ref[...] = _mlp2_body(x_ref[...], w1_ref[...], b1_ref[...],
                            w2_ref[...], b2_ref[...])


def mlp2(x, w1, b1, w2, b2):
    """Linear -> LeakyReLU -> Linear in Pallas (weights in (in, out) layout)."""
    n, d_in = x.shape
    d_out = w2.shape[1]
    tile, n_pad = _row_tile(n)
    xp = _pad_rows(x, n_pad)
    out = pl.pallas_call(
        _mlp2_kernel,
        out_shape=jax.ShapeDtypeStruct((n_pad, d_out), jnp.float32),
        grid=(n_pad // tile,),
        in_specs=[pl.BlockSpec((tile, d_in), lambda i: (i, 0))]
        + [pl.BlockSpec(p.shape, lambda i: (0, 0)) for p in (w1, b1, w2, b2)],
        out_specs=pl.BlockSpec((tile, d_out), lambda i: (i, 0)),
        compiler_params=_mosaic_params(),
    )(xp, w1, b1, w2, b2)
    return out[:n]


def mlp2_xla(x, w1, b1, w2, b2):
    """Tiny MLP kept in plain XLA (kernel-launch overhead > compute)."""
    return _mlp2_body(x, w1, b1, w2, b2)


# ------------------------------------------------------- source preparation
def prep_sources(x_src, bs_eff):
    """Hoisted source-side tensors shared by the dist and edge kernels.

    bs_eff already folds source eligibility (e.g. 'charged') as id -2; padded
    source columns also get id -2 so they never match any real target batch."""
    ns, d = x_src.shape
    ns_pad = _round_up(max(ns, CH), CH)
    n_sc = ns_pad // CH
    xs = _pad_rows(x_src.astype(jnp.float32), ns_pad)
    bs = jnp.full((ns_pad,), -2, jnp.int32).at[:ns].set(bs_eff.astype(jnp.int32))
    sqs = jnp.sum(xs * xs, axis=-1)
    xs3 = xs.reshape(n_sc, CH, d)
    return dict(
        ns=ns, ns_pad=ns_pad, n_sc=n_sc, d=d,
        xst2=xs.T,                                    # (d, ns_pad)
        sqs2=sqs.reshape(1, ns_pad),
        bs2=bs.reshape(1, ns_pad),
        xs3=xs3,                                      # (n_sc, CH, d)
        xst3=jnp.transpose(xs3, (0, 2, 1)),           # (n_sc, d, CH)
        sqs3=sqs.reshape(n_sc, 1, CH),
        bs3=bs.reshape(n_sc, 1, CH),
    )


# ----------------------------------------------------- pairwise distances
def _dist_kernel(xt_ref, bt_ref, xst_ref, sqs_ref, bs_ref, d_ref):
    xt = xt_ref[...]
    sq_t = jnp.sum(xt * xt, axis=-1, keepdims=True)
    dots = jnp.dot(xt, xst_ref[...], preferred_element_type=jnp.float32)
    dist = jnp.maximum(sq_t + sqs_ref[...] - 2.0 * dots, 0.0)
    keep = bt_ref[...] == bs_ref[...]
    d_ref[...] = jnp.where(keep, dist, BIG)


def pairwise_dist(x_tgt, b_tgt, src):
    """Masked squared distances target-tile x all sources (only consumed by
    the top_k threshold computation)."""
    nt, d = x_tgt.shape
    ns_pad = src["ns_pad"]
    tile, n_pad = _row_tile(nt)
    xt = _pad_rows(x_tgt, n_pad)
    bt = _pad_rows(b_tgt.reshape(-1, 1).astype(jnp.int32), n_pad, value=-1)
    est = 4 * (2 * ns_pad * (d + 2) + 2 * tile * (ns_pad + d + 2))
    dist = pl.pallas_call(
        _dist_kernel,
        out_shape=jax.ShapeDtypeStruct((n_pad, ns_pad), jnp.float32),
        grid=(n_pad // tile,),
        in_specs=[
            pl.BlockSpec((tile, d), lambda i: (i, 0)),
            pl.BlockSpec((tile, 1), lambda i: (i, 0)),
            pl.BlockSpec((d, ns_pad), lambda i: (0, 0)),
            pl.BlockSpec((1, ns_pad), lambda i: (0, 0)),
            pl.BlockSpec((1, ns_pad), lambda i: (0, 0)),
        ],
        out_specs=pl.BlockSpec((tile, ns_pad), lambda i: (i, 0)),
        compiler_params=_mosaic_params(est),
    )(xt, bt, src["xst2"], src["sqs2"], src["bs2"])
    return dist[:nt]


def knn_threshold(dist, k):
    """Per-row k-th smallest masked distance.  Replaces the scatter-built
    selection matrix; exact distance ties may select slightly more than k."""
    # TODO(synk): top-k stays in XLA (no clean Pallas TPU sort primitive).
    keff = min(k, dist.shape[1])
    neg_vals, _ = lax.top_k(-dist, keff)
    return -neg_vals[:, keff - 1:keff]                 # (nt, 1)


# --------------------------------------------- DynamicEdgeConv message+aggr
def _make_edge_kernel(tile, d_out, n_sc, with_head):
    """out[t] = mean_{s in kNN(t)} LeakyReLU(x_t @ W1 + b + (x_s - x_t) @ W2)
              = mean LeakyReLU(base[t] + projT[s])
       with  base  = x_t @ (W1 - W2) + b
             projT = x_s @ W2
       Leaky split: slope*(cnt*base + sel@projT) goes to the MXU; only the
       relu part runs on the dense (TGT_CHUNK, d_out, CH) VPU path, chunked
       over targets and sources with fori_loop (bounded live ranges)."""
    n_tc = tile // TGT_CHUNK

    def kernel(*refs):
        (xt_ref, bt_ref, thr_ref, xs3_ref, xst3_ref, sqs3_ref, bs3_ref,
         wb_ref, w2_ref, w2t_ref, b_ref) = refs[:11]
        pos = 11
        head_refs = ()
        if with_head:
            head_refs = refs[pos:pos + 8]
            pos += 8
        o_ref = refs[pos]
        sel_scr, proj_scr, base_scr, relu_scr = refs[pos + 1:pos + 5]

        xt = xt_ref[...]                                   # (tile, d_in)
        bt = bt_ref[...]                                   # (tile, 1) int32
        thr = thr_ref[...]                                 # (tile, 1) f32
        w2 = w2_ref[...]                                   # (d_in, d_out)
        w2t = w2t_ref[...]                                 # (d_out, d_in)
        sq_t = jnp.sum(xt * xt, axis=-1, keepdims=True)
        base = jnp.dot(xt, wb_ref[...],
                       preferred_element_type=jnp.float32) + b_ref[...]
        base_scr[...] = base

        # -- pass 1: per source-chunk selection, neighbour count, MXU linear --
        def pass1(j, carry):
            cnt, lin = carry
            xst_c = xst3_ref[j]                            # (d_in, CH)
            xs_c = xs3_ref[j]                              # (CH, d_in)
            dots = jnp.dot(xt, xst_c, preferred_element_type=jnp.float32)
            dist = jnp.maximum(sq_t + sqs3_ref[j] - 2.0 * dots, 0.0)
            sel_c = ((bt == bs3_ref[j]) & (dist <= thr)).astype(jnp.float32)
            sel_scr[j] = sel_c
            proj_scr[j] = jnp.dot(w2t, xst_c,
                                  preferred_element_type=jnp.float32)
            projT_c = jnp.dot(xs_c, w2, preferred_element_type=jnp.float32)
            cnt = cnt + jnp.sum(sel_c, axis=-1, keepdims=True)
            lin = lin + jnp.dot(sel_c, projT_c,
                                preferred_element_type=jnp.float32)
            return cnt, lin

        cnt, lin = lax.fori_loop(
            0, n_sc, pass1,
            (jnp.zeros((tile, 1), jnp.float32),
             jnp.zeros((tile, d_out), jnp.float32)))

        # -- pass 2: dense relu part, chunked over targets and sources --------
        def tgt_body(c, carry):
            ot = pl.multiple_of(c * TGT_CHUNK, TGT_CHUNK)
            base_c = base_scr[pl.ds(ot, TGT_CHUNK), :]     # (8, d_out)

            def src_body(j, acc):
                proj_c = proj_scr[j]                       # (d_out, CH)
                sel_c = sel_scr[j, pl.ds(ot, TGT_CHUNK), :]  # (8, CH)
                m = jnp.maximum(base_c[:, :, None] + proj_c[None, :, :], 0.0)
                return acc + jnp.sum(m * sel_c[:, None, :], axis=-1)

            relu_c = lax.fori_loop(
                0, n_sc, src_body,
                jnp.zeros((TGT_CHUNK, d_out), jnp.float32))
            relu_scr[pl.ds(ot, TGT_CHUNK), :] = relu_c
            return carry

        lax.fori_loop(0, n_tc, tgt_body, 0)

        inv = pl.reciprocal(jnp.maximum(cnt, 1.0), approx=True)   # EUP slot
        agg = (NEG_SLOPE * (base * cnt + lin)
               + (1.0 - NEG_SLOPE) * relu_scr[...]) * inv

        if with_head:
            (wo1, bo1, wo2, bo2, wo3, bo3, wo4, bo4) = head_refs
            o_ref[...] = _mlp4_body(agg, wo1[...], bo1[...], wo2[...], bo2[...],
                                    wo3[...], bo3[...], wo4[...], bo4[...])
        else:
            o_ref[...] = agg

    return kernel


def edge_conv(x_tgt, b_tgt, thr, src, w, bias, head_params=None):
    """DynamicEdgeConv (Linear(2D,Dout)+LeakyReLU message, mean aggregation),
    optionally fused with the 4-layer output head (feats2 never leaves VMEM)."""
    nt, d_in = x_tgt.shape
    d_out = w.shape[1]
    tile, n_pad = _row_tile(nt)
    n_sc = src["n_sc"]

    xt = _pad_rows(x_tgt, n_pad)
    bt = _pad_rows(b_tgt.reshape(-1, 1).astype(jnp.int32), n_pad, value=-1)
    thr_p = _pad_rows(thr.astype(jnp.float32), n_pad, value=-1.0)

    w_base = w[:d_in, :] - w[d_in:, :]          # acts on x_i   (d_in, d_out)
    w2 = w[d_in:, :]                            # acts on x_j   (d_in, d_out)
    w2t = w2.T                                  # (d_out, d_in)

    head = tuple(head_params) if head_params is not None else ()
    final_dim = head[-1].shape[1] if head else d_out

    kernel = _make_edge_kernel(tile, d_out, n_sc, with_head=bool(head))

    in_specs = ([
        pl.BlockSpec((tile, d_in), lambda i: (i, 0)),
        pl.BlockSpec((tile, 1), lambda i: (i, 0)),
        pl.BlockSpec((tile, 1), lambda i: (i, 0)),
        pl.BlockSpec((n_sc, CH, d_in), lambda i: (0, 0, 0)),
        pl.BlockSpec((n_sc, d_in, CH), lambda i: (0, 0, 0)),
        pl.BlockSpec((n_sc, 1, CH), lambda i: (0, 0, 0)),
        pl.BlockSpec((n_sc, 1, CH), lambda i: (0, 0, 0)),
        pl.BlockSpec((d_in, d_out), lambda i: (0, 0)),
        pl.BlockSpec((d_in, d_out), lambda i: (0, 0)),
        pl.BlockSpec((d_out, d_in), lambda i: (0, 0)),
        pl.BlockSpec((1, d_out), lambda i: (0, 0)),
    ] + [pl.BlockSpec(p.shape, lambda i: (0, 0)) for p in head])

    scratch = [
        pltpu.VMEM((n_sc, tile, CH), jnp.float32),    # selection mask
        pltpu.VMEM((n_sc, d_out, CH), jnp.float32),   # W2-projected sources
        pltpu.VMEM((tile, d_out), jnp.float32),       # base term
        pltpu.VMEM((tile, d_out), jnp.float32),       # relu accumulator
    ]

    est = 4 * (2 * n_sc * CH * (2 * d_in + 2)
               + n_sc * CH * (tile + d_out)
               + 2 * tile * d_out
               + 2 * tile * (d_in + final_dim + 4))

    out = pl.pallas_call(
        kernel,
        out_shape=jax.ShapeDtypeStruct((n_pad, final_dim), jnp.float32),
        grid=(n_pad // tile,),
        in_specs=in_specs,
        out_specs=pl.BlockSpec((tile, final_dim), lambda i: (i, 0)),
        scratch_shapes=scratch,
        compiler_params=_mosaic_params(est),
    )(xt, bt, thr_p, src["xs3"], src["xst3"], src["sqs3"], src["bs3"],
      w_base, w2, w2t, bias, *head)
    return out[:nt]


# --------------------------------------------------------------- parameters
def init_linear(key, fan_in, fan_out):
    """PyTorch-style uniform(-1/sqrt(fan_in), 1/sqrt(fan_in)); (in, out) layout."""
    k_w, k_b = jax.random.split(key)
    bound = 1.0 / (fan_in ** 0.5)
    w = jax.random.uniform(k_w, (fan_in, fan_out), jnp.float32, -bound, bound)
    b = jax.random.uniform(k_b, (1, fan_out), jnp.float32, -bound, bound)
    return w, b


# ------------------------------------------------------------------ forward
@functools.partial(jax.jit, static_argnames=("k",))
def net_forward(params, x_pfc, x_vtx, batch_pfc, batch_vtx, k=64):
    p = params
    # encoders (dropout p=0.5 / p=0.2 are identity in eval mode)
    x_vtx_enc = mlp2_xla(x_vtx, *p["vtx_encode"])          # tiny -> plain XLA
    x_pfc_enc = mlp2(x_pfc, *p["pfc_encode"])              # (N_pfc, 32) Pallas

    batch = batch_pfc.astype(jnp.int32)

    # conv1: DynamicEdgeConv(Linear(64,16)+LeakyReLU, k, 'mean') on the encoded
    # pfc self-graph (kNN includes the self pair, as torch_cluster.knn does).
    src1 = prep_sources(x_pfc_enc, batch)
    dist1 = pairwise_dist(x_pfc_enc, batch, src1)
    thr1 = knn_threshold(dist1, k)
    feats1 = edge_conv(x_pfc_enc, batch, thr1, src1,
                       p["conv_w"], p["conv_b"])           # (N_pfc, 16)

    # Charged-particle selection: the data-dependent nonzero/gather becomes a
    # static-shape eligibility encoded in the source batch ids (-2 = excluded).
    charged = x_pfc[:, 11] != 0
    bs2 = jnp.where(charged, batch, -2).astype(jnp.int32)

    # NOTE: the reference also builds combined_feats / combined_batch but never
    # uses them, so they are skipped here.
    # TODO(synk): the reference calls self.conv (Linear(64,16)) on 2*16-dim
    # messages, a shape mismatch; we keep the dimensionally consistent
    # interpretation and use conv2 (Linear(32,32)) for this stage, fused with
    # the 4-layer output head.
    src2 = prep_sources(feats1, bs2)
    dist2 = pairwise_dist(feats1, batch, src2)
    thr2 = knn_threshold(dist2, k)
    out = edge_conv(feats1, batch, thr2, src2,
                    p["conv2_w"], p["conv2_b"],
                    head_params=p["output"])               # (N_pfc, 1)
    return out, batch_pfc, feats1, x_vtx_enc


if __name__ == "__main__":
    key = jax.random.PRNGKey(0)
    keys = jax.random.split(key, 16)

    N_PFC, N_VTX, HID, K = 128, 16, 32, 64

    w_p1, b_p1 = init_linear(keys[0], 13, HID)
    w_p2, b_p2 = init_linear(keys[1], HID, HID)
    w_v1, b_v1 = init_linear(keys[2], 4, HID)
    w_v2, b_v2 = init_linear(keys[3], HID, HID)
    w_c1, b_c1 = init_linear(keys[4], 2 * HID, HID // 2)   # conv.nn  : Linear(64,16)
    w_c2, b_c2 = init_linear(keys[5], HID, HID)            # conv2.nn : Linear(32,32)
    w_o1, b_o1 = init_linear(keys[6], HID, 64)
    w_o2, b_o2 = init_linear(keys[7], 64, 32)
    w_o3, b_o3 = init_linear(keys[8], 32, 4)
    w_o4, b_o4 = init_linear(keys[9], 4, 1)

    params = {
        "pfc_encode": (w_p1, b_p1, w_p2, b_p2),
        "vtx_encode": (w_v1, b_v1, w_v2, b_v2),
        "conv_w": w_c1, "conv_b": b_c1,
        "conv2_w": w_c2, "conv2_b": b_c2,
        "output": (w_o1, b_o1, w_o2, b_o2, w_o3, b_o3, w_o4, b_o4),
    }

    # deterministic example inputs: 2 graphs of 64 pfc nodes / 8 vtx nodes each
    x_pfc = jax.random.normal(keys[10], (N_PFC, 13), dtype=jnp.float32)
    charged_flag = jax.random.bernoulli(keys[11], 0.5, (N_PFC,))
    charged_flag = charged_flag.at[0].set(True).at[N_PFC // 2].set(True)
    x_pfc = x_pfc.at[:, 11].set(jnp.where(charged_flag, x_pfc[:, 11], 0.0))
    x_vtx = jax.random.normal(keys[12], (N_VTX, 4), dtype=jnp.float32)
    batch_pfc = jnp.concatenate([jnp.zeros(N_PFC // 2, jnp.int32),
                                 jnp.ones(N_PFC // 2, jnp.int32)])
    batch_vtx = jnp.concatenate([jnp.zeros(N_VTX // 2, jnp.int32),
                                 jnp.ones(N_VTX // 2, jnp.int32)])

    out, batch, feats1, x_vtx_enc = net_forward(params, x_pfc, x_vtx,
                                                batch_pfc, batch_vtx, k=K)
    jax.block_until_ready((out, batch, feats1, x_vtx_enc))
    assert out.shape == (N_PFC, 1)
    assert feats1.shape == (N_PFC, HID // 2)
    assert x_vtx_enc.shape == (N_VTX, HID)
    assert bool(jnp.all(jnp.isfinite(out)))
    assert bool(jnp.all(jnp.isfinite(feats1)))
    print("KERNEL_OK")
</pallas_src>

<mosaic_0001>
module attributes {stable_mosaic.version = 11 : i64} {
  func.func @_mlp2_kernel(%arg0: i32, %arg1: memref<64x13xf32, #tpu.memory_space<vmem>>, %arg2: memref<13x32xf32, #tpu.memory_space<vmem>>, %arg3: memref<1x32xf32, #tpu.memory_space<vmem>>, %arg4: memref<32x32xf32, #tpu.memory_space<vmem>>, %arg5: memref<1x32xf32, #tpu.memory_space<vmem>>, %arg6: memref<64x32xf32, #tpu.memory_space<vmem>>) attributes {dimension_semantics = [#tpu.dimension_semantics<parallel>], iteration_bounds = array<i64: 2>, scalar_prefetch = 0 : i64, scratch_operands = 0 : i64, tpu.core_type = #tpu.core_type<tc>, window_params = [{transform_indices = @transform_0, window_bounds = array<i64: 64, 13>}, {pipeline_mode = #tpu.pipeline_mode<synchronous>, transform_indices = @transform_1, window_bounds = array<i64: 13, 32>}, {pipeline_mode = #tpu.pipeline_mode<synchronous>, transform_indices = @transform_2, window_bounds = array<i64: 1, 32>}, {pipeline_mode = #tpu.pipeline_mode<synchronous>, transform_indices = @transform_3, window_bounds = array<i64: 32, 32>}, {pipeline_mode = #tpu.pipeline_mode<synchronous>, transform_indices = @transform_4, window_bounds = array<i64: 1, 32>}, {transform_indices = @transform_5, window_bounds = array<i64: 64, 32>}]} {
    %c0 = arith.constant 0 : index
    %c0_0 = arith.constant 0 : index
    %0 = vector.load %arg1[%c0, %c0_0] : memref<64x13xf32, #tpu.memory_space<vmem>>, vector<64x13xf32>
    %c0_1 = arith.constant 0 : index
    %c0_2 = arith.constant 0 : index
    %1 = vector.load %arg2[%c0_1, %c0_2] : memref<13x32xf32, #tpu.memory_space<vmem>>, vector<13x32xf32>
    %c0_3 = arith.constant 0 : index
    %c0_4 = arith.constant 0 : index
    %2 = vector.load %arg3[%c0_3, %c0_4] : memref<1x32xf32, #tpu.memory_space<vmem>>, vector<1x32xf32>
    %c0_5 = arith.constant 0 : index
    %c0_6 = arith.constant 0 : index
    %3 = vector.load %arg4[%c0_5, %c0_6] : memref<32x32xf32, #tpu.memory_space<vmem>>, vector<32x32xf32>
    %c0_7 = arith.constant 0 : index
    %c0_8 = arith.constant 0 : index
    %4 = vector.load %arg5[%c0_7, %c0_8] : memref<1x32xf32, #tpu.memory_space<vmem>>, vector<1x32xf32>
    %cst = arith.constant dense<0.000000e+00> : vector<64x32xf32>
    %5 = tpu.matmul %0, %1, %cst {dimension_numbers = #tpu.dot_dimension_numbers<[1], [0], [0], [1], [0, 0, 1, 1], [], []>} : vector<64x13xf32>, vector<13x32xf32>, vector<64x32xf32> -> vector<64x32xf32>
    %6 = vector.broadcast %2 : vector<1x32xf32> to vector<64x32xf32>
    %7 = arith.addf %5, %6 : vector<64x32xf32>
    %cst_9 = arith.constant 0.000000e+00 : f32
    %8 = vector.broadcast %cst_9 : f32 to vector<64x32xf32>
    %9 = arith.cmpf ogt, %7, %8 : vector<64x32xf32>
    %cst_10 = arith.constant 0.00999999977 : f32
    %10 = vector.broadcast %cst_10 : f32 to vector<64x32xf32>
    %11 = arith.mulf %10, %7 : vector<64x32xf32>
    %12 = arith.select %9, %7, %11 : vector<64x32xi1>, vector<64x32xf32>
    %cst_11 = arith.constant dense<0.000000e+00> : vector<64x32xf32>
    %13 = tpu.matmul %12, %3, %cst_11 {dimension_numbers = #tpu.dot_dimension_numbers<[1], [0], [0], [1], [0, 0, 1, 1], [], []>} : vector<64x32xf32>, vector<32x32xf32>, vector<64x32xf32> -> vector<64x32xf32>
    %14 = vector.broadcast %4 : vector<1x32xf32> to vector<64x32xf32>
    %15 = arith.addf %13, %14 : vector<64x32xf32>
    %c0_12 = arith.constant 0 : index
    %c0_13 = arith.constant 0 : index
    %16 = vector.load %arg6[%c0_12, %c0_13] : memref<64x32xf32, #tpu.memory_space<vmem>>, vector<64x32xf32>
    tpu.vector_store %arg6[%c0_12, %c0_13], %15 {strides = array<i32>} : memref<64x32xf32, #tpu.memory_space<vmem>>, vector<64x32xf32>,
    return
  }
  func.func @transform_0(%arg0: i32) -> (i32, i32) {
    %c0_i32 = arith.constant 0 : i32
    %c0_i32_0 = arith.constant 0 : i32
    return %arg0, %c0_i32 : i32, i32
  }
  func.func @transform_1(%arg0: i32) -> (i32, i32) {
    %c0_i32 = arith.constant 0 : i32
    %c0_i32_0 = arith.constant 0 : i32
    %c0_i32_1 = arith.constant 0 : i32
    return %c0_i32, %c0_i32_0 : i32, i32
  }
  func.func @transform_2(%arg0: i32) -> (i32, i32) {
    %c0_i32 = arith.constant 0 : i32
    %c0_i32_0 = arith.constant 0 : i32
    %c0_i32_1 = arith.constant 0 : i32
    return %c0_i32, %c0_i32_0 : i32, i32
  }
  func.func @transform_3(%arg0: i32) -> (i32, i32) {
    %c0_i32 = arith.constant 0 : i32
    %c0_i32_0 = arith.constant 0 : i32
    %c0_i32_1 = arith.constant 0 : i32
    return %c0_i32, %c0_i32_0 : i32, i32
  }
  func.func @transform_4(%arg0: i32) -> (i32, i32) {
    %c0_i32 = arith.constant 0 : i32
    %c0_i32_0 = arith.constant 0 : i32
    %c0_i32_1 = arith.constant 0 : i32
    return %c0_i32, %c0_i32_0 : i32, i32
  }
  func.func @transform_5(%arg0: i32) -> (i32, i32) {
    %c0_i32 = arith.constant 0 : i32
    %c0_i32_0 = arith.constant 0 : i32
    return %arg0, %c0_i32 : i32, i32
  }
}

module attributes {stable_mosaic.version = 11 : i64} {
  func.func @_dist_kernel(%arg0: i32, %arg1: memref<64x32xf32, #tpu.memory_space<vmem>>, %arg2: memref<64x1xi32, #tpu.memory_space<vmem>>, %arg3: memref<32x128xf32, #tpu.memory_space<vmem>>, %arg4: memref<1x128xf32, #tpu.memory_space<vmem>>, %arg5: memref<1x128xi32, #tpu.memory_space<vmem>>, %arg6: memref<64x128xf32, #tpu.memory_space<vmem>>) attributes {dimension_semantics = [#tpu.dimension_semantics<parallel>], iteration_bounds = array<i64: 2>, scalar_prefetch = 0 : i64, scratch_operands = 0 : i64, tpu.core_type = #tpu.core_type<tc>, window_params = [{transform_indices = @transform_0, window_bounds = array<i64: 64, 32>}, {transform_indices = @transform_1, window_bounds = array<i64: 64, 1>}, {pipeline_mode = #tpu.pipeline_mode<synchronous>, transform_indices = @transform_2, window_bounds = array<i64: 32, 128>}, {pipeline_mode = #tpu.pipeline_mode<synchronous>, transform_indices = @transform_3, window_bounds = array<i64: 1, 128>}, {pipeline_mode = #tpu.pipeline_mode<synchronous>, transform_indices = @transform_4, window_bounds = array<i64: 1, 128>}, {transform_indices = @transform_5, window_bounds = array<i64: 64, 128>}]} {
    %c0 = arith.constant 0 : index
    %c0_0 = arith.constant 0 : index
    %0 = vector.load %arg1[%c0, %c0_0] : memref<64x32xf32, #tpu.memory_space<vmem>>, vector<64x32xf32>
    %1 = arith.mulf %0, %0 : vector<64x32xf32>
    %cst = arith.constant dense<0.000000e+00> : vector<64xf32>
    %2 = vector.multi_reduction <add>, %1, %cst [1] : vector<64x32xf32> to vector<64xf32>
    %3 = vector.shape_cast %2 : vector<64xf32> to vector<64x1xf32>
    %c0_1 = arith.constant 0 : index
    %c0_2 = arith.constant 0 : index
    %4 = vector.load %arg3[%c0_1, %c0_2] : memref<32x128xf32, #tpu.memory_space<vmem>>, vector<32x128xf32>
    %cst_3 = arith.constant dense<0.000000e+00> : vector<64x128xf32>
    %5 = tpu.matmul %0, %4, %cst_3 {dimension_numbers = #tpu.dot_dimension_numbers<[1], [0], [0], [1], [0, 0, 1, 1], [], []>} : vector<64x32xf32>, vector<32x128xf32>, vector<64x128xf32> -> vector<64x128xf32>
    %c0_4 = arith.constant 0 : index
    %c0_5 = arith.constant 0 : index
    %6 = vector.load %arg4[%c0_4, %c0_5] : memref<1x128xf32, #tpu.memory_space<vmem>>, vector<1x128xf32>
    %7 = vector.broadcast %3 : vector<64x1xf32> to vector<64x128xf32>
    %8 = vector.broadcast %6 : vector<1x128xf32> to vector<64x128xf32>
    %9 = arith.addf %7, %8 : vector<64x128xf32>
    %cst_6 = arith.constant 2.000000e+00 : f32
    %10 = vector.broadcast %cst_6 : f32 to vector<64x128xf32>
    %11 = arith.mulf %10, %5 : vector<64x128xf32>
    %12 = arith.subf %9, %11 : vector<64x128xf32>
    %cst_7 = arith.constant 0.000000e+00 : f32
    %13 = vector.broadcast %cst_7 : f32 to vector<64x128xf32>
    %14 = arith.maximumf %12, %13 : vector<64x128xf32>
    %c0_8 = arith.constant 0 : index
    %c0_9 = arith.constant 0 : index
    %15 = vector.load %arg2[%c0_8, %c0_9] : memref<64x1xi32, #tpu.memory_space<vmem>>, vector<64x1xi32>
    %c0_10 = arith.constant 0 : index
    %c0_11 = arith.constant 0 : index
    %16 = vector.load %arg5[%c0_10, %c0_11] : memref<1x128xi32, #tpu.memory_space<vmem>>, vector<1x128xi32>
    %17 = vector.broadcast %15 : vector<64x1xi32> to vector<64x128xi32>
    %18 = vector.broadcast %16 : vector<1x128xi32> to vector<64x128xi32>
    %19 = arith.cmpi eq, %17, %18 : vector<64x128xi32>
    %cst_12 = arith.constant 1.000000e+30 : f32
    %20 = vector.broadcast %cst_12 : f32 to vector<64x128xf32>
    %21 = arith.select %19, %14, %20 : vector<64x128xi1>, vector<64x128xf32>
    %c0_13 = arith.constant 0 : index
    %c0_14 = arith.constant 0 : index
    %22 = vector.load %arg6[%c0_13, %c0_14] : memref<64x128xf32, #tpu.memory_space<vmem>>, vector<64x128xf32>
    tpu.vector_store %arg6[%c0_13, %c0_14], %21 {strides = array<i32>} : memref<64x128xf32, #tpu.memory_space<vmem>>, vector<64x128xf32>,
    return
  }
  func.func @transform_0(%arg0: i32) -> (i32, i32) {
    %c0_i32 = arith.constant 0 : i32
    %c0_i32_0 = arith.constant 0 : i32
    return %arg0, %c0_i32 : i32, i32
  }
  func.func @transform_1(%arg0: i32) -> (i32, i32) {
    %c0_i32 = arith.constant 0 : i32
    %c0_i32_0 = arith.constant 0 : i32
    return %arg0, %c0_i32 : i32, i32
  }
  func.func @transform_2(%arg0: i32) -> (i32, i32) {
    %c0_i32 = arith.constant 0 : i32
    %c0_i32_0 = arith.constant 0 : i32
    %c0_i32_1 = arith.constant 0 : i32
    return %c0_i32, %c0_i32_0 : i32, i32
  }
  func.func @transform_3(%arg0: i32) -> (i32, i32) {
    %c0_i32 = arith.constant 0 : i32
    %c0_i32_0 = arith.constant 0 : i32
    %c0_i32_1 = arith.constant 0 : i32
    return %c0_i32, %c0_i32_0 : i32, i32
  }
  func.func @transform_4(%arg0: i32) -> (i32, i32) {
    %c0_i32 = arith.constant 0 : i32
    %c0_i32_0 = arith.constant 0 : i32
    %c0_i32_1 = arith.constant 0 : i32
    return %c0_i32, %c0_i32_0 : i32, i32
  }
  func.func @transform_5(%arg0: i32) -> (i32, i32) {
    %c0_i32 = arith.constant 0 : i32
    %c0_i32_0 = arith.constant 0 : i32
    return %arg0, %c0_i32 : i32, i32
  }
}

module attributes {stable_mosaic.version = 11 : i64} {
  func.func @kernel(%arg0: i32, %arg1: memref<64x32xf32, #tpu.memory_space<vmem>>, %arg2: memref<64x1xi32, #tpu.memory_space<vmem>>, %arg3: memref<64x1xf32, #tpu.memory_space<vmem>>, %arg4: memref<1x128x32xf32, #tpu.memory_space<vmem>>, %arg5: memref<1x32x128xf32, #tpu.memory_space<vmem>>, %arg6: memref<1x1x128xf32, #tpu.memory_space<vmem>>, %arg7: memref<1x1x128xi32, #tpu.memory_space<vmem>>, %arg8: memref<32x16xf32, #tpu.memory_space<vmem>>, %arg9: memref<32x16xf32, #tpu.memory_space<vmem>>, %arg10: memref<16x32xf32, #tpu.memory_space<vmem>>, %arg11: memref<1x16xf32, #tpu.memory_space<vmem>>, %arg12: memref<64x16xf32, #tpu.memory_space<vmem>>, %arg13: memref<1x64x128xf32, #tpu.memory_space<vmem>>, %arg14: memref<1x16x128xf32, #tpu.memory_space<vmem>>, %arg15: memref<64x16xf32, #tpu.memory_space<vmem>>, %arg16: memref<64x16xf32, #tpu.memory_space<vmem>>) attributes {dimension_semantics = [#tpu.dimension_semantics<parallel>], iteration_bounds = array<i64: 2>, scalar_prefetch = 0 : i64, scratch_operands = 4 : i64, tpu.core_type = #tpu.core_type<tc>, window_params = [{transform_indices = @transform_0, window_bounds = array<i64: 64, 32>}, {transform_indices = @transform_1, window_bounds = array<i64: 64, 1>}, {transform_indices = @transform_2, window_bounds = array<i64: 64, 1>}, {pipeline_mode = #tpu.pipeline_mode<synchronous>, transform_indices = @transform_3, window_bounds = array<i64: 1, 128, 32>}, {pipeline_mode = #tpu.pipeline_mode<synchronous>, transform_indices = @transform_4, window_bounds = array<i64: 1, 32, 128>}, {pipeline_mode = #tpu.pipeline_mode<synchronous>, transform_indices = @transform_5, window_bounds = array<i64: 1, 1, 128>}, {pipeline_mode = #tpu.pipeline_mode<synchronous>, transform_indices = @transform_6, window_bounds = array<i64: 1, 1, 128>}, {pipeline_mode = #tpu.pipeline_mode<synchronous>, transform_indices = @transform_7, window_bounds = array<i64: 32, 16>}, {pipeline_mode = #tpu.pipeline_mode<synchronous>, transform_indices = @transform_8, window_bounds = array<i64: 32, 16>}, {pipeline_mode = #tpu.pipeline_mode<synchronous>, transform_indices = @transform_9, window_bounds = array<i64: 16, 32>}, {pipeline_mode = #tpu.pipeline_mode<synchronous>, transform_indices = @transform_10, window_bounds = array<i64: 1, 16>}, {transform_indices = @transform_11, window_bounds = array<i64: 64, 16>}]} {
    %c0 = arith.constant 0 : index
    %c0_0 = arith.constant 0 : index
    %0 = vector.load %arg1[%c0, %c0_0] : memref<64x32xf32, #tpu.memory_space<vmem>>, vector<64x32xf32>
    %c0_1 = arith.constant 0 : index
    %c0_2 = arith.constant 0 : index
    %1 = vector.load %arg2[%c0_1, %c0_2] : memref<64x1xi32, #tpu.memory_space<vmem>>, vector<64x1xi32>
    %c0_3 = arith.constant 0 : index
    %c0_4 = arith.constant 0 : index
    %2 = vector.load %arg3[%c0_3, %c0_4] : memref<64x1xf32, #tpu.memory_space<vmem>>, vector<64x1xf32>
    %c0_5 = arith.constant 0 : index
    %c0_6 = arith.constant 0 : index
    %3 = vector.load %arg9[%c0_5, %c0_6] : memref<32x16xf32, #tpu.memory_space<vmem>>, vector<32x16xf32>
    %c0_7 = arith.constant 0 : index
    %c0_8 = arith.constant 0 : index
    %4 = vector.load %arg10[%c0_7, %c0_8] : memref<16x32xf32, #tpu.memory_space<vmem>>, vector<16x32xf32>
    %5 = arith.mulf %0, %0 : vector<64x32xf32>
    %cst = arith.constant dense<0.000000e+00> : vector<64xf32>
    %6 = vector.multi_reduction <add>, %5, %cst [1] : vector<64x32xf32> to vector<64xf32>
    %7 = vector.shape_cast %6 : vector<64xf32> to vector<64x1xf32>
    %c0_9 = arith.constant 0 : index
    %c0_10 = arith.constant 0 : index
    %8 = vector.load %arg8[%c0_9, %c0_10] : memref<32x16xf32, #tpu.memory_space<vmem>>, vector<32x16xf32>
    %cst_11 = arith.constant dense<0.000000e+00> : vector<64x16xf32>
    %9 = tpu.matmul %0, %8, %cst_11 {dimension_numbers = #tpu.dot_dimension_numbers<[1], [0], [0], [1], [0, 0, 1, 1], [], []>} : vector<64x32xf32>, vector<32x16xf32>, vector<64x16xf32> -> vector<64x16xf32>
    %c0_12 = arith.constant 0 : index
    %c0_13 = arith.constant 0 : index
    %10 = vector.load %arg11[%c0_12, %c0_13] : memref<1x16xf32, #tpu.memory_space<vmem>>, vector<1x16xf32>
    %11 = vector.broadcast %10 : vector<1x16xf32> to vector<64x16xf32>
    %12 = arith.addf %9, %11 : vector<64x16xf32>
    %c0_14 = arith.constant 0 : index
    %c0_15 = arith.constant 0 : index
    %13 = vector.load %arg15[%c0_14, %c0_15] : memref<64x16xf32, #tpu.memory_space<vmem>>, vector<64x16xf32>
    tpu.vector_store %arg15[%c0_14, %c0_15], %12 {strides = array<i32>} : memref<64x16xf32, #tpu.memory_space<vmem>>, vector<64x16xf32>,
    %cst_16 = arith.constant 0.000000e+00 : f32
    %14 = vector.broadcast %cst_16 : f32 to vector<64x1xf32>
    %cst_17 = arith.constant 0.000000e+00 : f32
    %15 = vector.broadcast %cst_17 : f32 to vector<64x16xf32>
    %c0_i32 = arith.constant 0 : i32
    %16 = arith.index_cast %c0_i32 : i32 to index
    %c0_18 = arith.constant 0 : index
    %c0_19 = arith.constant 0 : index
    %17 = vector.load %arg5[%16, %c0_18, %c0_19] : memref<1x32x128xf32, #tpu.memory_space<vmem>>, vector<1x32x128xf32>
    %18 = vector.shape_cast %17 : vector<1x32x128xf32> to vector<32x128xf32>
    %19 = arith.index_cast %c0_i32 : i32 to index
    %c0_20 = arith.constant 0 : index
    %c0_21 = arith.constant 0 : index
    %20 = vector.load %arg4[%19, %c0_20, %c0_21] : memref<1x128x32xf32, #tpu.memory_space<vmem>>, vector<1x128x32xf32>
    %21 = vector.shape_cast %20 : vector<1x128x32xf32> to vector<128x32xf32>
    %cst_22 = arith.constant dense<0.000000e+00> : vector<64x128xf32>
    %22 = tpu.matmul %0, %18, %cst_22 {dimension_numbers = #tpu.dot_dimension_numbers<[1], [0], [0], [1], [0, 0, 1, 1], [], []>} : vector<64x32xf32>, vector<32x128xf32>, vector<64x128xf32> -> vector<64x128xf32>
    %23 = arith.index_cast %c0_i32 : i32 to index
    %c0_23 = arith.constant 0 : index
    %c0_24 = arith.constant 0 : index
    %24 = vector.load %arg6[%23, %c0_23, %c0_24] : memref<1x1x128xf32, #tpu.memory_space<vmem>>, vector<1x1x128xf32>
    %25 = vector.shape_cast %24 : vector<1x1x128xf32> to vector<1x128xf32>
    %26 = vector.broadcast %7 : vector<64x1xf32> to vector<64x128xf32>
    %27 = vector.broadcast %25 : vector<1x128xf32> to vector<64x128xf32>
    %28 = arith.addf %26, %27 : vector<64x128xf32>
    %cst_25 = arith.constant 2.000000e+00 : f32
    %29 = vector.broadcast %cst_25 : f32 to vector<64x128xf32>
    %30 = arith.mulf %29, %22 : vector<64x128xf32>
    %31 = arith.subf %28, %30 : vector<64x128xf32>
    %cst_26 = arith.constant 0.000000e+00 : f32
    %32 = vector.broadcast %cst_26 : f32 to vector<64x128xf32>
    %33 = arith.maximumf %31, %32 : vector<64x128xf32>
    %34 = arith.index_cast %c0_i32 : i32 to index
    %c0_27 = arith.constant 0 : index
    %c0_28 = arith.constant 0 : index
    %35 = vector.load %arg7[%34, %c0_27, %c0_28] : memref<1x1x128xi32, #tpu.memory_space<vmem>>, vector<1x1x128xi32>
    %36 = vector.shape_cast %35 : vector<1x1x128xi32> to vector<1x128xi32>
    %37 = vector.broadcast %1 : vector<64x1xi32> to vector<64x128xi32>
    %38 = vector.broadcast %36 : vector<1x128xi32> to vector<64x128xi32>
    %39 = arith.cmpi eq, %37, %38 : vector<64x128xi32>
    %40 = vector.broadcast %2 : vector<64x1xf32> to vector<64x128xf32>
    %41 = arith.cmpf ole, %33, %40 : vector<64x128xf32>
    %42 = arith.andi %39, %41 : vector<64x128xi1>
    %43 = arith.extui %42 : vector<64x128xi1> to vector<64x128xi32>
    %44 = arith.sitofp %43 : vector<64x128xi32> to vector<64x128xf32>
    %45 = arith.index_cast %c0_i32 : i32 to index
    %c0_29 = arith.constant 0 : index
    %c0_30 = arith.constant 0 : index
    %46 = vector.load %arg13[%45, %c0_29, %c0_30] : memref<1x64x128xf32, #tpu.memory_space<vmem>>, vector<1x64x128xf32>
    %47 = vector.shape_cast %46 : vector<1x64x128xf32> to vector<64x128xf32>
    %48 = vector.shape_cast %44 : vector<64x128xf32> to vector<1x64x128xf32>
    tpu.vector_store %arg13[%45, %c0_29, %c0_30], %48 {strides = array<i32>} : memref<1x64x128xf32, #tpu.memory_space<vmem>>, vector<1x64x128xf32>,
    %cst_31 = arith.constant dense<0.000000e+00> : vector<16x128xf32>
    %49 = tpu.matmul %4, %18, %cst_31 {dimension_numbers = #tpu.dot_dimension_numbers<[1], [0], [0], [1], [0, 0, 1, 1], [], []>} : vector<16x32xf32>, vector<32x128xf32>, vector<16x128xf32> -> vector<16x128xf32>
    %50 = arith.index_cast %c0_i32 : i32 to index
    %c0_32 = arith.constant 0 : index
    %c0_33 = arith.constant 0 : index
    %51 = vector.load %arg14[%50, %c0_32, %c0_33] : memref<1x16x128xf32, #tpu.memory_space<vmem>>, vector<1x16x128xf32>
    %52 = vector.shape_cast %51 : vector<1x16x128xf32> to vector<16x128xf32>
    %53 = vector.shape_cast %49 : vector<16x128xf32> to vector<1x16x128xf32>
    tpu.vector_store %arg14[%50, %c0_32, %c0_33], %53 {strides = array<i32>} : memref<1x16x128xf32, #tpu.memory_space<vmem>>, vector<1x16x128xf32>,
    %cst_34 = arith.constant dense<0.000000e+00> : vector<128x16xf32>
    %54 = tpu.matmul %21, %3, %cst_34 {dimension_numbers = #tpu.dot_dimension_numbers<[1], [0], [0], [1], [0, 0, 1, 1], [], []>} : vector<128x32xf32>, vector<32x16xf32>, vector<128x16xf32> -> vector<128x16xf32>
    %cst_35 = arith.constant dense<0.000000e+00> : vector<64xf32>
    %55 = vector.multi_reduction <add>, %44, %cst_35 [1] : vector<64x128xf32> to vector<64xf32>
    %56 = vector.shape_cast %55 : vector<64xf32> to vector<64x1xf32>
    %57 = arith.addf %14, %56 : vector<64x1xf32>
    %cst_36 = arith.constant dense<0.000000e+00> : vector<64x16xf32>
    %58 = tpu.matmul %44, %54, %cst_36 {dimension_numbers = #tpu.dot_dimension_numbers<[1], [0], [0], [1], [0, 0, 1, 1], [], []>} : vector<64x128xf32>, vector<128x16xf32>, vector<64x16xf32> -> vector<64x16xf32>
    %59 = arith.addf %15, %58 : vector<64x16xf32>
    %c1_i32 = arith.constant 1 : i32
    %c0_i32_37 = arith.constant 0 : i32
    %c8_i32 = arith.constant 8 : i32
    %60 = arith.addi %c0_i32_37, %c8_i32 : i32
    %c1_i32_38 = arith.constant 1 : i32
    scf.for %arg17 = %c0_i32_37 to %60 step %c1_i32_38  : i32 {
      %c8_i32_47 = arith.constant 8 : i32
      %76 = arith.muli %arg17, %c8_i32_47 : i32
      %77 = tpu.assume_multiple %76, 8 : i32
      %78 = arith.index_cast %77 : i32 to index
      %c0_48 = arith.constant 0 : index
      %79 = vector.load %arg15[%78, %c0_48] : memref<64x16xf32, #tpu.memory_space<vmem>>, vector<8x16xf32>
      %cst_49 = arith.constant 0.000000e+00 : f32
      %80 = vector.broadcast %cst_49 : f32 to vector<8x16xf32>
      %c0_i32_50 = arith.constant 0 : i32
      %81 = arith.index_cast %c0_i32_50 : i32 to index
      %c0_51 = arith.constant 0 : index
      %c0_52 = arith.constant 0 : index
      %82 = vector.load %arg14[%81, %c0_51, %c0_52] : memref<1x16x128xf32, #tpu.memory_space<vmem>>, vector<1x16x128xf32>
      %83 = vector.shape_cast %82 : vector<1x16x128xf32> to vector<16x128xf32>
      %84 = arith.index_cast %c0_i32_50 : i32 to index
      %85 = arith.index_cast %77 : i32 to index
      %c0_53 = arith.constant 0 : index
      %86 = vector.load %arg13[%84, %85, %c0_53] : memref<1x64x128xf32, #tpu.memory_space<vmem>>, vector<1x8x128xf32>
      %87 = vector.shape_cast %86 : vector<1x8x128xf32> to vector<8x128xf32>
      %88 = vector.shape_cast %79 : vector<8x16xf32> to vector<8x16x1xf32>
      %89 = vector.shape_cast %83 : vector<16x128xf32> to vector<1x16x128xf32>
      %90 = vector.broadcast %88 : vector<8x16x1xf32> to vector<8x16x128xf32>
      %91 = vector.broadcast %89 : vector<1x16x128xf32> to vector<8x16x128xf32>
      %92 = arith.addf %90, %91 : vector<8x16x128xf32>
      %cst_54 = arith.constant 0.000000e+00 : f32
      %93 = vector.broadcast %cst_54 : f32 to vector<8x16x128xf32>
      %94 = arith.maximumf %92, %93 : vector<8x16x128xf32>
      %95 = vector.shape_cast %87 : vector<8x128xf32> to vector<8x1x128xf32>
      %96 = vector.broadcast %95 : vector<8x1x128xf32> to vector<8x16x128xf32>
      %97 = arith.mulf %94, %96 : vector<8x16x128xf32>
      %cst_55 = arith.constant dense<0.000000e+00> : vector<8x16xf32>
      %98 = vector.multi_reduction <add>, %97, %cst_55 [2] : vector<8x16x128xf32> to vector<8x16xf32>
      %99 = arith.addf %80, %98 : vector<8x16xf32>
      %c1_i32_56 = arith.constant 1 : i32
      %100 = arith.index_cast %77 : i32 to index
      %c0_57 = arith.constant 0 : index
      %101 = vector.load %arg16[%100, %c0_57] : memref<64x16xf32, #tpu.memory_space<vmem>>, vector<8x16xf32>
      tpu.vector_store %arg16[%100, %c0_57], %99 {strides = array<i32>} : memref<64x16xf32, #tpu.memory_space<vmem>>, vector<8x16xf32>,
    }
    %c8_i32_39 = arith.constant 8 : i32
    %cst_40 = arith.constant 1.000000e+00 : f32
    %61 = vector.broadcast %cst_40 : f32 to vector<64x1xf32>
    %62 = arith.maximumf %57, %61 : vector<64x1xf32>
    %63 = tpu.reciprocal %62 {approx = true} : vector<64x1xf32> -> vector<64x1xf32>
    %64 = vector.broadcast %57 : vector<64x1xf32> to vector<64x16xf32>
    %65 = arith.mulf %12, %64 : vector<64x16xf32>
    %66 = arith.addf %65, %59 : vector<64x16xf32>
    %cst_41 = arith.constant 0.00999999977 : f32
    %67 = vector.broadcast %cst_41 : f32 to vector<64x16xf32>
    %68 = arith.mulf %67, %66 : vector<64x16xf32>
    %c0_42 = arith.constant 0 : index
    %c0_43 = arith.constant 0 : index
    %69 = vector.load %arg16[%c0_42, %c0_43] : memref<64x16xf32, #tpu.memory_space<vmem>>, vector<64x16xf32>
    %cst_44 = arith.constant 9.900000e-01 : f32
    %70 = vector.broadcast %cst_44 : f32 to vector<64x16xf32>
    %71 = arith.mulf %70, %69 : vector<64x16xf32>
    %72 = arith.addf %68, %71 : vector<64x16xf32>
    %73 = vector.broadcast %63 : vector<64x1xf32> to vector<64x16xf32>
    %74 = arith.mulf %72, %73 : vector<64x16xf32>
    %c0_45 = arith.constant 0 : index
    %c0_46 = arith.constant 0 : index
    %75 = vector.load %arg12[%c0_45, %c0_46] : memref<64x16xf32, #tpu.memory_space<vmem>>, vector<64x16xf32>
    tpu.vector_store %arg12[%c0_45, %c0_46], %74 {strides = array<i32>} : memref<64x16xf32, #tpu.memory_space<vmem>>, vector<64x16xf32>,
    return
  }
  func.func @transform_0(%arg0: i32) -> (i32, i32) {
    %c0_i32 = arith.constant 0 : i32
    %c0_i32_0 = arith.constant 0 : i32
    return %arg0, %c0_i32 : i32, i32
  }
  func.func @transform_1(%arg0: i32) -> (i32, i32) {
    %c0_i32 = arith.constant 0 : i32
    %c0_i32_0 = arith.constant 0 : i32
    return %arg0, %c0_i32 : i32, i32
  }
  func.func @transform_2(%arg0: i32) -> (i32, i32) {
    %c0_i32 = arith.constant 0 : i32
    %c0_i32_0 = arith.constant 0 : i32
    return %arg0, %c0_i32 : i32, i32
  }
  func.func @transform_3(%arg0: i32) -> (i32, i32, i32) {
    %c0_i32 = arith.constant 0 : i32
    %c0_i32_0 = arith.constant 0 : i32
    %c0_i32_1 = arith.constant 0 : i32
    %c0_i32_2 = arith.constant 0 : i32
    return %c0_i32, %c0_i32_0, %c0_i32_1 : i32, i32, i32
  }
  func.func @transform_4(%arg0: i32) -> (i32, i32, i32) {
    %c0_i32 = arith.constant 0 : i32
    %c0_i32_0 = arith.constant 0 : i32
    %c0_i32_1 = arith.constant 0 : i32
    %c0_i32_2 = arith.constant 0 : i32
    return %c0_i32, %c0_i32_0, %c0_i32_1 : i32, i32, i32
  }
  func.func @transform_5(%arg0: i32) -> (i32, i32, i32) {
    %c0_i32 = arith.constant 0 : i32
    %c0_i32_0 = arith.constant 0 : i32
    %c0_i32_1 = arith.constant 0 : i32
    %c0_i32_2 = arith.constant 0 : i32
    return %c0_i32, %c0_i32_0, %c0_i32_1 : i32, i32, i32
  }
  func.func @transform_6(%arg0: i32) -> (i32, i32, i32) {
    %c0_i32 = arith.constant 0 : i32
    %c0_i32_0 = arith.constant 0 : i32
    %c0_i32_1 = arith.constant 0 : i32
    %c0_i32_2 = arith.constant 0 : i32
    return %c0_i32, %c0_i32_0, %c0_i32_1 : i32, i32, i32
  }
  func.func @transform_7(%arg0: i32) -> (i32, i32) {
    %c0_i32 = arith.constant 0 : i32
    %c0_i32_0 = arith.constant 0 : i32
    %c0_i32_1 = arith.constant 0 : i32
    return %c0_i32, %c0_i32_0 : i32, i32
  }
  func.func @transform_8(%arg0: i32) -> (i32, i32) {
    %c0_i32 = arith.constant 0 : i32
    %c0_i32_0 = arith.constant 0 : i32
    %c0_i32_1 = arith.constant 0 : i32
    return %c0_i32, %c0_i32_0 : i32, i32
  }
  func.func @transform_9(%arg0: i32) -> (i32, i32) {
    %c0_i32 = arith.constant 0 : i32
    %c0_i32_0 = arith.constant 0 : i32
    %c0_i32_1 = arith.constant 0 : i32
    return %c0_i32, %c0_i32_0 : i32, i32
  }
  func.func @transform_10(%arg0: i32) -> (i32, i32) {
    %c0_i32 = arith.constant 0 : i32
    %c0_i32_0 = arith.constant 0 : i32
    %c0_i32_1 = arith.constant 0 : i32
    return %c0_i32, %c0_i32_0 : i32, i32
  }
  func.func @transform_11(%arg0: i32) -> (i32, i32) {
    %c0_i32 = arith.constant 0 : i32
    %c0_i32_0 = arith.constant 0 : i32
    return %arg0, %c0_i32 : i32, i32
  }
}

module attributes {stable_mosaic.version = 11 : i64} {
  func.func @_dist_kernel(%arg0: i32, %arg1: memref<64x16xf32, #tpu.memory_space<vmem>>, %arg2: memref<64x1xi32, #tpu.memory_space<vmem>>, %arg3: memref<16x128xf32, #tpu.memory_space<vmem>>, %arg4: memref<1x128xf32, #tpu.memory_space<vmem>>, %arg5: memref<1x128xi32, #tpu.memory_space<vmem>>, %arg6: memref<64x128xf32, #tpu.memory_space<vmem>>) attributes {dimension_semantics = [#tpu.dimension_semantics<parallel>], iteration_bounds = array<i64: 2>, scalar_prefetch = 0 : i64, scratch_operands = 0 : i64, tpu.core_type = #tpu.core_type<tc>, window_params = [{transform_indices = @transform_0, window_bounds = array<i64: 64, 16>}, {transform_indices = @transform_1, window_bounds = array<i64: 64, 1>}, {pipeline_mode = #tpu.pipeline_mode<synchronous>, transform_indices = @transform_2, window_bounds = array<i64: 16, 128>}, {pipeline_mode = #tpu.pipeline_mode<synchronous>, transform_indices = @transform_3, window_bounds = array<i64: 1, 128>}, {pipeline_mode = #tpu.pipeline_mode<synchronous>, transform_indices = @transform_4, window_bounds = array<i64: 1, 128>}, {transform_indices = @transform_5, window_bounds = array<i64: 64, 128>}]} {
    %c0 = arith.constant 0 : index
    %c0_0 = arith.constant 0 : index
    %0 = vector.load %arg1[%c0, %c0_0] : memref<64x16xf32, #tpu.memory_space<vmem>>, vector<64x16xf32>
    %1 = arith.mulf %0, %0 : vector<64x16xf32>
    %cst = arith.constant dense<0.000000e+00> : vector<64xf32>
    %2 = vector.multi_reduction <add>, %1, %cst [1] : vector<64x16xf32> to vector<64xf32>
    %3 = vector.shape_cast %2 : vector<64xf32> to vector<64x1xf32>
    %c0_1 = arith.constant 0 : index
    %c0_2 = arith.constant 0 : index
    %4 = vector.load %arg3[%c0_1, %c0_2] : memref<16x128xf32, #tpu.memory_space<vmem>>, vector<16x128xf32>
    %cst_3 = arith.constant dense<0.000000e+00> : vector<64x128xf32>
    %5 = tpu.matmul %0, %4, %cst_3 {dimension_numbers = #tpu.dot_dimension_numbers<[1], [0], [0], [1], [0, 0, 1, 1], [], []>} : vector<64x16xf32>, vector<16x128xf32>, vector<64x128xf32> -> vector<64x128xf32>
    %c0_4 = arith.constant 0 : index
    %c0_5 = arith.constant 0 : index
    %6 = vector.load %arg4[%c0_4, %c0_5] : memref<1x128xf32, #tpu.memory_space<vmem>>, vector<1x128xf32>
    %7 = vector.broadcast %3 : vector<64x1xf32> to vector<64x128xf32>
    %8 = vector.broadcast %6 : vector<1x128xf32> to vector<64x128xf32>
    %9 = arith.addf %7, %8 : vector<64x128xf32>
    %cst_6 = arith.constant 2.000000e+00 : f32
    %10 = vector.broadcast %cst_6 : f32 to vector<64x128xf32>
    %11 = arith.mulf %10, %5 : vector<64x128xf32>
    %12 = arith.subf %9, %11 : vector<64x128xf32>
    %cst_7 = arith.constant 0.000000e+00 : f32
    %13 = vector.broadcast %cst_7 : f32 to vector<64x128xf32>
    %14 = arith.maximumf %12, %13 : vector<64x128xf32>
    %c0_8 = arith.constant 0 : index
    %c0_9 = arith.constant 0 : index
    %15 = vector.load %arg2[%c0_8, %c0_9] : memref<64x1xi32, #tpu.memory_space<vmem>>, vector<64x1xi32>
    %c0_10 = arith.constant 0 : index
    %c0_11 = arith.constant 0 : index
    %16 = vector.load %arg5[%c0_10, %c0_11] : memref<1x128xi32, #tpu.memory_space<vmem>>, vector<1x128xi32>
    %17 = vector.broadcast %15 : vector<64x1xi32> to vector<64x128xi32>
    %18 = vector.broadcast %16 : vector<1x128xi32> to vector<64x128xi32>
    %19 = arith.cmpi eq, %17, %18 : vector<64x128xi32>
    %cst_12 = arith.constant 1.000000e+30 : f32
    %20 = vector.broadcast %cst_12 : f32 to vector<64x128xf32>
    %21 = arith.select %19, %14, %20 : vector<64x128xi1>, vector<64x128xf32>
    %c0_13 = arith.constant 0 : index
    %c0_14 = arith.constant 0 : index
    %22 = vector.load %arg6[%c0_13, %c0_14] : memref<64x128xf32, #tpu.memory_space<vmem>>, vector<64x128xf32>
    tpu.vector_store %arg6[%c0_13, %c0_14], %21 {strides = array<i32>} : memref<64x128xf32, #tpu.memory_space<vmem>>, vector<64x128xf32>,
    return
  }
  func.func @transform_0(%arg0: i32) -> (i32, i32) {
    %c0_i32 = arith.constant 0 : i32
    %c0_i32_0 = arith.constant 0 : i32
    return %arg0, %c0_i32 : i32, i32
  }
  func.func @transform_1(%arg0: i32) -> (i32, i32) {
    %c0_i32 = arith.constant 0 : i32
    %c0_i32_0 = arith.constant 0 : i32
    return %arg0, %c0_i32 : i32, i32
  }
  func.func @transform_2(%arg0: i32) -> (i32, i32) {
    %c0_i32 = arith.constant 0 : i32
    %c0_i32_0 = arith.constant 0 : i32
    %c0_i32_1 = arith.constant 0 : i32
    return %c0_i32, %c0_i32_0 : i32, i32
  }
  func.func @transform_3(%arg0: i32) -> (i32, i32) {
    %c0_i32 = arith.constant 0 : i32
    %c0_i32_0 = arith.constant 0 : i32
    %c0_i32_1 = arith.constant 0 : i32
    return %c0_i32, %c0_i32_0 : i32, i32
  }
  func.func @transform_4(%arg0: i32) -> (i32, i32) {
    %c0_i32 = arith.constant 0 : i32
    %c0_i32_0 = arith.constant 0 : i32
    %c0_i32_1 = arith.constant 0 : i32
    return %c0_i32, %c0_i32_0 : i32, i32
  }
  func.func @transform_5(%arg0: i32) -> (i32, i32) {
    %c0_i32 = arith.constant 0 : i32
    %c0_i32_0 = arith.constant 0 : i32
    return %arg0, %c0_i32 : i32, i32
  }
}

module attributes {stable_mosaic.version = 11 : i64} {
  func.func @kernel(%arg0: i32, %arg1: memref<64x16xf32, #tpu.memory_space<vmem>>, %arg2: memref<64x1xi32, #tpu.memory_space<vmem>>, %arg3: memref<64x1xf32, #tpu.memory_space<vmem>>, %arg4: memref<1x128x16xf32, #tpu.memory_space<vmem>>, %arg5: memref<1x16x128xf32, #tpu.memory_space<vmem>>, %arg6: memref<1x1x128xf32, #tpu.memory_space<vmem>>, %arg7: memref<1x1x128xi32, #tpu.memory_space<vmem>>, %arg8: memref<16x32xf32, #tpu.memory_space<vmem>>, %arg9: memref<16x32xf32, #tpu.memory_space<vmem>>, %arg10: memref<32x16xf32, #tpu.memory_space<vmem>>, %arg11: memref<1x32xf32, #tpu.memory_space<vmem>>, %arg12: memref<32x64xf32, #tpu.memory_space<vmem>>, %arg13: memref<1x64xf32, #tpu.memory_space<vmem>>, %arg14: memref<64x32xf32, #tpu.memory_space<vmem>>, %arg15: memref<1x32xf32, #tpu.memory_space<vmem>>, %arg16: memref<32x4xf32, #tpu.memory_space<vmem>>, %arg17: memref<1x4xf32, #tpu.memory_space<vmem>>, %arg18: memref<4x1xf32, #tpu.memory_space<vmem>>, %arg19: memref<1x1xf32, #tpu.memory_space<vmem>>, %arg20: memref<64x1xf32, #tpu.memory_space<vmem>>, %arg21: memref<1x64x128xf32, #tpu.memory_space<vmem>>, %arg22: memref<1x32x128xf32, #tpu.memory_space<vmem>>, %arg23: memref<64x32xf32, #tpu.memory_space<vmem>>, %arg24: memref<64x32xf32, #tpu.memory_space<vmem>>) attributes {dimension_semantics = [#tpu.dimension_semantics<parallel>], iteration_bounds = array<i64: 2>, scalar_prefetch = 0 : i64, scratch_operands = 4 : i64, tpu.core_type = #tpu.core_type<tc>, window_params = [{transform_indices = @transform_0, window_bounds = array<i64: 64, 16>}, {transform_indices = @transform_1, window_bounds = array<i64: 64, 1>}, {transform_indices = @transform_2, window_bounds = array<i64: 64, 1>}, {pipeline_mode = #tpu.pipeline_mode<synchronous>, transform_indices = @transform_3, window_bounds = array<i64: 1, 128, 16>}, {pipeline_mode = #tpu.pipeline_mode<synchronous>, transform_indices = @transform_4, window_bounds = array<i64: 1, 16, 128>}, {pipeline_mode = #tpu.pipeline_mode<synchronous>, transform_indices = @transform_5, window_bounds = array<i64: 1, 1, 128>}, {pipeline_mode = #tpu.pipeline_mode<synchronous>, transform_indices = @transform_6, window_bounds = array<i64: 1, 1, 128>}, {pipeline_mode = #tpu.pipeline_mode<synchronous>, transform_indices = @transform_7, window_bounds = array<i64: 16, 32>}, {pipeline_mode = #tpu.pipeline_mode<synchronous>, transform_indices = @transform_8, window_bounds = array<i64: 16, 32>}, {pipeline_mode = #tpu.pipeline_mode<synchronous>, transform_indices = @transform_9, window_bounds = array<i64: 32, 16>}, {pipeline_mode = #tpu.pipeline_mode<synchronous>, transform_indices = @transform_10, window_bounds = array<i64: 1, 32>}, {pipeline_mode = #tpu.pipeline_mode<synchronous>, transform_indices = @transform_11, window_bounds = array<i64: 32, 64>}, {pipeline_mode = #tpu.pipeline_mode<synchronous>, transform_indices = @transform_12, window_bounds = array<i64: 1, 64>}, {pipeline_mode = #tpu.pipeline_mode<synchronous>, transform_indices = @transform_13, window_bounds = array<i64: 64, 32>}, {pipeline_mode = #tpu.pipeline_mode<synchronous>, transform_indices = @transform_14, window_bounds = array<i64: 1, 32>}, {pipeline_mode = #tpu.pipeline_mode<synchronous>, transform_indices = @transform_15, window_bounds = array<i64: 32, 4>}, {pipeline_mode = #tpu.pipeline_mode<synchronous>, transform_indices = @transform_16, window_bounds = array<i64: 1, 4>}, {pipeline_mode = #tpu.pipeline_mode<synchronous>, transform_indices = @transform_17, window_bounds = array<i64: 4, 1>}, {pipeline_mode = #tpu.pipeline_mode<synchronous>, transform_indices = @transform_18, window_bounds = array<i64: 1, 1>}, {transform_indices = @transform_19, window_bounds = array<i64: 64, 1>}]} {
    %c0 = arith.constant 0 : index
    %c0_0 = arith.constant 0 : index
    %0 = vector.load %arg1[%c0, %c0_0] : memref<64x16xf32, #tpu.memory_space<vmem>>, vector<64x16xf32>
    %c0_1 = arith.constant 0 : index
    %c0_2 = arith.constant 0 : index
    %1 = vector.load %arg2[%c0_1, %c0_2] : memref<64x1xi32, #tpu.memory_space<vmem>>, vector<64x1xi32>
    %c0_3 = arith.constant 0 : index
    %c0_4 = arith.constant 0 : index
    %2 = vector.load %arg3[%c0_3, %c0_4] : memref<64x1xf32, #tpu.memory_space<vmem>>, vector<64x1xf32>
    %c0_5 = arith.constant 0 : index
    %c0_6 = arith.constant 0 : index
    %3 = vector.load %arg9[%c0_5, %c0_6] : memref<16x32xf32, #tpu.memory_space<vmem>>, vector<16x32xf32>
    %c0_7 = arith.constant 0 : index
    %c0_8 = arith.constant 0 : index
    %4 = vector.load %arg10[%c0_7, %c0_8] : memref<32x16xf32, #tpu.memory_space<vmem>>, vector<32x16xf32>
    %5 = arith.mulf %0, %0 : vector<64x16xf32>
    %cst = arith.constant dense<0.000000e+00> : vector<64xf32>
    %6 = vector.multi_reduction <add>, %5, %cst [1] : vector<64x16xf32> to vector<64xf32>
    %7 = vector.shape_cast %6 : vector<64xf32> to vector<64x1xf32>
    %c0_9 = arith.constant 0 : index
    %c0_10 = arith.constant 0 : index
    %8 = vector.load %arg8[%c0_9, %c0_10] : memref<16x32xf32, #tpu.memory_space<vmem>>, vector<16x32xf32>
    %cst_11 = arith.constant dense<0.000000e+00> : vector<64x32xf32>
    %9 = tpu.matmul %0, %8, %cst_11 {dimension_numbers = #tpu.dot_dimension_numbers<[1], [0], [0], [1], [0, 0, 1, 1], [], []>} : vector<64x16xf32>, vector<16x32xf32>, vector<64x32xf32> -> vector<64x32xf32>
    %c0_12 = arith.constant 0 : index
    %c0_13 = arith.constant 0 : index
    %10 = vector.load %arg11[%c0_12, %c0_13] : memref<1x32xf32, #tpu.memory_space<vmem>>, vector<1x32xf32>
    %11 = vector.broadcast %10 : vector<1x32xf32> to vector<64x32xf32>
    %12 = arith.addf %9, %11 : vector<64x32xf32>
    %c0_14 = arith.constant 0 : index
    %c0_15 = arith.constant 0 : index
    %13 = vector.load %arg23[%c0_14, %c0_15] : memref<64x32xf32, #tpu.memory_space<vmem>>, vector<64x32xf32>
    tpu.vector_store %arg23[%c0_14, %c0_15], %12 {strides = array<i32>} : memref<64x32xf32, #tpu.memory_space<vmem>>, vector<64x32xf32>,
    %cst_16 = arith.constant 0.000000e+00 : f32
    %14 = vector.broadcast %cst_16 : f32 to vector<64x1xf32>
    %cst_17 = arith.constant 0.000000e+00 : f32
    %15 = vector.broadcast %cst_17 : f32 to vector<64x32xf32>
    %c0_i32 = arith.constant 0 : i32
    %16 = arith.index_cast %c0_i32 : i32 to index
    %c0_18 = arith.constant 0 : index
    %c0_19 = arith.constant 0 : index
    %17 = vector.load %arg5[%16, %c0_18, %c0_19] : memref<1x16x128xf32, #tpu.memory_space<vmem>>, vector<1x16x128xf32>
    %18 = vector.shape_cast %17 : vector<1x16x128xf32> to vector<16x128xf32>
    %19 = arith.index_cast %c0_i32 : i32 to index
    %c0_20 = arith.constant 0 : index
    %c0_21 = arith.constant 0 : index
    %20 = vector.load %arg4[%19, %c0_20, %c0_21] : memref<1x128x16xf32, #tpu.memory_space<vmem>>, vector<1x128x16xf32>
    %21 = vector.shape_cast %20 : vector<1x128x16xf32> to vector<128x16xf32>
    %cst_22 = arith.constant dense<0.000000e+00> : vector<64x128xf32>
    %22 = tpu.matmul %0, %18, %cst_22 {dimension_numbers = #tpu.dot_dimension_numbers<[1], [0], [0], [1], [0, 0, 1, 1], [], []>} : vector<64x16xf32>, vector<16x128xf32>, vector<64x128xf32> -> vector<64x128xf32>
    %23 = arith.index_cast %c0_i32 : i32 to index
    %c0_23 = arith.constant 0 : index
    %c0_24 = arith.constant 0 : index
    %24 = vector.load %arg6[%23, %c0_23, %c0_24] : memref<1x1x128xf32, #tpu.memory_space<vmem>>, vector<1x1x128xf32>
    %25 = vector.shape_cast %24 : vector<1x1x128xf32> to vector<1x128xf32>
    %26 = vector.broadcast %7 : vector<64x1xf32> to vector<64x128xf32>
    %27 = vector.broadcast %25 : vector<1x128xf32> to vector<64x128xf32>
    %28 = arith.addf %26, %27 : vector<64x128xf32>
    %cst_25 = arith.constant 2.000000e+00 : f32
    %29 = vector.broadcast %cst_25 : f32 to vector<64x128xf32>
    %30 = arith.mulf %29, %22 : vector<64x128xf32>
    %31 = arith.subf %28, %30 : vector<64x128xf32>
    %cst_26 = arith.constant 0.000000e+00 : f32
    %32 = vector.broadcast %cst_26 : f32 to vector<64x128xf32>
    %33 = arith.maximumf %31, %32 : vector<64x128xf32>
    %34 = arith.index_cast %c0_i32 : i32 to index
    %c0_27 = arith.constant 0 : index
    %c0_28 = arith.constant 0 : index
    %35 = vector.load %arg7[%34, %c0_27, %c0_28] : memref<1x1x128xi32, #tpu.memory_space<vmem>>, vector<1x1x128xi32>
    %36 = vector.shape_cast %35 : vector<1x1x128xi32> to vector<1x128xi32>
    %37 = vector.broadcast %1 : vector<64x1xi32> to vector<64x128xi32>
    %38 = vector.broadcast %36 : vector<1x128xi32> to vector<64x128xi32>
    %39 = arith.cmpi eq, %37, %38 : vector<64x128xi32>
    %40 = vector.broadcast %2 : vector<64x1xf32> to vector<64x128xf32>
    %41 = arith.cmpf ole, %33, %40 : vector<64x128xf32>
    %42 = arith.andi %39, %41 : vector<64x128xi1>
    %43 = arith.extui %42 : vector<64x128xi1> to vector<64x128xi32>
    %44 = arith.sitofp %43 : vector<64x128xi32> to vector<64x128xf32>
    %45 = arith.index_cast %c0_i32 : i32 to index
    %c0_29 = arith.constant 0 : index
    %c0_30 = arith.constant 0 : index
    %46 = vector.load %arg21[%45, %c0_29, %c0_30] : memref<1x64x128xf32, #tpu.memory_space<vmem>>, vector<1x64x128xf32>
    %47 = vector.shape_cast %46 : vector<1x64x128xf32> to vector<64x128xf32>
    %48 = vector.shape_cast %44 : vector<64x128xf32> to vector<1x64x128xf32>
    tpu.vector_store %arg21[%45, %c0_29, %c0_30], %48 {strides = array<i32>} : memref<1x64x128xf32, #tpu.memory_space<vmem>>, vector<1x64x128xf32>,
    %cst_31 = arith.constant dense<0.000000e+00> : vector<32x128xf32>
    %49 = tpu.matmul %4, %18, %cst_31 {dimension_numbers = #tpu.dot_dimension_numbers<[1], [0], [0], [1], [0, 0, 1, 1], [], []>} : vector<32x16xf32>, vector<16x128xf32>, vector<32x128xf32> -> vector<32x128xf32>
    %50 = arith.index_cast %c0_i32 : i32 to index
    %c0_32 = arith.constant 0 : index
    %c0_33 = arith.constant 0 : index
    %51 = vector.load %arg22[%50, %c0_32, %c0_33] : memref<1x32x128xf32, #tpu.memory_space<vmem>>, vector<1x32x128xf32>
    %52 = vector.shape_cast %51 : vector<1x32x128xf32> to vector<32x128xf32>
    %53 = vector.shape_cast %49 : vector<32x128xf32> to vector<1x32x128xf32>
    tpu.vector_store %arg22[%50, %c0_32, %c0_33], %53 {strides = array<i32>} : memref<1x32x128xf32, #tpu.memory_space<vmem>>, vector<1x32x128xf32>,
    %cst_34 = arith.constant dense<0.000000e+00> : vector<128x32xf32>
    %54 = tpu.matmul %21, %3, %cst_34 {dimension_numbers = #tpu.dot_dimension_numbers<[1], [0], [0], [1], [0, 0, 1, 1], [], []>} : vector<128x16xf32>, vector<16x32xf32>, vector<128x32xf32> -> vector<128x32xf32>
    %cst_35 = arith.constant dense<0.000000e+00> : vector<64xf32>
    %55 = vector.multi_reduction <add>, %44, %cst_35 [1] : vector<64x128xf32> to vector<64xf32>
    %56 = vector.shape_cast %55 : vector<64xf32> to vector<64x1xf32>
    %57 = arith.addf %14, %56 : vector<64x1xf32>
    %cst_36 = arith.constant dense<0.000000e+00> : vector<64x32xf32>
    %58 = tpu.matmul %44, %54, %cst_36 {dimension_numbers = #tpu.dot_dimension_numbers<[1], [0], [0], [1], [0, 0, 1, 1], [], []>} : vector<64x128xf32>, vector<128x32xf32>, vector<64x32xf32> -> vector<64x32xf32>
    %59 = arith.addf %15, %58 : vector<64x32xf32>
    %c1_i32 = arith.constant 1 : i32
    %c0_i32_37 = arith.constant 0 : i32
    %c8_i32 = arith.constant 8 : i32
    %60 = arith.addi %c0_i32_37, %c8_i32 : i32
    %c1_i32_38 = arith.constant 1 : i32
    scf.for %arg25 = %c0_i32_37 to %60 step %c1_i32_38  : i32 {
      %c8_i32_73 = arith.constant 8 : i32
      %111 = arith.muli %arg25, %c8_i32_73 : i32
      %112 = tpu.assume_multiple %111, 8 : i32
      %113 = arith.index_cast %112 : i32 to index
      %c0_74 = arith.constant 0 : index
      %114 = vector.load %arg23[%113, %c0_74] : memref<64x32xf32, #tpu.memory_space<vmem>>, vector<8x32xf32>
      %cst_75 = arith.constant 0.000000e+00 : f32
      %115 = vector.broadcast %cst_75 : f32 to vector<8x32xf32>
      %c0_i32_76 = arith.constant 0 : i32
      %116 = arith.index_cast %c0_i32_76 : i32 to index
      %c0_77 = arith.constant 0 : index
      %c0_78 = arith.constant 0 : index
      %117 = vector.load %arg22[%116, %c0_77, %c0_78] : memref<1x32x128xf32, #tpu.memory_space<vmem>>, vector<1x32x128xf32>
      %118 = vector.shape_cast %117 : vector<1x32x128xf32> to vector<32x128xf32>
      %119 = arith.index_cast %c0_i32_76 : i32 to index
      %120 = arith.index_cast %112 : i32 to index
      %c0_79 = arith.constant 0 : index
      %121 = vector.load %arg21[%119, %120, %c0_79] : memref<1x64x128xf32, #tpu.memory_space<vmem>>, vector<1x8x128xf32>
      %122 = vector.shape_cast %121 : vector<1x8x128xf32> to vector<8x128xf32>
      %123 = vector.shape_cast %114 : vector<8x32xf32> to vector<8x32x1xf32>
      %124 = vector.shape_cast %118 : vector<32x128xf32> to vector<1x32x128xf32>
      %125 = vector.broadcast %123 : vector<8x32x1xf32> to vector<8x32x128xf32>
      %126 = vector.broadcast %124 : vector<1x32x128xf32> to vector<8x32x128xf32>
      %127 = arith.addf %125, %126 : vector<8x32x128xf32>
      %cst_80 = arith.constant 0.000000e+00 : f32
      %128 = vector.broadcast %cst_80 : f32 to vector<8x32x128xf32>
      %129 = arith.maximumf %127, %128 : vector<8x32x128xf32>
      %130 = vector.shape_cast %122 : vector<8x128xf32> to vector<8x1x128xf32>
      %131 = vector.broadcast %130 : vector<8x1x128xf32> to vector<8x32x128xf32>
      %132 = arith.mulf %129, %131 : vector<8x32x128xf32>
      %cst_81 = arith.constant dense<0.000000e+00> : vector<8x32xf32>
      %133 = vector.multi_reduction <add>, %132, %cst_81 [2] : vector<8x32x128xf32> to vector<8x32xf32>
      %134 = arith.addf %115, %133 : vector<8x32xf32>
      %c1_i32_82 = arith.constant 1 : i32
      %135 = arith.index_cast %112 : i32 to index
      %c0_83 = arith.constant 0 : index
      %136 = vector.load %arg24[%135, %c0_83] : memref<64x32xf32, #tpu.memory_space<vmem>>, vector<8x32xf32>
      tpu.vector_store %arg24[%135, %c0_83], %134 {strides = array<i32>} : memref<64x32xf32, #tpu.memory_space<vmem>>, vector<8x32xf32>,
    }
    %c8_i32_39 = arith.constant 8 : i32
    %cst_40 = arith.constant 1.000000e+00 : f32
    %61 = vector.broadcast %cst_40 : f32 to vector<64x1xf32>
    %62 = arith.maximumf %57, %61 : vector<64x1xf32>
    %63 = tpu.reciprocal %62 {approx = true} : vector<64x1xf32> -> vector<64x1xf32>
    %64 = vector.broadcast %57 : vector<64x1xf32> to vector<64x32xf32>
    %65 = arith.mulf %12, %64 : vector<64x32xf32>
    %66 = arith.addf %65, %59 : vector<64x32xf32>
    %cst_41 = arith.constant 0.00999999977 : f32
    %67 = vector.broadcast %cst_41 : f32 to vector<64x32xf32>
    %68 = arith.mulf %67, %66 : vector<64x32xf32>
    %c0_42 = arith.constant 0 : index
    %c0_43 = arith.constant 0 : index
    %69 = vector.load %arg24[%c0_42, %c0_43] : memref<64x32xf32, #tpu.memory_space<vmem>>, vector<64x32xf32>
    %cst_44 = arith.constant 9.900000e-01 : f32
    %70 = vector.broadcast %cst_44 : f32 to vector<64x32xf32>
    %71 = arith.mulf %70, %69 : vector<64x32xf32>
    %72 = arith.addf %68, %71 : vector<64x32xf32>
    %73 = vector.broadcast %63 : vector<64x1xf32> to vector<64x32xf32>
    %74 = arith.mulf %72, %73 : vector<64x32xf32>
    %c0_45 = arith.constant 0 : index
    %c0_46 = arith.constant 0 : index
    %75 = vector.load %arg12[%c0_45, %c0_46] : memref<32x64xf32, #tpu.memory_space<vmem>>, vector<32x64xf32>
    %c0_47 = arith.constant 0 : index
    %c0_48 = arith.constant 0 : index
    %76 = vector.load %arg13[%c0_47, %c0_48] : memref<1x64xf32, #tpu.memory_space<vmem>>, vector<1x64xf32>
    %c0_49 = arith.constant 0 : index
    %c0_50 = arith.constant 0 : index
    %77 = vector.load %arg14[%c0_49, %c0_50] : memref<64x32xf32, #tpu.memory_space<vmem>>, vector<64x32xf32>
    %c0_51 = arith.constant 0 : index
    %c0_52 = arith.constant 0 : index
    %78 = vector.load %arg15[%c0_51, %c0_52] : memref<1x32xf32, #tpu.memory_space<vmem>>, vector<1x32xf32>
    %c0_53 = arith.constant 0 : index
    %c0_54 = arith.constant 0 : index
    %79 = vector.load %arg16[%c0_53, %c0_54] : memref<32x4xf32, #tpu.memory_space<vmem>>, vector<32x4xf32>
    %c0_55 = arith.constant 0 : index
    %c0_56 = arith.constant 0 : index
    %80 = vector.load %arg17[%c0_55, %c0_56] : memref<1x4xf32, #tpu.memory_space<vmem>>, vector<1x4xf32>
    %c0_57 = arith.constant 0 : index
    %c0_58 = arith.constant 0 : index
    %81 = vector.load %arg18[%c0_57, %c0_58] : memref<4x1xf32, #tpu.memory_space<vmem>>, vector<4x1xf32>
    %c0_59 = arith.constant 0 : index
    %c0_60 = arith.constant 0 : index
    %82 = vector.load %arg19[%c0_59, %c0_60] : memref<1x1xf32, #tpu.memory_space<vmem>>, vector<1x1xf32>
    %cst_61 = arith.constant dense<0.000000e+00> : vector<64x64xf32>
    %83 = tpu.matmul %74, %75, %cst_61 {dimension_numbers = #tpu.dot_dimension_numbers<[1], [0], [0], [1], [0, 0, 1, 1], [], []>} : vector<64x32xf32>, vector<32x64xf32>, vector<64x64xf32> -> vector<64x64xf32>
    %84 = vector.broadcast %76 : vector<1x64xf32> to vector<64x64xf32>
    %85 = arith.addf %83, %84 : vector<64x64xf32>
    %cst_62 = arith.constant 0.000000e+00 : f32
    %86 = vector.broadcast %cst_62 : f32 to vector<64x64xf32>
    %87 = arith.cmpf ogt, %85, %86 : vector<64x64xf32>
    %cst_63 = arith.constant 0.00999999977 : f32
    %88 = vector.broadcast %cst_63 : f32 to vector<64x64xf32>
    %89 = arith.mulf %88, %85 : vector<64x64xf32>
    %90 = arith.select %87, %85, %89 : vector<64x64xi1>, vector<64x64xf32>
    %cst_64 = arith.constant dense<0.000000e+00> : vector<64x32xf32>
    %91 = tpu.matmul %90, %77, %cst_64 {dimension_numbers = #tpu.dot_dimension_numbers<[1], [0], [0], [1], [0, 0, 1, 1], [], []>} : vector<64x64xf32>, vector<64x32xf32>, vector<64x32xf32> -> vector<64x32xf32>
    %92 = vector.broadcast %78 : vector<1x32xf32> to vector<64x32xf32>
    %93 = arith.addf %91, %92 : vector<64x32xf32>
    %cst_65 = arith.constant 0.000000e+00 : f32
    %94 = vector.broadcast %cst_65 : f32 to vector<64x32xf32>
    %95 = arith.cmpf ogt, %93, %94 : vector<64x32xf32>
    %cst_66 = arith.constant 0.00999999977 : f32
    %96 = vector.broadcast %cst_66 : f32 to vector<64x32xf32>
    %97 = arith.mulf %96, %93 : vector<64x32xf32>
    %98 = arith.select %95, %93, %97 : vector<64x32xi1>, vector<64x32xf32>
    %cst_67 = arith.constant dense<0.000000e+00> : vector<64x4xf32>
    %99 = tpu.matmul %98, %79, %cst_67 {dimension_numbers = #tpu.dot_dimension_numbers<[1], [0], [0], [1], [0, 0, 1, 1], [], []>} : vector<64x32xf32>, vector<32x4xf32>, vector<64x4xf32> -> vector<64x4xf32>
    %100 = vector.broadcast %80 : vector<1x4xf32> to vector<64x4xf32>
    %101 = arith.addf %99, %100 : vector<64x4xf32>
    %cst_68 = arith.constant 0.000000e+00 : f32
    %102 = vector.broadcast %cst_68 : f32 to vector<64x4xf32>
    %103 = arith.cmpf ogt, %101, %102 : vector<64x4xf32>
    %cst_69 = arith.constant 0.00999999977 : f32
    %104 = vector.broadcast %cst_69 : f32 to vector<64x4xf32>
    %105 = arith.mulf %104, %101 : vector<64x4xf32>
    %106 = arith.select %103, %101, %105 : vector<64x4xi1>, vector<64x4xf32>
    %cst_70 = arith.constant dense<0.000000e+00> : vector<64x1xf32>
    %107 = tpu.matmul %106, %81, %cst_70 {dimension_numbers = #tpu.dot_dimension_numbers<[1], [0], [0], [1], [0, 0, 1, 1], [], []>} : vector<64x4xf32>, vector<4x1xf32>, vector<64x1xf32> -> vector<64x1xf32>
    %108 = vector.broadcast %82 : vector<1x1xf32> to vector<64x1xf32>
    %109 = arith.addf %107, %108 : vector<64x1xf32>
    %c0_71 = arith.constant 0 : index
    %c0_72 = arith.constant 0 : index
    %110 = vector.load %arg20[%c0_71, %c0_72] : memref<64x1xf32, #tpu.memory_space<vmem>>, vector<64x1xf32>
    tpu.vector_store %arg20[%c0_71, %c0_72], %109 {strides = array<i32>} : memref<64x1xf32, #tpu.memory_space<vmem>>, vector<64x1xf32>,
    return
  }
  func.func @transform_0(%arg0: i32) -> (i32, i32) {
    %c0_i32 = arith.constant 0 : i32
    %c0_i32_0 = arith.constant 0 : i32
    return %arg0, %c0_i32 : i32, i32
  }
  func.func @transform_1(%arg0: i32) -> (i32, i32) {
    %c0_i32 = arith.constant 0 : i32
    %c0_i32_0 = arith.constant 0 : i32
    return %arg0, %c0_i32 : i32, i32
  }
  func.func @transform_2(%arg0: i32) -> (i32, i32) {
    %c0_i32 = arith.constant 0 : i32
    %c0_i32_0 = arith.constant 0 : i32
    return %arg0, %c0_i32 : i32, i32
  }
  func.func @transform_3(%arg0: i32) -> (i32, i32, i32) {
    %c0_i32 = arith.constant 0 : i32
    %c0_i32_0 = arith.constant 0 : i32
    %c0_i32_1 = arith.constant 0 : i32
    %c0_i32_2 = arith.constant 0 : i32
    return %c0_i32, %c0_i32_0, %c0_i32_1 : i32, i32, i32
  }
  func.func @transform_4(%arg0: i32) -> (i32, i32, i32) {
    %c0_i32 = arith.constant 0 : i32
    %c0_i32_0 = arith.constant 0 : i32
    %c0_i32_1 = arith.constant 0 : i32
    %c0_i32_2 = arith.constant 0 : i32
    return %c0_i32, %c0_i32_0, %c0_i32_1 : i32, i32, i32
  }
  func.func @transform_5(%arg0: i32) -> (i32, i32, i32) {
    %c0_i32 = arith.constant 0 : i32
    %c0_i32_0 = arith.constant 0 : i32
    %c0_i32_1 = arith.constant 0 : i32
    %c0_i32_2 = arith.constant 0 : i32
    return %c0_i32, %c0_i32_0, %c0_i32_1 : i32, i32, i32
  }
  func.func @transform_6(%arg0: i32) -> (i32, i32, i32) {
    %c0_i32 = arith.constant 0 : i32
    %c0_i32_0 = arith.constant 0 : i32
    %c0_i32_1 = arith.constant 0 : i32
    %c0_i32_2 = arith.constant 0 : i32
    return %c0_i32, %c0_i32_0, %c0_i32_1 : i32, i32, i32
  }
  func.func @transform_7(%arg0: i32) -> (i32, i32) {
    %c0_i32 = arith.constant 0 : i32
    %c0_i32_0 = arith.constant 0 : i32
    %c0_i32_1 = arith.constant 0 : i32
    return %c0_i32, %c0_i32_0 : i32, i32
  }
  func.func @transform_8(%arg0: i32) -> (i32, i32) {
    %c0_i32 = arith.constant 0 : i32
    %c0_i32_0 = arith.constant 0 : i32
    %c0_i32_1 = arith.constant 0 : i32
    return %c0_i32, %c0_i32_0 : i32, i32
  }
  func.func @transform_9(%arg0: i32) -> (i32, i32) {
    %c0_i32 = arith.constant 0 : i32
    %c0_i32_0 = arith.constant 0 : i32
    %c0_i32_1 = arith.constant 0 : i32
    return %c0_i32, %c0_i32_0 : i32, i32
  }
  func.func @transform_10(%arg0: i32) -> (i32, i32) {
    %c0_i32 = arith.constant 0 : i32
    %c0_i32_0 = arith.constant 0 : i32
    %c0_i32_1 = arith.constant 0 : i32
    return %c0_i32, %c0_i32_0 : i32, i32
  }
  func.func @transform_11(%arg0: i32) -> (i32, i32) {
    %c0_i32 = arith.constant 0 : i32
    %c0_i32_0 = arith.constant 0 : i32
    %c0_i32_1 = arith.constant 0 : i32
    return %c0_i32, %c0_i32_0 : i32, i32
  }
  func.func @transform_12(%arg0: i32) -> (i32, i32) {
    %c0_i32 = arith.constant 0 : i32
    %c0_i32_0 = arith.constant 0 : i32
    %c0_i32_1 = arith.constant 0 : i32
    return %c0_i32, %c0_i32_0 : i32, i32
  }
  func.func @transform_13(%arg0: i32) -> (i32, i32) {
    %c0_i32 = arith.constant 0 : i32
    %c0_i32_0 = arith.constant 0 : i32
    %c0_i32_1 = arith.constant 0 : i32
    return %c0_i32, %c0_i32_0 : i32, i32
  }
  func.func @transform_14(%arg0: i32) -> (i32, i32) {
    %c0_i32 = arith.constant 0 : i32
    %c0_i32_0 = arith.constant 0 : i32
    %c0_i32_1 = arith.constant 0 : i32
    return %c0_i32, %c0_i32_0 : i32, i32
  }
  func.func @transform_15(%arg0: i32) -> (i32, i32) {
    %c0_i32 = arith.constant 0 : i32
    %c0_i32_0 = arith.constant 0 : i32
    %c0_i32_1 = arith.constant 0 : i32
    return %c0_i32, %c0_i32_0 : i32, i32
  }
  func.func @transform_16(%arg0: i32) -> (i32, i32) {
    %c0_i32 = arith.constant 0 : i32
    %c0_i32_0 = arith.constant 0 : i32
    %c0_i32_1 = arith.constant 0 : i32
    return %c0_i32, %c0_i32_0 : i32, i32
  }
  func.func @transform_17(%arg0: i32) -> (i32, i32) {
    %c0_i32 = arith.constant 0 : i32
    %c0_i32_0 = arith.constant 0 : i32
    %c0_i32_1 = arith.constant 0 : i32
    return %c0_i32, %c0_i32_0 : i32, i32
  }
  func.func @transform_18(%arg0: i32) -> (i32, i32) {
    %c0_i32 = arith.constant 0 : i32
    %c0_i32_0 = arith.constant 0 : i32
    %c0_i32_1 = arith.constant 0 : i32
    return %c0_i32, %c0_i32_0 : i32, i32
  }
  func.func @transform_19(%arg0: i32) -> (i32, i32) {
    %c0_i32 = arith.constant 0 : i32
    %c0_i32_0 = arith.constant 0 : i32
    return %arg0, %c0_i32 : i32, i32
  }
}

</mosaic_0001>

<bundles_post_ra>
// kernel: neg.4
= control target key start
LH: loop header
LB: loop body
LE: loop exit
PB: predicated region body
PF: predicated region fallthrough
CT: control target
= control target key end

     0   :  { %s264_s0 = inlined_call_operand.vmem [shape: f32[128,128], index: 0, kind: input, shape index: {}]   ;;  %s265_s1 = inlined_call_operand.vmem [shape: f32[128,128], index: 1, kind: output, shape index: {}]  }
   0x1   :  { %v2_v0 = vld [vmem:[%s264_s0] sm:$0xff]  ;;  %v128_v1 = vld [vmem:[%s264_s0 + $0x8] sm:$0xff]  ;;  %v130_v2 = vld [vmem:[%s264_s0 + $0x10] sm:$0xff] }
   0x2   :  { %v5_v3 = vxor.u32 2147483648, %v2_v0  ;;  %v12_v4 = vxor.u32 2147483648, %v128_v1  ;;  %v20_v5 = vxor.u32 2147483648, %v130_v2  ;;  %v132_v6 = vld [vmem:[%s264_s0 + $0x18] sm:$0xff]  ;;  %v134_v7 = vld [vmem:[%s264_s0 + $0x20] sm:$0xff]  ;;  %v136_v8 = vld [vmem:[%s264_s0 + $0x28] sm:$0xff] }
   0x3   :  { %v28_v9 = vxor.u32 2147483648, %v132_v6  ;;  %v36_v10 = vxor.u32 2147483648, %v134_v7  ;;  %v44_v11 = vxor.u32 2147483648, %v136_v8  ;;  %v138_v12 = vld [vmem:[%s264_s0 + $0x30] sm:$0xff]  ;;  %v140_v13 = vld [vmem:[%s264_s0 + $0x38] sm:$0xff]  ;;  %v142_v14 = vld [vmem:[%s264_s0 + $0x40] sm:$0xff] }
   0x4   :  { %7 = vst [vmem:[%s265_s1] sm:$0xff] %v5_v3  ;;  %129 = vst [vmem:[%s265_s1 + $0x8] sm:$0xff] %v12_v4  ;;  %v52_v15 = vxor.u32 2147483648, %v138_v12  ;;  %v60_v16 = vxor.u32 2147483648, %v140_v13  ;;  %v68_v17 = vxor.u32 2147483648, %v142_v14  ;;  %v144_v18 = vld [vmem:[%s264_s0 + $0x48] sm:$0xff]  ;;  %v146_v19 = vld [vmem:[%s264_s0 + $0x50] sm:$0xff] }
   0x5   :  { %131 = vst [vmem:[%s265_s1 + $0x10] sm:$0xff] %v20_v5  ;;  %v148_v20 = vld [vmem:[%s264_s0 + $0x58] sm:$0xff]  ;;  %133 = vst [vmem:[%s265_s1 + $0x18] sm:$0xff] %v28_v9  ;;  %v76_v21 = vxor.u32 2147483648, %v144_v18  ;;  %v84_v22 = vxor.u32 2147483648, %v146_v19  ;;  %v150_v24 = vld [vmem:[%s264_s0 + $0x60] sm:$0xff] }
   0x6   :  { %135 = vst [vmem:[%s265_s1 + $0x20] sm:$0xff] %v36_v10  ;;  %137 = vst [vmem:[%s265_s1 + $0x28] sm:$0xff] %v44_v11  ;;  %v92_v23 = vxor.u32 2147483648, %v148_v20  ;;  %v152_v25 = vld [vmem:[%s264_s0 + $0x68] sm:$0xff]  ;;  %v154_v26 = vld [vmem:[%s264_s0 + $0x70] sm:$0xff]  ;;  %v100_v27 = vxor.u32 2147483648, %v150_v24 }
   0x7   :  { %139 = vst [vmem:[%s265_s1 + $0x30] sm:$0xff] %v52_v15  ;;  %141 = vst [vmem:[%s265_s1 + $0x38] sm:$0xff] %v60_v16  ;;  %v108_v28 = vxor.u32 2147483648, %v152_v25  ;;  %v116_v29 = vxor.u32 2147483648, %v154_v26  ;;  %v156_v30 = vld [vmem:[%s264_s0 + $0x78] sm:$0xff] }
   0x8   :  { %143 = vst [vmem:[%s265_s1 + $0x40] sm:$0xff] %v68_v17  ;;  %145 = vst [vmem:[%s265_s1 + $0x48] sm:$0xff] %v76_v21  ;;  %v124_v31 = vxor.u32 2147483648, %v156_v30 }
   0x9   :  { %147 = vst [vmem:[%s265_s1 + $0x50] sm:$0xff] %v84_v22  ;;  %149 = vst [vmem:[%s265_s1 + $0x58] sm:$0xff] %v92_v23 }
   0xa   :  { %151 = vst [vmem:[%s265_s1 + $0x60] sm:$0xff] %v100_v27  ;;  %153 = vst [vmem:[%s265_s1 + $0x68] sm:$0xff] %v108_v28 }
   0xb   :  { %155 = vst [vmem:[%s265_s1 + $0x70] sm:$0xff] %v116_v29  ;;  %157 = vst [vmem:[%s265_s1 + $0x78] sm:$0xff] %v124_v31 }

// kernel: net_forward.5
= control target key start
LH: loop header
LB: loop body
LE: loop exit
PB: predicated region body
PF: predicated region fallthrough
CT: control target
= control target key end

     0   :  { %s758_s18 = smov 0   ;;  %s830_s0 = inlined_call_operand.vmem [shape: f32[128,13], index: 0, kind: input, shape index: {}]   ;;  %s831_s1 = inlined_call_operand.vmem [shape: f32[13,32], index: 1, kind: input, shape index: {}]   ;;  %s832_s2 = inlined_call_operand.vmem [shape: f32[1,32], index: 2, kind: input, shape index: {}]   ;;  %s833_s3 = inlined_call_operand.vmem [shape: f32[32,32], index: 3, kind: input, shape index: {}]   ;;  %s834_s4 = inlined_call_operand.vmem [shape: f32[1,32], index: 4, kind: input, shape index: {}]   ;;  %s835_s5 = inlined_call_operand.vmem [shape: f32[128,32], index: 5, kind: output, shape index: {}]  }
   0x1 LB: > { %s608_s19 = sadd.s32 4294967295, %s725_s18   ;;  %p612_p0 = scmp.ge.s32.totalorder %s725_s18, 1  ;;  %s725_s18 = sphi %s758_s18, %s15_s18  }
   0x2   : > { %p188_p1 = scmp.lt.s32.totalorder %s725_s18, 3 }
   0x4   : > { %p189_p2 = pnand %p612_p0, %p188_p1 }
   0x5   : > { %v236_v0 = vld [vmem:[%s831_s1] sm:$0xff] (!%p189_p2)  ;;  %v237_v1 = vld [vmem:[%s831_s1 + $0x8] sm:$0x1f] (!%p189_p2)  ;;  %vm275_vm0 = vcmask (!%p189_p2), 1044480   ;;  %s613_s24 = sshll.u32 (!%p189_p2), %s608_s19, 3  ;;  %vm727_vm1 = vmmov (!%p189_p2), 1  }
   0x6   : > { %192 = sbr.rel (%p189_p2) target bundleno = 465 (0x1d1), region = 40  ;;  %v696_v2 = vpack.c.bf16 (!%p189_p2), %v237_v1, %v236_v0  ;;  %vm697_vm2 = vmpackc.low (!%p189_p2), %vm275_vm0, %vm727_vm1  ;;  %p217_p3 = scmp.lt.s32.totalorder (!%p189_p2), %s613_s24, 15  ;;  %vm250_vm3 = vcmask (!%p189_p2), 105472   ;;  %v239_v11 = vld [vmem:[%s833_s3] sm:$0xff] (!%p189_p2)  ;;  %v240_v12 = vld [vmem:[%s833_s3 + $0x8] sm:$0xff] (!%p189_p2)  ;;  %vm414_vm6 = vcmask (!%p189_p2), 261120  }
   0x7   : > { %v702_v13 = vpack.c.bf16 (!%p189_p2), %v240_v12, %v239_v11  ;;  %v241_v14 = vld [vmem:[%s833_s3 + $0x10] sm:$0xff] (!%p189_p2)  ;;  %v242_v15 = vld [vmem:[%s833_s3 + $0x18] sm:$0xff] (!%p189_p2)  ;;  %v617_v17 = vld [vmem:[%s832_s2] ss:$0 sm:$0xff] (!%p189_p2) }
   0x8   : > { %698 = vmatprep.subr.msk.bf16.mxu0 (!%p189_p2), %vm697_vm2, %v696_v2  ;;  %v706_v16 = vpack.c.bf16 (!%p189_p2), %v242_v15, %v241_v14  ;;  %v627_v50 = vld [vmem:[%s834_s4] ss:$0 sm:$0xff] (!%p189_p2) }
   0x9   : > { %701 = vmatpush3.bf16.msk.msra.mxu0 (!%p189_p2), %vm697_vm2, %v696_v2  ;;  %703 = vmatprep.subr.bf16.mxu1 (!%p189_p2), %v702_v13 }
   0xa   : > { %705 = vmatpush3.bf16.msra.mxu1 (!%p189_p2), %v702_v13 }
   0xb   : > { %707 = vmatprep.subr.bf16.mxu1 (!%p189_p2), %v706_v16 }
   0xd   : > { %s837_s24 = smov (!%p217_p3, %s613_s24), 15 }
   0xe   : > { %s614_s25 = sshll.u32 %s837_s24, 3  ;;  %709 = vmatpush3.bf16.msra.mxu1 %v706_v16 }
   0xf   : > { %s220_s28 = scalar_lea.vmem %s830_s0, %s614_s25  ;;  %s226_s19 = scalar_lea.vmem %s835_s5, %s614_s25 }
  0x10   : > { %v228_v3 = vld [vmem:[%s220_s28] sm:$0xff]  ;;  %v229_v4 = vld [vmem:[%s220_s28 + $0x8] sm:$0xff]  ;;  %v230_v5 = vld [vmem:[%s220_s28 + $0x10] sm:$0xff] }
  0x11   : > { %664 = vmatprep.mubr.msk.f32.mxu0 %vm250_vm3, %v228_v3  ;;  %v231_v6 = vld [vmem:[%s220_s28 + $0x18] sm:$0xff]  ;;  %v232_v7 = vld [vmem:[%s220_s28 + $0x20] sm:$0xff]  ;;  %v233_v8 = vld [vmem:[%s220_s28 + $0x28] sm:$0xff] }
  0x12   : > { %665 = vmatmul.mubr.msk.f32.vlgmr.msra.gmra.mrb[0].mxu0 %vm250_vm3, %v229_v4  ;;  %v234_v9 = vld [vmem:[%s220_s28 + $0x30] sm:$0xff]  ;;  %v235_v10 = vld [vmem:[%s220_s28 + $0x38] sm:$0xff] }
  0x13   : > { %667 = vmatprep.mubr.msk.f32.mxu0 %vm250_vm3, %v230_v5 }
  0x16   : > { %668 = vmatmul.mubr.msk.f32.gmra.mrb[2].mxu0 %vm250_vm3, %v231_v6 }
  0x17   : > { %670 = vmatprep.mubr.msk.f32.mxu0 %vm250_vm3, %v232_v7 }
  0x1a   : > { %671 = vmatmul.mubr.msk.f32.gmra.mrb[4].mxu0 %vm250_vm3, %v233_v8 }
  0x1b   : > { %673 = vmatprep.mubr.msk.f32.mxu0 %vm250_vm3, %v234_v9 }
  0x1e   : > { %674 = vmatmul.mubr.msk.f32.gmra.mrb[6].mxu0 %vm250_vm3, %v235_v10 }
  0xe5   : > { %v666_v18 = vpop.f32.mrb[0].mxu0 }
  0xe6   : > { %v351_v19 = vadd.f32 %v666_v18, %v617_v17  ;;  %v345_v20 = vpop.f32.mrb[1].mxu0 }
  0xe7   : > { %v346_v21 = vadd.f32 %v617_v17, %v345_v20 }
  0xe8   : > { %v393_v22 = vmul.f32 0.01, %v351_v19  ;;  %vm385_vm4 = vcmp.gt.f32.partialorder %v351_v19, 0.0 }
  0xe9   : > { %v669_v23 = vpop.f32.mrb[2].mxu0  ;;  %vm384_vm5 = vcmp.gt.f32.partialorder %v346_v21, 0.0  ;;  %v392_v24 = vmul.f32 0.01, %v346_v21 }
  0xea   : > { %v361_v25 = vadd.f32 %v669_v23, %v617_v17  ;;  %v355_v26 = vpop.f32.mrb[3].mxu0  ;;  %v401_v30 = vsel %vm385_vm4, %v351_v19, %v393_v22 }
  0xeb   : > { %v356_v27 = vadd.f32 %v617_v17, %v355_v26  ;;  %v400_v28 = vsel %vm384_vm5, %v346_v21, %v392_v24 }
  0xec   : > { %v395_v29 = vmul.f32 0.01, %v361_v25  ;;  %684 = vmatprep.mubr.msk.f32.mxu1 %vm414_vm6, %v400_v28  ;;  %vm387_vm7 = vcmp.gt.f32.partialorder %v361_v25, 0.0 }
  0xed   : > { %vm386_vm8 = vcmp.gt.f32.partialorder %v356_v27, 0.0  ;;  %v394_v31 = vmul.f32 0.01, %v356_v27  ;;  %v672_v32 = vpop.f32.mrb[4].mxu0  ;;  %685 = vmatmul.mubr.msk.f32.vlgmr.msra.gmra.mrb[0].mxu1 %vm414_vm6, %v401_v30 }
  0xee   : > { %v371_v33 = vadd.f32 %v672_v32, %v617_v17  ;;  %v365_v34 = vpop.f32.mrb[5].mxu0  ;;  %v403_v38 = vsel %vm387_vm7, %v361_v25, %v395_v29 }
  0xef   : > { %v366_v35 = vadd.f32 %v617_v17, %v365_v34  ;;  %v402_v36 = vsel %vm386_vm8, %v356_v27, %v394_v31 }
  0xf0   : > { %v397_v37 = vmul.f32 0.01, %v371_v33  ;;  %687 = vmatprep.mubr.msk.f32.mxu1 %vm414_vm6, %v402_v36  ;;  %vm389_vm9 = vcmp.gt.f32.partialorder %v371_v33, 0.0 }
  0xf1   : > { %vm388_vm10 = vcmp.gt.f32.partialorder %v366_v35, 0.0  ;;  %v396_v39 = vmul.f32 0.01, %v366_v35  ;;  %v675_v40 = vpop.f32.mrb[6].mxu0  ;;  %688 = vmatmul.mubr.msk.f32.gmra.mrb[2].mxu1 %vm414_vm6, %v403_v38 }
  0xf2   : > { %v381_v41 = vadd.f32 %v675_v40, %v617_v17  ;;  %v375_v42 = vpop.f32.mrb[7].mxu0  ;;  %v405_v46 = vsel %vm389_vm9, %v371_v33, %v397_v37 }
  0xf3   : > { %v376_v43 = vadd.f32 %v617_v17, %v375_v42  ;;  %v404_v44 = vsel %vm388_vm10, %v366_v35, %v396_v39 }
  0xf4   : > { %v399_v45 = vmul.f32 0.01, %v381_v41  ;;  %690 = vmatprep.mubr.msk.f32.mxu1 %vm414_vm6, %v404_v44  ;;  %vm391_vm11 = vcmp.gt.f32.partialorder %v381_v41, 0.0 }
  0xf5   : > { %vm390_vm12 = vcmp.gt.f32.partialorder %v376_v43, 0.0  ;;  %v398_v47 = vmul.f32 0.01, %v376_v43  ;;  %691 = vmatmul.mubr.msk.f32.gmra.mrb[4].mxu1 %vm414_vm6, %v405_v46 }
  0xf6   : > { %v407_v49 = vsel %vm391_vm11, %v381_v41, %v399_v45 }
  0xf7   : > { %v406_v48 = vsel %vm390_vm12, %v376_v43, %v398_v47 }
  0xf8   : > { %693 = vmatprep.mubr.msk.f32.mxu1 %vm414_vm6, %v406_v48 }
  0xf9   : > { %694 = vmatmul.mubr.msk.f32.gmra.mrb[6].mxu1 %vm414_vm6, %v407_v49 }
 0x1c0   : > { %v686_v51 = vpop.f32.mrb[0].mxu1 }
 0x1c1   : > { %v511_v52 = vadd.f32 %v686_v51, %v627_v50  ;;  %v505_v53 = vpop.f32.mrb[1].mxu1 }
 0x1c2   : > { %v506_v54 = vadd.f32 %v627_v50, %v505_v53 }
 0x1c3   : > { %545 = vst.msk [vmem:[%s226_s19 + $0x8] sm:$0xff] %vm414_vm6, %v511_v52 }
 0x1c4   : > { %544 = vst.msk [vmem:[%s226_s19] sm:$0xff] %vm414_vm6, %v506_v54  ;;  %v689_v55 = vpop.f32.mrb[2].mxu1 }
 0x1c5   : > { %v521_v56 = vadd.f32 %v689_v55, %v627_v50  ;;  %v515_v57 = vpop.f32.mrb[3].mxu1 }
 0x1c6   : > { %v516_v58 = vadd.f32 %v627_v50, %v515_v57 }
 0x1c7   : > { %547 = vst.msk [vmem:[%s226_s19 + $0x18] sm:$0xff] %vm414_vm6, %v521_v56 }
 0x1c8   : > { %546 = vst.msk [vmem:[%s226_s19 + $0x10] sm:$0xff] %vm414_vm6, %v516_v58  ;;  %v692_v59 = vpop.f32.mrb[4].mxu1 }
 0x1c9   : > { %v531_v60 = vadd.f32 %v692_v59, %v627_v50  ;;  %v525_v61 = vpop.f32.mrb[5].mxu1 }
 0x1ca   : > { %v526_v62 = vadd.f32 %v627_v50, %v525_v61 }
 0x1cb   : > { %549 = vst.msk [vmem:[%s226_s19 + $0x28] sm:$0xff] %vm414_vm6, %v531_v60 }
 0x1cc   : > { %548 = vst.msk [vmem:[%s226_s19 + $0x20] sm:$0xff] %vm414_vm6, %v526_v62  ;;  %v695_v63 = vpop.f32.mrb[6].mxu1 }
 0x1cd   : > { %v541_v0 = vadd.f32 %v695_v63, %v627_v50  ;;  %v535_v1 = vpop.f32.mrb[7].mxu1 }
 0x1ce   : > { %v536_v2 = vadd.f32 %v627_v50, %v535_v1 }
 0x1cf   : > { %551 = vst.msk [vmem:[%s226_s19 + $0x38] sm:$0xff] %vm414_vm6, %v541_v0 }
 0x1d0   : > { %550 = vst.msk [vmem:[%s226_s19 + $0x30] sm:$0xff] %vm414_vm6, %v536_v2 }
 0x1d1 PF: > { %s15_s18 = sadd.s32 1, %s725_s18  }
 0x1d2   : > { %p12_p4 = scmp.ge.s32.totalorder %s15_s18, 4  }
 0x1d4   :  { %14 = sbr.rel (!%p12_p4) target bundleno = 1 (0x1), region = 70 }

// kernel: net_forward.6
= control target key start
LH: loop header
LB: loop body
LE: loop exit
PB: predicated region body
PF: predicated region fallthrough
CT: control target
= control target key end

     0   :  { %s709_s18 = smov 0   ;;  %s805_s0 = inlined_call_operand.vmem [shape: f32[128,32], index: 0, kind: input, shape index: {}]   ;;  %s806_s1 = inlined_call_operand.vmem [shape: s32[128,1], index: 1, kind: input, shape index: {}]   ;;  %s807_s2 = inlined_call_operand.vmem [shape: f32[32,128], index: 2, kind: input, shape index: {}]   ;;  %s808_s3 = inlined_call_operand.vmem [shape: f32[1,128], index: 3, kind: input, shape index: {}]   ;;  %s809_s4 = inlined_call_operand.vmem [shape: s32[1,128], index: 4, kind: input, shape index: {}]   ;;  %s810_s5 = inlined_call_operand.vmem [shape: f32[128,128], index: 5, kind: output, shape index: {}]  }
   0x1 LB: > { %s592_s19 = sadd.s32 4294967295, %s676_s18   ;;  %p596_p0 = scmp.ge.s32.totalorder %s676_s18, 1  ;;  %s676_s18 = sphi %s709_s18, %s15_s18  }
   0x2   : > { %p199_p1 = scmp.lt.s32.totalorder %s676_s18, 3 }
   0x4   : > { %p200_p2 = pnand %p596_p0, %p199_p1 }
   0x5   : > { %v291_v0 = vld [vmem:[%s807_s2] sm:$0xff] (!%p200_p2)  ;;  %v292_v1 = vld [vmem:[%s807_s2 + $0x8] sm:$0xff] (!%p200_p2)  ;;  %v293_v2 = vld [vmem:[%s807_s2 + $0x10] sm:$0xff] (!%p200_p2)  ;;  %s597_s26 = sshll.u32 (!%p200_p2), %s592_s19, 3  ;;  %v678_v5 = vmov (!%p200_p2), 0   ;;  %vm266_vm0 = vcmask (!%p200_p2), 261120  }
   0x6   : > { %203 = sbr.rel (%p200_p2) target bundleno = 244 (0xf4), region = 40  ;;  %v647_v3 = vpack.c.bf16 (!%p200_p2), %v292_v1, %v291_v0  ;;  %v294_v4 = vld [vmem:[%s807_s2 + $0x18] sm:$0xff] (!%p200_p2)  ;;  %p233_p3 = scmp.lt.s32.totalorder (!%p200_p2), %s597_s26, 15  ;;  %669 = vset.pattern.permute.xlu1 (!%p200_p2), %v678_v5  ;;  %668 = vset.pattern.permute.xlu0 (!%p200_p2), %v678_v5  ;;  %v611_v52 = vld [vmem:[%s808_s3] ss:$0 sm:$0xff] (!%p200_p2) }
   0x7   : > { %v651_v6 = vpack.c.bf16 (!%p200_p2), %v294_v4, %v293_v2  ;;  %v767_v57 = vld [vmem:[%s809_s4] ss:$0 sm:$0xff] (!%p200_p2) }
   0x8   : > { %648 = vmatprep.subr.bf16.mxu0 (!%p200_p2), %v647_v3  ;;  %655 = vmatprep.subr.bf16.mxu1 (!%p200_p2), %v647_v3 }
   0x9   : > { %650 = vmatpush3.bf16.msra.mxu0 (!%p200_p2), %v647_v3  ;;  %657 = vmatpush3.bf16.msra.mxu1 (!%p200_p2), %v647_v3 }
   0xa   : > { %652 = vmatprep.subr.bf16.mxu0 (!%p200_p2), %v651_v6  ;;  %656 = vmatprep.subr.bf16.mxu1 (!%p200_p2), %v651_v6 }
   0xd   : > { %s812_s26 = smov (!%p233_p3, %s597_s26), 15  ;;  %654 = vmatpush3.bf16.msra.mxu0 %v651_v6  ;;  %658 = vmatpush3.bf16.msra.mxu1 %v651_v6 }
   0xe   : > { %s729_s29 = sshll.u32 %s812_s26, 3 }
   0xf   : > { %s236_s7 = scalar_lea.vmem %s805_s0, %s729_s29  ;;  %s242_s10 = scalar_lea.vmem %s806_s1, %s729_s29 }
  0x10   : > { %v250_v7 = vld [vmem:[%s236_s7] sm:$0xff]  ;;  %v251_v10 = vld [vmem:[%s236_s7 + $0x8] sm:$0xff]  ;;  %v252_v12 = vld [vmem:[%s236_s7 + $0x10] sm:$0xff]  ;;  %s777_s17 = scalar_lea.vmem %s810_s5, %s729_s29 }
  0x11   : > { %v254_v8 = vld [vmem:[%s236_s7 + $0x20] sm:$0xff]  ;;  %v258_v9 = vmul.f32 %v250_v7, %v250_v7  ;;  %v255_v11 = vld [vmem:[%s236_s7 + $0x28] sm:$0xff]  ;;  %635 = vmatprep.mubr.msk.f32.mxu0 %vm266_vm0, %v250_v7  ;;  %v256_v13 = vld [vmem:[%s236_s7 + $0x30] sm:$0xff]  ;;  %v260_v15 = vmul.f32 %v252_v12, %v252_v12  ;;  %v259_v18 = vmul.f32 %v251_v10, %v251_v10 }
  0x12   : > { %641 = vmatprep.mubr.msk.f32.mxu1 %vm266_vm0, %v254_v8  ;;  %v253_v14 = vld [vmem:[%s236_s7 + $0x18] sm:$0xff]  ;;  %636 = vmatmul.mubr.msk.f32.vlgmr.msra.gmra.mrb[0].mxu0 %vm266_vm0, %v251_v10  ;;  %v262_v21 = vmul.f32 %v254_v8, %v254_v8  ;;  %v263_v23 = vmul.f32 %v255_v11, %v255_v11  ;;  %v264_v28 = vmul.f32 %v256_v13, %v256_v13  ;;  %v464_v31 = vld [vmem:[%s242_s10 + $0x8] sm:$0xff]  ;;  %v465_v32 = vld [vmem:[%s242_s10 + $0x10] sm:$0xff] }
  0x13   : > { %v261_v16 = vmul.f32 %v253_v14, %v253_v14  ;;  %v267_v17 = vsel %vm266_vm0, %v258_v9, 0.0  ;;  %642 = vmatmul.mubr.msk.f32.vlgmr.msra.gmra.mrb[0].mxu1 %vm266_vm0, %v255_v11  ;;  %v273_v19 = vsel %vm266_vm0, %v260_v15, 0.0  ;;  %638 = vmatprep.mubr.msk.f32.mxu0 %vm266_vm0, %v252_v12  ;;  %v257_v20 = vld [vmem:[%s236_s7 + $0x38] sm:$0xff]  ;;  %v270_v24 = vsel %vm266_vm0, %v259_v18, 0.0  ;;  %v463_v33 = vld [vmem:[%s242_s10] sm:$0xff]  ;;  %v468_v36 = vld [vmem:[%s242_s10 + $0x28] sm:$0xff] }
  0x14   : > { %644 = vmatprep.mubr.msk.f32.mxu1 %vm266_vm0, %v256_v13  ;;  %274 = vadd.xlane.f32.xlu1 %v273_v19  ;;  %v282_v25 = vsel %vm266_vm0, %v263_v23, 0.0  ;;  %v265_v26 = vmul.f32 %v257_v20, %v257_v20  ;;  %v279_v27 = vsel %vm266_vm0, %v262_v21, 0.0  ;;  %v285_v30 = vsel %vm266_vm0, %v264_v28, 0.0  ;;  %v466_v34 = vld [vmem:[%s242_s10 + $0x18] sm:$0xff]  ;;  %v467_v35 = vld [vmem:[%s242_s10 + $0x20] sm:$0xff]  ;;  %v469_v37 = vld [vmem:[%s242_s10 + $0x30] sm:$0xff] }
  0x15   : > { %268 = vadd.xlane.f32.xlu0 %v267_v17  ;;  %v276_v22 = vsel %vm266_vm0, %v261_v16, 0.0  ;;  %v470_v38 = vld [vmem:[%s242_s10 + $0x38] sm:$0xff] }
  0x16   : > { %639 = vmatmul.mubr.msk.f32.gmra.mrb[2].mxu0 %vm266_vm0, %v253_v14  ;;  %v288_v29 = vsel %vm266_vm0, %v265_v26, 0.0 }
  0x17   : > { %645 = vmatmul.mubr.msk.f32.gmra.mrb[2].mxu1 %vm266_vm0, %v257_v20 }
  0x18   : > { %277 = vadd.xlane.f32.xlu1 %v276_v22 }
  0x19   : > { %271 = vadd.xlane.f32.xlu0 %v270_v24 }
  0x1c   : > { %283 = vadd.xlane.f32.xlu1 %v282_v25 }
  0x1d   : > { %280 = vadd.xlane.f32.xlu0 %v279_v27 }
  0x20   : > { %289 = vadd.xlane.f32.xlu1 %v288_v29 }
  0x21   : > { %286 = vadd.xlane.f32.xlu0 %v285_v30 }
  0x31   : > { %476 = vperm.xlu1 %669, %v464_v31  }
  0x35   : > { %479 = vperm.xlu1 %669, %v465_v32  }
  0x37   : > { %473 = vperm.xlu0 %668, %v463_v33  }
  0x39   : > { %482 = vperm.xlu1 %669, %v466_v34  }
  0x3d   : > { %485 = vperm.xlu1 %669, %v467_v35  }
  0x41   : > { %488 = vperm.xlu1 %669, %v468_v36  }
  0x45   : > { %491 = vperm.xlu1 %669, %v469_v37  }
  0x49   : > { %494 = vperm.xlu1 %669, %v470_v38  }
  0xa1   : > { %v275_v39 = vpop.xlane.xlu1 %274 }
  0xa2   : > { %v269_v45 = vpop.xlane.xlu0 %268  ;;  %v433_v55 = vadd.f32 %v611_v52, %v275_v39 }
  0xa3   : > { %v431_v58 = vadd.f32 %v611_v52, %v269_v45 }
  0xa5   : > { %v278_v40 = vpop.xlane.xlu1 %277 }
  0xa6   : > { %v272_v47 = vpop.xlane.xlu0 %271  ;;  %v434_v56 = vadd.f32 %v611_v52, %v278_v40 }
  0xa7   : > { %v432_v59 = vadd.f32 %v611_v52, %v272_v47 }
  0xa9   : > { %v284_v41 = vpop.xlane.xlu1 %283 }
  0xaa   : > { %v281_v49 = vpop.xlane.xlu0 %280  ;;  %v436_v62 = vadd.f32 %v611_v52, %v284_v41 }
  0xab   : > { %v435_v63 = vadd.f32 %v611_v52, %v281_v49 }
  0xad   : > { %v290_v42 = vpop.xlane.xlu1 %289 }
  0xae   : > { %v287_v51 = vpop.xlane.xlu0 %286  ;;  %v438_v4 = vadd.f32 %v611_v52, %v290_v42 }
  0xaf   : > { %v437_v7 = vadd.f32 %v611_v52, %v287_v51 }
  0xb1   : > { %v477_v43 = vpop.permute.xlu1 %476 }
  0xb2   : > { %vm501_vm1 = vcmp.eq.s32.totalorder %v477_v43, %v767_v57 }
  0xb5   : > { %v755_v44 = vpop.permute.xlu1 %479 }
  0xb6   : > { %v474_v54 = vpop.permute.xlu0 %473  ;;  %vm502_vm7 = vcmp.eq.s32.totalorder %v755_v44, %v767_v57 }
  0xb7   : > { %vm500_vm2 = vcmp.eq.s32.totalorder %v474_v54, %v767_v57 }
  0xb9   : > { %v757_v46 = vpop.permute.xlu1 %482 }
  0xba   : > { %vm503_vm5 = vcmp.eq.s32.totalorder %v757_v46, %v767_v57 }
  0xbd   : > { %v486_v48 = vpop.permute.xlu1 %485 }
  0xbe   : > { %vm504_vm3 = vcmp.eq.s32.totalorder %v486_v48, %v767_v57 }
  0xc1   : > { %v489_v50 = vpop.permute.xlu1 %488 }
  0xc2   : > { %vm505_vm4 = vcmp.eq.s32.totalorder %v489_v50, %v767_v57 }
  0xc5   : > { %v762_v53 = vpop.permute.xlu1 %491 }
  0xc6   : > { %vm506_vm8 = vcmp.eq.s32.totalorder %v762_v53, %v767_v57 }
  0xc9   : > { %v495_v24 = vpop.permute.xlu1 %494 }
  0xca   : > { %vm507_vm6 = vcmp.eq.s32.totalorder %v495_v24, %v767_v57 }
  0xe5   : > { %v637_v60 = vpop.f32.mrb[0].mxu0 }
  0xe6   : > { %v643_v61 = vpop.f32.mrb[0].mxu1  ;;  %v440_v0 = vmul.f32 2.0, %v637_v60  ;;  %v385_v2 = vpop.f32.mrb[1].mxu0 }
  0xe7   : > { %v444_v1 = vmul.f32 2.0, %v643_v61  ;;  %v405_v3 = vpop.f32.mrb[1].mxu1  ;;  %v439_v5 = vmul.f32 2.0, %v385_v2 }
  0xe8   : > { %v443_v6 = vmul.f32 2.0, %v405_v3  ;;  %v448_v8 = vsub.f32 %v432_v59, %v440_v0 }
  0xe9   : > { %v452_v9 = vsub.f32 %v436_v62, %v444_v1  ;;  %v447_v10 = vsub.f32 %v431_v58, %v439_v5  ;;  %v640_v12 = vpop.f32.mrb[2].mxu0 }
  0xea   : > { %v451_v11 = vsub.f32 %v435_v63, %v443_v6  ;;  %v646_v13 = vpop.f32.mrb[2].mxu1  ;;  %v456_v14 = vmax.f32 %v448_v8, 0.0  ;;  %v442_v16 = vmul.f32 2.0, %v640_v12  ;;  %v395_v18 = vpop.f32.mrb[3].mxu0 }
  0xeb   : > { %v460_v15 = vmax.f32 %v452_v9, 0.0  ;;  %v446_v17 = vmul.f32 2.0, %v646_v13  ;;  %v415_v19 = vpop.f32.mrb[3].mxu1  ;;  %v455_v20 = vmax.f32 %v447_v10, 0.0  ;;  %v441_v22 = vmul.f32 2.0, %v395_v18 }
  0xec   : > { %v459_v21 = vmax.f32 %v451_v11, 0.0  ;;  %v445_v23 = vmul.f32 2.0, %v415_v19  ;;  %v509_v25 = vsel %vm501_vm1, %v456_v14, 1e+30  ;;  %v450_v27 = vsub.f32 %v434_v56, %v442_v16 }
  0xed   : > { %v513_v26 = vsel %vm505_vm4, %v460_v15, 1e+30  ;;  %v454_v28 = vsub.f32 %v438_v4, %v446_v17  ;;  %517 = vst [vmem:[%s777_s17 + $0x8] sm:$0xff] %v509_v25  ;;  %v449_v30 = vsub.f32 %v433_v55, %v441_v22  ;;  %v508_v32 = vsel %vm500_vm2, %v455_v20, 1e+30 }
  0xee   : > { %521 = vst [vmem:[%s777_s17 + $0x28] sm:$0xff] %v513_v26  ;;  %v512_v29 = vsel %vm504_vm3, %v459_v21, 1e+30  ;;  %v453_v31 = vsub.f32 %v437_v7, %v445_v23  ;;  %v458_v33 = vmax.f32 %v450_v27, 0.0  ;;  %516 = vst [vmem:[%s777_s17] sm:$0xff] %v508_v32 }
  0xef   : > { %520 = vst [vmem:[%s777_s17 + $0x20] sm:$0xff] %v512_v29  ;;  %v462_v34 = vmax.f32 %v454_v28, 0.0  ;;  %v457_v35 = vmax.f32 %v449_v30, 0.0 }
  0xf0   : > { %v461_v36 = vmax.f32 %v453_v31, 0.0  ;;  %v511_v37 = vsel %vm503_vm5, %v458_v33, 1e+30 }
  0xf1   : > { %v515_v38 = vsel %vm507_vm6, %v462_v34, 1e+30  ;;  %519 = vst [vmem:[%s777_s17 + $0x18] sm:$0xff] %v511_v37  ;;  %v510_v39 = vsel %vm502_vm7, %v457_v35, 1e+30 }
  0xf2   : > { %523 = vst [vmem:[%s777_s17 + $0x38] sm:$0xff] %v515_v38  ;;  %v514_v40 = vsel %vm506_vm8, %v461_v36, 1e+30  ;;  %518 = vst [vmem:[%s777_s17 + $0x10] sm:$0xff] %v510_v39 }
  0xf3   : > { %522 = vst [vmem:[%s777_s17 + $0x30] sm:$0xff] %v514_v40 }
  0xf4 PF: > { %s15_s18 = sadd.s32 1, %s676_s18  }
  0xf5   : > { %p12_p4 = scmp.ge.s32.totalorder %s15_s18, 4  }
  0xf7   :  { %14 = sbr.rel (!%p12_p4) target bundleno = 1 (0x1), region = 73 }

// kernel: sub.3
= control target key start
LH: loop header
LB: loop body
LE: loop exit
PB: predicated region body
PF: predicated region fallthrough
CT: control target
= control target key end

     0   :  { %s100_s0 = inlined_call_operand.vmem [shape: f32[16,32], index: 0, kind: input, shape index: {}]   ;;  %s101_s1 = inlined_call_operand.vmem [shape: f32[16,32], index: 1, kind: input, shape index: {}]   ;;  %s102_s2 = inlined_call_operand.vmem [shape: f32[16,32], index: 2, kind: output, shape index: {}]  }
   0x1   :  { %v3_v0 = vld [vmem:[%s100_s0] sm:$0xff]  ;;  %v40_v2 = vld [vmem:[%s100_s0 + $0x8] sm:$0xff]  ;;  %v43_v5 = vld [vmem:[%s100_s0 + $0x10] sm:$0xff] }
   0x2   :  { %v4_v1 = vld [vmem:[%s101_s1] sm:$0xff]  ;;  %v41_v4 = vld [vmem:[%s101_s1 + $0x8] sm:$0xff]  ;;  %v44_v6 = vld [vmem:[%s101_s1 + $0x10] sm:$0xff] }
   0x3   :  { %v7_v3 = vsub.f32 %v3_v0, %v4_v1  ;;  %v16_v7 = vsub.f32 %v40_v2, %v41_v4  ;;  %v26_v8 = vsub.f32 %v43_v5, %v44_v6  ;;  %v46_v9 = vld [vmem:[%s100_s0 + $0x18] sm:$0xff] }
   0x4   :  { %v47_v10 = vld [vmem:[%s101_s1 + $0x18] sm:$0xff] }
   0x5   :  { %9 = vst [vmem:[%s102_s2] sm:$0xff] %v7_v3  ;;  %v36_v11 = vsub.f32 %v46_v9, %v47_v10  ;;  %42 = vst [vmem:[%s102_s2 + $0x8] sm:$0xff] %v16_v7 }
   0x6   :  { %45 = vst [vmem:[%s102_s2 + $0x10] sm:$0xff] %v26_v8 }
   0x7   :  { %48 = vst [vmem:[%s102_s2 + $0x18] sm:$0xff] %v36_v11 }

// kernel: net_forward.8
= control target key start
LH: loop header
LB: loop body
LE: loop exit
PB: predicated region body
PF: predicated region fallthrough
CT: control target
= control target key end

     0   :  { %s695_s18 = smov 0   ;;  %s785_s0 = inlined_call_operand.vmem [shape: f32[128,16], index: 0, kind: input, shape index: {}]   ;;  %s786_s1 = inlined_call_operand.vmem [shape: s32[128,1], index: 1, kind: input, shape index: {}]   ;;  %s787_s2 = inlined_call_operand.vmem [shape: f32[16,128], index: 2, kind: input, shape index: {}]   ;;  %s788_s3 = inlined_call_operand.vmem [shape: f32[1,128], index: 3, kind: input, shape index: {}]   ;;  %s789_s4 = inlined_call_operand.vmem [shape: s32[1,128], index: 4, kind: input, shape index: {}]   ;;  %s790_s5 = inlined_call_operand.vmem [shape: f32[128,128], index: 5, kind: output, shape index: {}]  }
   0x1 LB: > { %s590_s19 = sadd.s32 4294967295, %s662_s18   ;;  %p594_p0 = scmp.ge.s32.totalorder %s662_s18, 1  ;;  %s662_s18 = sphi %s695_s18, %s15_s18  }
   0x2   : > { %p199_p1 = scmp.lt.s32.totalorder %s662_s18, 3 }
   0x4   : > { %p200_p2 = pnand %p594_p0, %p199_p1 }
   0x5   : > { %v291_v0 = vld [vmem:[%s787_s2] sm:$0xff] (!%p200_p2)  ;;  %v292_v1 = vld [vmem:[%s787_s2 + $0x8] sm:$0xff] (!%p200_p2)  ;;  %s595_s24 = sshll.u32 (!%p200_p2), %s590_s19, 3  ;;  %v664_v3 = vmov (!%p200_p2), 0   ;;  %vm266_vm0 = vcmask (!%p200_p2), 130048  }
   0x6   : > { %203 = sbr.rel (%p200_p2) target bundleno = 244 (0xf4), region = 40  ;;  %v639_v2 = vpack.c.bf16 (!%p200_p2), %v292_v1, %v291_v0  ;;  %p233_p3 = scmp.lt.s32.totalorder (!%p200_p2), %s595_s24, 15  ;;  %655 = vset.pattern.permute.xlu1 (!%p200_p2), %v664_v3  ;;  %654 = vset.pattern.permute.xlu0 (!%p200_p2), %v664_v3  ;;  %v609_v49 = vld [vmem:[%s788_s3] ss:$0 sm:$0xff] (!%p200_p2) }
   0x7   : > { %v747_v54 = vld [vmem:[%s789_s4] ss:$0 sm:$0xff] (!%p200_p2) }
   0x8   : > { %640 = vmatprep.subr.bf16.mxu0 (!%p200_p2), %v639_v2  ;;  %643 = vmatprep.subr.bf16.mxu1 (!%p200_p2), %v639_v2 }
   0x9   : > { %642 = vmatpush3.bf16.msra.mxu0 (!%p200_p2), %v639_v2  ;;  %644 = vmatpush3.bf16.msra.mxu1 (!%p200_p2), %v639_v2 }
   0xd   : > { %s792_s24 = smov (!%p233_p3, %s595_s24), 15 }
   0xe   : > { %s709_s25 = sshll.u32 %s792_s24, 3 }
   0xf   : > { %s236_s28 = scalar_lea.vmem %s785_s0, %s709_s25  ;;  %s242_s6 = scalar_lea.vmem %s786_s1, %s709_s25 }
  0x10   : > { %v250_v4 = vld [vmem:[%s236_s28] sm:$0xff]  ;;  %v251_v6 = vld [vmem:[%s236_s28 + $0x8] sm:$0xff]  ;;  %v252_v9 = vld [vmem:[%s236_s28 + $0x10] sm:$0xff]  ;;  %s757_s13 = scalar_lea.vmem %s790_s5, %s709_s25 }
  0x11   : > { %v254_v5 = vld [vmem:[%s236_s28 + $0x20] sm:$0xff]  ;;  %v258_v7 = vmul.f32 %v250_v4, %v250_v4  ;;  %627 = vmatprep.mubr.msk.f32.mxu0 %vm266_vm0, %v250_v4  ;;  %v255_v8 = vld [vmem:[%s236_s28 + $0x28] sm:$0xff]  ;;  %v256_v10 = vld [vmem:[%s236_s28 + $0x30] sm:$0xff]  ;;  %v259_v11 = vmul.f32 %v251_v6, %v251_v6  ;;  %v260_v13 = vmul.f32 %v252_v9, %v252_v9 }
  0x12   : > { %633 = vmatprep.mubr.msk.f32.mxu1 %vm266_vm0, %v254_v5  ;;  %628 = vmatmul.mubr.msk.f32.vlgmr.msra.gmra.mrb[0].mxu0 %vm266_vm0, %v251_v6  ;;  %v253_v12 = vld [vmem:[%s236_s28 + $0x18] sm:$0xff]  ;;  %v262_v18 = vmul.f32 %v254_v5, %v254_v5  ;;  %v263_v21 = vmul.f32 %v255_v8, %v255_v8  ;;  %v264_v23 = vmul.f32 %v256_v10, %v256_v10  ;;  %v462_v28 = vld [vmem:[%s242_s6 + $0x8] sm:$0xff]  ;;  %v463_v29 = vld [vmem:[%s242_s6 + $0x10] sm:$0xff] }
  0x13   : > { %634 = vmatmul.mubr.msk.f32.vlgmr.msra.gmra.mrb[0].mxu1 %vm266_vm0, %v255_v8  ;;  %630 = vmatprep.mubr.msk.f32.mxu0 %vm266_vm0, %v252_v9  ;;  %v257_v14 = vld [vmem:[%s236_s28 + $0x38] sm:$0xff]  ;;  %v261_v15 = vmul.f32 %v253_v12, %v253_v12  ;;  %v267_v16 = vsel %vm266_vm0, %v258_v7, 0.0  ;;  %v273_v17 = vsel %vm266_vm0, %v260_v13, 0.0  ;;  %v270_v19 = vsel %vm266_vm0, %v259_v11, 0.0  ;;  %v461_v30 = vld [vmem:[%s242_s6] sm:$0xff]  ;;  %v466_v33 = vld [vmem:[%s242_s6 + $0x28] sm:$0xff] }
  0x14   : > { %636 = vmatprep.mubr.msk.f32.mxu1 %vm266_vm0, %v256_v10  ;;  %268 = vadd.xlane.f32.xlu0 %v267_v16  ;;  %v279_v22 = vsel %vm266_vm0, %v262_v18, 0.0  ;;  %v282_v24 = vsel %vm266_vm0, %v263_v21, 0.0  ;;  %v265_v25 = vmul.f32 %v257_v14, %v257_v14  ;;  %v285_v26 = vsel %vm266_vm0, %v264_v23, 0.0  ;;  %v464_v31 = vld [vmem:[%s242_s6 + $0x18] sm:$0xff]  ;;  %v465_v32 = vld [vmem:[%s242_s6 + $0x20] sm:$0xff]  ;;  %v467_v34 = vld [vmem:[%s242_s6 + $0x30] sm:$0xff] }
  0x15   : > { %274 = vadd.xlane.f32.xlu1 %v273_v17  ;;  %v276_v20 = vsel %vm266_vm0, %v261_v15, 0.0  ;;  %v468_v35 = vld [vmem:[%s242_s6 + $0x38] sm:$0xff] }
  0x16   : > { %631 = vmatmul.mubr.msk.f32.gmra.mrb[2].mxu0 %vm266_vm0, %v253_v12  ;;  %v288_v27 = vsel %vm266_vm0, %v265_v25, 0.0 }
  0x17   : > { %637 = vmatmul.mubr.msk.f32.gmra.mrb[2].mxu1 %vm266_vm0, %v257_v14 }
  0x18   : > { %271 = vadd.xlane.f32.xlu0 %v270_v19 }
  0x19   : > { %277 = vadd.xlane.f32.xlu1 %v276_v20 }
  0x1c   : > { %280 = vadd.xlane.f32.xlu0 %v279_v22 }
  0x1d   : > { %283 = vadd.xlane.f32.xlu1 %v282_v24 }
  0x20   : > { %286 = vadd.xlane.f32.xlu0 %v285_v26 }
  0x21   : > { %289 = vadd.xlane.f32.xlu1 %v288_v27 }
  0x32   : > { %474 = vperm.xlu1 %655, %v462_v28  }
  0x36   : > { %477 = vperm.xlu1 %655, %v463_v29   ;;  %471 = vperm.xlu0 %654, %v461_v30  }
  0x3a   : > { %480 = vperm.xlu1 %655, %v464_v31  }
  0x3e   : > { %483 = vperm.xlu1 %655, %v465_v32  }
  0x42   : > { %486 = vperm.xlu1 %655, %v466_v33  }
  0x46   : > { %489 = vperm.xlu1 %655, %v467_v34  }
  0x4a   : > { %492 = vperm.xlu1 %655, %v468_v35  }
  0xa1   : > { %v269_v42 = vpop.xlane.xlu0 %268 }
  0xa2   : > { %v275_v36 = vpop.xlane.xlu1 %274  ;;  %v429_v55 = vadd.f32 %v609_v49, %v269_v42 }
  0xa3   : > { %v431_v52 = vadd.f32 %v609_v49, %v275_v36 }
  0xa5   : > { %v272_v44 = vpop.xlane.xlu0 %271 }
  0xa6   : > { %v278_v37 = vpop.xlane.xlu1 %277  ;;  %v430_v56 = vadd.f32 %v609_v49, %v272_v44 }
  0xa7   : > { %v432_v53 = vadd.f32 %v609_v49, %v278_v37 }
  0xa9   : > { %v281_v46 = vpop.xlane.xlu0 %280 }
  0xaa   : > { %v284_v38 = vpop.xlane.xlu1 %283  ;;  %v433_v60 = vadd.f32 %v609_v49, %v281_v46 }
  0xab   : > { %v434_v59 = vadd.f32 %v609_v49, %v284_v38 }
  0xad   : > { %v287_v48 = vpop.xlane.xlu0 %286 }
  0xae   : > { %v290_v39 = vpop.xlane.xlu1 %289  ;;  %v435_v4 = vadd.f32 %v609_v49, %v287_v48 }
  0xaf   : > { %v436_v1 = vadd.f32 %v609_v49, %v290_v39 }
  0xb2   : > { %v475_v40 = vpop.permute.xlu1 %474 }
  0xb3   : > { %vm499_vm1 = vcmp.eq.s32.totalorder %v475_v40, %v747_v54 }
  0xb5   : > { %v472_v51 = vpop.permute.xlu0 %471 }
  0xb6   : > { %v735_v41 = vpop.permute.xlu1 %477  ;;  %vm498_vm2 = vcmp.eq.s32.totalorder %v472_v51, %v747_v54 }
  0xb7   : > { %vm500_vm7 = vcmp.eq.s32.totalorder %v735_v41, %v747_v54 }
  0xba   : > { %v737_v43 = vpop.permute.xlu1 %480 }
  0xbb   : > { %vm501_vm5 = vcmp.eq.s32.totalorder %v737_v43, %v747_v54 }
  0xbe   : > { %v484_v45 = vpop.permute.xlu1 %483 }
  0xbf   : > { %vm502_vm3 = vcmp.eq.s32.totalorder %v484_v45, %v747_v54 }
  0xc2   : > { %v487_v47 = vpop.permute.xlu1 %486 }
  0xc3   : > { %vm503_vm4 = vcmp.eq.s32.totalorder %v487_v47, %v747_v54 }
  0xc6   : > { %v742_v50 = vpop.permute.xlu1 %489 }
  0xc7   : > { %vm504_vm8 = vcmp.eq.s32.totalorder %v742_v50, %v747_v54 }
  0xca   : > { %v493_v21 = vpop.permute.xlu1 %492 }
  0xcb   : > { %vm505_vm6 = vcmp.eq.s32.totalorder %v493_v21, %v747_v54 }
  0xe5   : > { %v629_v57 = vpop.f32.mrb[0].mxu0 }
  0xe6   : > { %v635_v58 = vpop.f32.mrb[0].mxu1  ;;  %v438_v61 = vmul.f32 2.0, %v629_v57  ;;  %v383_v63 = vpop.f32.mrb[1].mxu0 }
  0xe7   : > { %v442_v62 = vmul.f32 2.0, %v635_v58  ;;  %v403_v0 = vpop.f32.mrb[1].mxu1  ;;  %v437_v2 = vmul.f32 2.0, %v383_v63 }
  0xe8   : > { %v441_v3 = vmul.f32 2.0, %v403_v0  ;;  %v446_v5 = vsub.f32 %v430_v56, %v438_v61 }
  0xe9   : > { %v450_v6 = vsub.f32 %v434_v59, %v442_v62  ;;  %v445_v7 = vsub.f32 %v429_v55, %v437_v2  ;;  %v632_v9 = vpop.f32.mrb[2].mxu0 }
  0xea   : > { %v449_v8 = vsub.f32 %v433_v60, %v441_v3  ;;  %v638_v10 = vpop.f32.mrb[2].mxu1  ;;  %v454_v11 = vmax.f32 %v446_v5, 0.0  ;;  %v440_v13 = vmul.f32 2.0, %v632_v9  ;;  %v393_v15 = vpop.f32.mrb[3].mxu0 }
  0xeb   : > { %v458_v12 = vmax.f32 %v450_v6, 0.0  ;;  %v444_v14 = vmul.f32 2.0, %v638_v10  ;;  %v413_v16 = vpop.f32.mrb[3].mxu1  ;;  %v453_v17 = vmax.f32 %v445_v7, 0.0  ;;  %v439_v19 = vmul.f32 2.0, %v393_v15 }
  0xec   : > { %v457_v18 = vmax.f32 %v449_v8, 0.0  ;;  %v443_v20 = vmul.f32 2.0, %v413_v16  ;;  %v507_v22 = vsel %vm499_vm1, %v454_v11, 1e+30  ;;  %v448_v24 = vsub.f32 %v432_v53, %v440_v13 }
  0xed   : > { %v511_v23 = vsel %vm503_vm4, %v458_v12, 1e+30  ;;  %v452_v25 = vsub.f32 %v436_v1, %v444_v14  ;;  %515 = vst [vmem:[%s757_s13 + $0x8] sm:$0xff] %v507_v22  ;;  %v447_v27 = vsub.f32 %v431_v52, %v439_v19  ;;  %v506_v29 = vsel %vm498_vm2, %v453_v17, 1e+30 }
  0xee   : > { %519 = vst [vmem:[%s757_s13 + $0x28] sm:$0xff] %v511_v23  ;;  %v510_v26 = vsel %vm502_vm3, %v457_v18, 1e+30  ;;  %v451_v28 = vsub.f32 %v435_v4, %v443_v20  ;;  %v456_v30 = vmax.f32 %v448_v24, 0.0  ;;  %514 = vst [vmem:[%s757_s13] sm:$0xff] %v506_v29 }
  0xef   : > { %518 = vst [vmem:[%s757_s13 + $0x20] sm:$0xff] %v510_v26  ;;  %v460_v31 = vmax.f32 %v452_v25, 0.0  ;;  %v455_v32 = vmax.f32 %v447_v27, 0.0 }
  0xf0   : > { %v459_v33 = vmax.f32 %v451_v28, 0.0  ;;  %v509_v34 = vsel %vm501_vm5, %v456_v30, 1e+30 }
  0xf1   : > { %v513_v35 = vsel %vm505_vm6, %v460_v31, 1e+30  ;;  %517 = vst [vmem:[%s757_s13 + $0x18] sm:$0xff] %v509_v34  ;;  %v508_v36 = vsel %vm500_vm7, %v455_v32, 1e+30 }
  0xf2   : > { %521 = vst [vmem:[%s757_s13 + $0x38] sm:$0xff] %v513_v35  ;;  %v512_v37 = vsel %vm504_vm8, %v459_v33, 1e+30  ;;  %516 = vst [vmem:[%s757_s13 + $0x10] sm:$0xff] %v508_v36 }
  0xf3   : > { %520 = vst [vmem:[%s757_s13 + $0x30] sm:$0xff] %v512_v37 }
  0xf4 PF: > { %s15_s18 = sadd.s32 1, %s662_s18  }
  0xf5   : > { %p12_p4 = scmp.ge.s32.totalorder %s15_s18, 4  }
  0xf7   :  { %14 = sbr.rel (!%p12_p4) target bundleno = 1 (0x1), region = 73 }

// kernel: net_forward.7
= control target key start
LH: loop header
LB: loop body
LE: loop exit
PB: predicated region body
PF: predicated region fallthrough
CT: control target
= control target key end

     0   :  { %s2356_s17 = smov 0   ;;  %s2878_s0 = inlined_call_operand.vmem [shape: f32[128,32], index: 0, kind: input, shape index: {}]   ;;  %s2879_s1 = inlined_call_operand.vmem [shape: s32[128,1], index: 1, kind: input, shape index: {}]   ;;  %s2880_s2 = inlined_call_operand.vmem [shape: f32[128,1], index: 2, kind: input, shape index: {}]   ;;  %s2881_s3 = inlined_call_operand.vmem [shape: f32[1,128,32], index: 3, kind: input, shape index: {}]   ;;  %s2882_s4 = inlined_call_operand.vmem [shape: f32[1,32,128], index: 4, kind: input, shape index: {}]   ;;  %s2883_s5 = inlined_call_operand.vmem [shape: f32[1,1,128], index: 5, kind: input, shape index: {}]   ;;  %s2884_s6 = inlined_call_operand.vmem [shape: s32[1,1,128], index: 6, kind: input, shape index: {}]   ;;  %s2885_s7 = inlined_call_operand.vmem [shape: f32[32,16], index: 7, kind: input, shape index: {}]   ;;  %s2886_s8 = inlined_call_operand.vmem [shape: f32[32,16], index: 8, kind: input, shape index: {}]   ;;  %s2887_s9 = inlined_call_operand.vmem [shape: f32[16,32], index: 9, kind: input, shape index: {}]   ;;  %s2888_s10 = inlined_call_operand.vmem [shape: f32[1,16], index: 10, kind: input, shape index: {}]   ;;  %s2889_s11 = inlined_call_operand.vmem [shape: f32[128,16], index: 11, kind: output, shape index: {}]  }
   0x1 LB: > { %s1899_s18 = sadd.s32 4294967295, %s2286_s17   ;;  %p1903_p0 = scmp.ge.s32.totalorder %s2286_s17, 1  ;;  %s2286_s17 = sphi %s2356_s17, %s21_s17  }
   0x2   : > { %p360_p1 = scmp.lt.s32.totalorder %s2286_s17, 3 }
   0x4   : > { %p361_p2 = pnand %p1903_p0, %p360_p1 }
   0x5   : > { %v497_v0 = vld [vmem:[%s2885_s7] sm:$0xff] (!%p361_p2)  ;;  %v498_v1 = vld [vmem:[%s2885_s7 + $0x8] sm:$0xff] (!%p361_p2)  ;;  %v499_v2 = vld [vmem:[%s2885_s7 + $0x10] sm:$0xff] (!%p361_p2)  ;;  %s1904_s25 = sshll.u32 (!%p361_p2), %s1899_s18, 3  ;;  %v2292_v5 = vmov (!%p361_p2), 0   ;;  %vm472_vm0 = vcmask (!%p361_p2), 261120  }
   0x6   : > { %364 = sbr.rel (%p361_p2) target bundleno = 840 (0x348), region = 64  ;;  %v2169_v3 = vpack.c.bf16 (!%p361_p2), %v498_v1, %v497_v0  ;;  %v500_v4 = vld [vmem:[%s2885_s7 + $0x18] sm:$0xff] (!%p361_p2)  ;;  %p411_p3 = scmp.lt.s32.totalorder (!%p361_p2), %s1904_s25, 15  ;;  %2258 = vset.pattern.permute.xlu1 (!%p361_p2), %v2292_v5  ;;  %2257 = vset.pattern.permute.xlu0 (!%p361_p2), %v2292_v5  ;;  %v646_v7 = vld [vmem:[%s2882_s4] sm:$0xff] (!%p361_p2)  ;;  %v647_v8 = vld [vmem:[%s2882_s4 + $0x8] sm:$0xff] (!%p361_p2)  ;;  %vm637_vm1 = vcmask (!%p361_p2), 130048  }
   0x7   : > { %v2173_v6 = vpack.c.bf16 (!%p361_p2), %v500_v4, %v499_v2  ;;  %v2177_v9 = vpack.c.bf16 (!%p361_p2), %v647_v8, %v646_v7  ;;  %v648_v10 = vld [vmem:[%s2882_s4 + $0x10] sm:$0xff] (!%p361_p2)  ;;  %v649_v11 = vld [vmem:[%s2882_s4 + $0x18] sm:$0xff] (!%p361_p2)  ;;  %v458_v21 = vld [vmem:[%s2886_s8] sm:$0xff] (!%p361_p2)  ;;  %s2757_s14 = smov (!%p361_p2), 0  }
   0x8   : > { %2233 = vmatprep.subr.bf16.mxu1 (!%p361_p2), %v2169_v3  ;;  %2170 = vmatprep.subr.bf16.mxu0 (!%p361_p2), %v2169_v3  ;;  %v2181_v16 = vpack.c.bf16 (!%p361_p2), %v649_v11, %v648_v10  ;;  %v459_v22 = vld [vmem:[%s2886_s8 + $0x8] sm:$0xff] (!%p361_p2)  ;;  %v460_v30 = vld [vmem:[%s2886_s8 + $0x10] sm:$0xff] (!%p361_p2)  ;;  %v461_v31 = vld [vmem:[%s2886_s8 + $0x18] sm:$0xff] (!%p361_p2) }
   0x9   : > { %2235 = vmatpush3.bf16.msra.mxu1 (!%p361_p2), %v2169_v3  ;;  %2172 = vmatpush3.bf16.msra.mxu0 (!%p361_p2), %v2169_v3  ;;  %v2193_v29 = vpack.c.bf16 (!%p361_p2), %v459_v22, %v458_v21  ;;  %v2197_v36 = vpack.c.bf16 (!%p361_p2), %v461_v31, %v460_v30  ;;  %v650_v43 = vld [vmem:[%s2881_s3] sm:$0xff] (!%p361_p2)  ;;  %v651_v44 = vld [vmem:[%s2881_s3 + $0x8] sm:$0xff] (!%p361_p2)  ;;  %v652_v45 = vld [vmem:[%s2881_s3 + $0x10] sm:$0xff] (!%p361_p2) }
   0xa   : > { %2234 = vmatprep.subr.bf16.mxu1 (!%p361_p2), %v2173_v6  ;;  %2174 = vmatprep.subr.bf16.mxu0 (!%p361_p2), %v2173_v6  ;;  %v653_v46 = vld [vmem:[%s2881_s3 + $0x18] sm:$0xff] (!%p361_p2)  ;;  %v654_v47 = vld [vmem:[%s2881_s3 + $0x20] sm:$0xff] (!%p361_p2)  ;;  %v655_v49 = vld [vmem:[%s2881_s3 + $0x28] sm:$0xff] (!%p361_p2) }
   0xb   : > { %v656_v50 = vld [vmem:[%s2881_s3 + $0x30] sm:$0xff] (!%p361_p2)  ;;  %v657_v52 = vld [vmem:[%s2881_s3 + $0x38] sm:$0xff] (!%p361_p2)  ;;  %v658_v53 = vld [vmem:[%s2881_s3 + $0x40] sm:$0xff] (!%p361_p2) }
   0xc   : > { %v659_v56 = vld [vmem:[%s2881_s3 + $0x48] sm:$0xff] (!%p361_p2)  ;;  %v660_v57 = vld [vmem:[%s2881_s3 + $0x50] sm:$0xff] (!%p361_p2)  ;;  %v661_v60 = vld [vmem:[%s2881_s3 + $0x58] sm:$0xff] (!%p361_p2) }
   0xd   : > { %s2905_s25 = smov (!%p411_p3, %s1904_s25), 15  ;;  %2236 = vmatpush3.bf16.msra.mxu1 %v2173_v6  ;;  %2176 = vmatpush3.bf16.msra.mxu0 %v2173_v6  ;;  %v662_v61 = vld [vmem:[%s2881_s3 + $0x60] sm:$0xff]  ;;  %v663_v0 = vld [vmem:[%s2881_s3 + $0x68] sm:$0xff]  ;;  %v664_v1 = vld [vmem:[%s2881_s3 + $0x70] sm:$0xff] }
   0xe   : > { %s2382_s13 = sshll.u32 %s2905_s25, 3  ;;  %2178 = vmatprep.subr.bf16.mxu1 %v2177_v9  ;;  %2186 = vmatprep.subr.bf16.mxu0 %v2177_v9  ;;  %v665_v4 = vld [vmem:[%s2881_s3 + $0x78] sm:$0xff]  ;;  %v462_v11 = vld [vmem:[%s2887_s9] sm:$0xff] }
   0xf   : > { %s414_s16 = scalar_lea.vmem %s2878_s0, %s2382_s13  ;;  %s2392_s20 = scalar_lea.vmem %s2889_s11, %s2382_s13 }
  0x10   : > { %v438_v12 = vld [vmem:[%s414_s16 + $0x20] sm:$0xff]  ;;  %v2401_v13 = vld [vmem:[%s414_s16 + $0x28] sm:$0xff]  ;;  %v440_v15 = vld [vmem:[%s414_s16 + $0x30] sm:$0xff]  ;;  %s2461_s27 = scalar_lea.vmem %s2880_s2, %s2382_s13 }
  0x11   : > { %2056 = vmatprep.mubr.msk.f32.mxu1 %vm472_vm0, %v438_v12  ;;  %v434_v14 = vld [vmem:[%s414_s16] sm:$0xff]  ;;  %v436_v17 = vld [vmem:[%s414_s16 + $0x10] sm:$0xff]  ;;  %v437_v18 = vld [vmem:[%s414_s16 + $0x18] sm:$0xff]  ;;  %v469_v33 = vmul.f32 %v2401_v13, %v2401_v13  ;;  %v468_v35 = vmul.f32 %v438_v12, %v438_v12  ;;  %v470_v40 = vmul.f32 %v440_v15, %v440_v15 }
  0x12   : > { %v464_v19 = vmul.f32 %v434_v14, %v434_v14  ;;  %v435_v20 = vld [vmem:[%s414_s16 + $0x8] sm:$0xff]  ;;  %v466_v23 = vmul.f32 %v436_v17, %v436_v17  ;;  %v467_v24 = vmul.f32 %v437_v18, %v437_v18  ;;  %2050 = vmatprep.mubr.msk.f32.mxu0 %vm472_vm0, %v434_v14  ;;  %2057 = vmatmul.mubr.msk.f32.vlgmr.msra.gmra.mrb[0].mxu1 %vm472_vm0, %v2401_v13  ;;  %v441_v27 = vld [vmem:[%s414_s16 + $0x38] sm:$0xff]  ;;  %v450_v48 = vld [vmem:[%s2461_s27] sm:$0xff]  ;;  %s2476_s16 = scalar_lea.vmem %s2879_s1, %s2382_s13 }
  0x13   : > { %v465_v26 = vmul.f32 %v435_v20, %v435_v20  ;;  %2180 = vmatpush3.bf16.msra.mxu1 %v2177_v9  ;;  %2059 = vmatprep.mubr.msk.f32.mxu1 %vm472_vm0, %v440_v15  ;;  %v488_v37 = vsel %vm472_vm0, %v469_v33, 0.0  ;;  %v471_v38 = vmul.f32 %v441_v27, %v441_v27  ;;  %v485_v39 = vsel %vm472_vm0, %v468_v35, 0.0  ;;  %v443_v51 = vld [vmem:[%s2476_s16 + $0x8] sm:$0xff]  ;;  %v442_v54 = vld [vmem:[%s2476_s16] sm:$0xff]  ;;  %v444_v59 = vld [vmem:[%s2476_s16 + $0x10] sm:$0xff] }
  0x14   : > { %v473_v25 = vsel %vm472_vm0, %v464_v19, 0.0  ;;  %v479_v28 = vsel %vm472_vm0, %v466_v23, 0.0  ;;  %2182 = vmatprep.subr.bf16.mxu1 %v2181_v16  ;;  %v482_v32 = vsel %vm472_vm0, %v467_v24, 0.0  ;;  %2051 = vmatmul.mubr.msk.f32.vlgmr.msra.gmra.mrb[0].mxu0 %vm472_vm0, %v435_v20  ;;  %v491_v42 = vsel %vm472_vm0, %v470_v40, 0.0  ;;  %v451_v55 = vld [vmem:[%s2461_s27 + $0x8] sm:$0xff]  ;;  %v454_v58 = vld [vmem:[%s2461_s27 + $0x20] sm:$0xff] }
  0x15   : > { %480 = vadd.xlane.f32.xlu1 %v479_v28  ;;  %474 = vadd.xlane.f32.xlu0 %v473_v25  ;;  %v476_v34 = vsel %vm472_vm0, %v465_v26, 0.0  ;;  %v494_v41 = vsel %vm472_vm0, %v471_v38, 0.0  ;;  %v455_v62 = vld [vmem:[%s2461_s27 + $0x28] sm:$0xff]  ;;  %v452_v63 = vld [vmem:[%s2461_s27 + $0x10] sm:$0xff]  ;;  %v445_v3 = vld [vmem:[%s2476_s16 + $0x18] sm:$0xff] }
  0x16   : > { %2060 = vmatmul.mubr.msk.f32.gmra.mrb[2].mxu1 %vm472_vm0, %v441_v27  ;;  %2188 = vmatpush3.bf16.msra.mxu0 %v2177_v9  ;;  %v456_v2 = vld [vmem:[%s2461_s27 + $0x30] sm:$0xff]  ;;  %v457_v5 = vld [vmem:[%s2461_s27 + $0x38] sm:$0xff]  ;;  %v446_v7 = vld [vmem:[%s2476_s16 + $0x20] sm:$0xff] }
  0x17   : > { %2184 = vmatpush3.bf16.msra.mxu1 %v2181_v16  ;;  %2070 = vmatprep.mubr.msk.f32.mxu1 %vm472_vm0, %v434_v14  ;;  %v453_v6 = vld [vmem:[%s2461_s27 + $0x18] sm:$0xff]  ;;  %v447_v8 = vld [vmem:[%s2476_s16 + $0x28] sm:$0xff]  ;;  %v448_v9 = vld [vmem:[%s2476_s16 + $0x30] sm:$0xff] }
  0x18   : > { %2194 = vmatprep.subr.bf16.mxu1 %v2193_v29  ;;  %2053 = vmatprep.mubr.msk.f32.mxu0 %vm472_vm0, %v436_v17  ;;  %v449_v10 = vld [vmem:[%s2476_s16 + $0x38] sm:$0xff] }
  0x19   : > { %483 = vadd.xlane.f32.xlu1 %v482_v32  ;;  %477 = vadd.xlane.f32.xlu0 %v476_v34  ;;  %v1929_v34 = vld [vmem:[%s2883_s5] ss:$0 sm:$0xff] }
  0x1a   : > { %2071 = vmatmul.mubr.msk.f32.vlgmr.msra.gmra.mrb[4].mxu1 %vm472_vm0, %v435_v20  ;;  %2054 = vmatmul.mubr.msk.f32.gmra.mrb[2].mxu0 %vm472_vm0, %v437_v18 }
  0x1b   : > { %2196 = vmatpush3.bf16.msra.mxu1 %v2193_v29  ;;  %2073 = vmatprep.mubr.msk.f32.mxu1 %vm472_vm0, %v436_v17 }
  0x1c   : > { %2198 = vmatprep.subr.bf16.mxu1 %v2197_v36  ;;  %2190 = vmatprep.subr.bf16.mxu0 %v2181_v16 }
  0x1d   : > { %489 = vadd.xlane.f32.xlu1 %v488_v37  ;;  %486 = vadd.xlane.f32.xlu0 %v485_v39 }
  0x1e   : > { %2074 = vmatmul.mubr.msk.f32.gmra.mrb[6].mxu1 %vm472_vm0, %v437_v18  ;;  %2192 = vmatpush3.bf16.msra.mxu0 %v2181_v16 }
  0x1f   : > { %2076 = vmatprep.mubr.msk.f32.mxu1 %vm472_vm0, %v438_v12  ;;  %2200 = vmatpush3.bf16.msra.mxu1 %v2197_v36  ;;  %v463_v12 = vld [vmem:[%s2887_s9 + $0x8] sm:$0xff] }
  0x20   : > { %2090 = vmatprep.mubr.msk.f32.mxu0 %vm472_vm0, %v462_v11 }
  0x21   : > { %495 = vadd.xlane.f32.xlu1 %v494_v41  ;;  %492 = vadd.xlane.f32.xlu0 %v491_v42 }
  0x22   : > { %2077 = vmatmul.mubr.msk.f32.gmra.mrb[8].mxu1 %vm472_vm0, %v2401_v13  ;;  %2091 = vmatmul.mubr.msk.f32.vlgmr.msra.gmra.mrb[4].mxu0 %vm472_vm0, %v463_v12 }
  0x23   : > { %2079 = vmatprep.mubr.msk.f32.mxu1 %vm472_vm0, %v440_v15 }
  0x26   : > { %2080 = vmatmul.mubr.msk.f32.gmra.mrb[10].mxu1 %vm472_vm0, %v441_v27  ;;  %v2555_v27 = vld [vmem:[%s2888_s10] ss:$0 sm:$0xff] }
  0x27   : > { %2101 = vmatprep.mubr.msk.f32.mxu1 %vm472_vm0, %v650_v43 }
  0x2a   : > { %2102 = vmatmul.mubr.msk.f32.vlgmr.msra.gmra.mrb[12].mxu1 %vm472_vm0, %v651_v44 }
  0x2b   : > { %2104 = vmatprep.mubr.msk.f32.mxu1 %vm472_vm0, %v652_v45 }
  0x2e   : > { %2105 = vmatmul.mubr.msk.f32.gmra.mrb[14].mxu1 %vm472_vm0, %v653_v46  ;;  %v2589_v46 = vld [vmem:[%s2884_s6] ss:$0 sm:$0xff] }
  0x2f   : > { %2107 = vmatprep.mubr.msk.f32.mxu1 %vm472_vm0, %v654_v47 }
  0x32   : > { %849 = vperm.xlu1 %2258, %v450_v48   ;;  %2108 = vmatmul.mubr.msk.f32.gmra.mrb[16].mxu1 %vm472_vm0, %v655_v49 }
  0x33   : > { %2110 = vmatprep.mubr.msk.f32.mxu1 %vm472_vm0, %v656_v50 }
  0x36   : > { %815 = vperm.xlu1 %2258, %v443_v51   ;;  %2111 = vmatmul.mubr.msk.f32.gmra.mrb[18].mxu1 %vm472_vm0, %v657_v52 }
  0x37   : > { %2113 = vmatprep.mubr.msk.f32.mxu1 %vm472_vm0, %v658_v53  ;;  %812 = vperm.xlu0 %2257, %v442_v54  }
  0x3a   : > { %854 = vperm.xlu1 %2258, %v451_v55   ;;  %2114 = vmatmul.mubr.msk.f32.gmra.mrb[20].mxu1 %vm472_vm0, %v659_v56 }
  0x3b   : > { %2116 = vmatprep.mubr.msk.f32.mxu1 %vm472_vm0, %v660_v57  ;;  %869 = vperm.xlu0 %2257, %v454_v58  }
  0x3e   : > { %818 = vperm.xlu1 %2258, %v444_v59   ;;  %2117 = vmatmul.mubr.msk.f32.gmra.mrb[22].mxu1 %vm472_vm0, %v661_v60 }
  0x3f   : > { %2119 = vmatprep.mubr.msk.f32.mxu1 %vm472_vm0, %v662_v61  ;;  %874 = vperm.xlu0 %2257, %v455_v62  }
  0x42   : > { %859 = vperm.xlu1 %2258, %v452_v63   ;;  %2120 = vmatmul.mubr.msk.f32.gmra.mrb[24].mxu1 %vm472_vm0, %v663_v0 }
  0x43   : > { %2122 = vmatprep.mubr.msk.f32.mxu1 %vm472_vm0, %v664_v1  ;;  %879 = vperm.xlu0 %2257, %v456_v2  }
  0x46   : > { %821 = vperm.xlu1 %2258, %v445_v3   ;;  %2123 = vmatmul.mubr.msk.f32.gmra.mrb[26].mxu1 %vm472_vm0, %v665_v4 }
  0x47   : > { %884 = vperm.xlu0 %2257, %v457_v5  }
  0x4a   : > { %864 = vperm.xlu1 %2258, %v453_v6   ;;  %v2293_v6 = vmov 0.0  }
  0x4e   : > { %824 = vperm.xlu1 %2258, %v446_v7  }
  0x52   : > { %827 = vperm.xlu1 %2258, %v447_v8  }
  0x56   : > { %830 = vperm.xlu1 %2258, %v448_v9  }
  0x5a   : > { %833 = vperm.xlu1 %2258, %v449_v10   ;;  %v2294_v10 = vmov 1.0  }
  0xa2   : > { %v481_v13 = vpop.xlane.xlu1 %480  ;;  %v475_v20 = vpop.xlane.xlu0 %474 }
  0xa3   : > { %v778_v42 = vadd.f32 %v1929_v34, %v475_v20  ;;  %v780_v51 = vadd.f32 %v1929_v34, %v481_v13 }
  0xa6   : > { %v484_v14 = vpop.xlane.xlu1 %483  ;;  %v478_v22 = vpop.xlane.xlu0 %477 }
  0xa7   : > { %v779_v41 = vadd.f32 %v1929_v34, %v478_v22  ;;  %v781_v49 = vadd.f32 %v1929_v34, %v484_v14 }
  0xaa   : > { %v490_v15 = vpop.xlane.xlu1 %489  ;;  %v487_v24 = vpop.xlane.xlu0 %486 }
  0xab   : > { %v783_v60 = vadd.f32 %v1929_v34, %v490_v15  ;;  %v782_v62 = vadd.f32 %v1929_v34, %v487_v24 }
  0xae   : > { %v2542_v16 = vpop.xlane.xlu1 %495  ;;  %v2550_v26 = vpop.xlane.xlu0 %492 }
  0xaf   : > { %v785_v13 = vadd.f32 %v1929_v34, %v2542_v16  ;;  %v784_v15 = vadd.f32 %v1929_v34, %v2550_v26 }
  0xb2   : > { %v850_v17 = vpop.permute.xlu1 %849 }
  0xb6   : > { %v816_v18 = vpop.permute.xlu1 %815  ;;  %v813_v30 = vpop.permute.xlu0 %812 }
  0xb7   : > { %vm840_vm2 = vcmp.eq.s32.totalorder %v816_v18, %v2589_v46  ;;  %vm839_vm3 = vcmp.eq.s32.totalorder %v813_v30, %v2589_v46 }
  0xba   : > { %v855_v19 = vpop.permute.xlu1 %854  ;;  %v2580_v40 = vpop.permute.xlu0 %869 }
  0xbe   : > { %v2544_v21 = vpop.permute.xlu1 %818  ;;  %v2593_v54 = vpop.permute.xlu0 %874 }
  0xbf   : > { %vm841_vm9 = vcmp.eq.s32.totalorder %v2544_v21, %v2589_v46 }
  0xc2   : > { %v2546_v23 = vpop.permute.xlu1 %859  ;;  %v880_v12 = vpop.permute.xlu0 %879 }
  0xc6   : > { %v2548_v25 = vpop.permute.xlu1 %821 }
  0xc7   : > { %vm842_vm7 = vcmp.eq.s32.totalorder %v2548_v25, %v2589_v46 }
  0xca   : > { %v2557_v28 = vpop.permute.xlu1 %864 }
  0xce   : > { %v2572_v36 = vpop.permute.xlu1 %824 }
  0xcf   : > { %vm843_vm15 = vcmp.eq.s32.totalorder %v2572_v36, %v2589_v46 }
  0xd2   : > { %v2591_v48 = vpop.permute.xlu1 %827 }
  0xd3   : > { %vm844_vm13 = vcmp.eq.s32.totalorder %v2591_v48, %v2589_v46 }
  0xd6   : > { %v2601_v2 = vpop.permute.xlu1 %830 }
  0xe5   : > { %v2058_v29 = vpop.f32.mrb[0].mxu1 }
  0xe6   : > { %v2560_v31 = vadd.f32 %v2058_v29, %v2555_v27  ;;  %v618_v32 = vpop.f32.mrb[1].mxu1  ;;  %v834_v29 = vpop.permute.xlu1 %833 }
  0xe7   : > { %v2563_v33 = vadd.f32 %v2555_v27, %v618_v32 }
  0xe8   : > { %643 = vst.msk [vmem:[#allocation4 + $0x28] sm:$0xff] %vm637_vm1, %v2560_v31 }
  0xe9   : > { %642 = vst.msk [vmem:[#allocation4 + $0x20] sm:$0xff] %vm637_vm1, %v2563_v33  ;;  %v2061_v35 = vpop.f32.mrb[2].mxu1 }
  0xea   : > { %v2575_v37 = vadd.f32 %v2061_v35, %v2555_v27  ;;  %v628_v38 = vpop.f32.mrb[3].mxu1  ;;  %v885_v35 = vpop.permute.xlu0 %884 }
  0xeb   : > { %v2578_v39 = vadd.f32 %v2555_v27, %v628_v38 }
  0xec   : > { %645 = vst.msk [vmem:[#allocation4 + $0x38] sm:$0xff] %vm637_vm1, %v2575_v37 }
  0xed   : > { %644 = vst.msk [vmem:[#allocation4 + $0x30] sm:$0xff] %vm637_vm1, %v2578_v39  ;;  %v2072_v43 = vpop.f32.mrb[4].mxu1 }
  0xee   : > { %v787_v44 = vmul.f32 2.0, %v2072_v43  ;;  %v732_v45 = vpop.f32.mrb[5].mxu1 }
  0xef   : > { %v786_v47 = vmul.f32 2.0, %v732_v45 }
  0xf0   : > { %v795_v50 = vsub.f32 %v779_v41, %v787_v44 }
  0xf1   : > { %v794_v52 = vsub.f32 %v778_v42, %v786_v47  ;;  %v2075_v53 = vpop.f32.mrb[6].mxu1 }
  0xf2   : > { %v803_v55 = vmax.f32 %v795_v50, 0.0  ;;  %v789_v56 = vmul.f32 2.0, %v2075_v53  ;;  %v742_v57 = vpop.f32.mrb[7].mxu1 }
  0xf3   : > { %v802_v58 = vmax.f32 %v794_v52, 0.0  ;;  %v788_v59 = vmul.f32 2.0, %v742_v57 }
  0xf4   : > { %v797_v61 = vsub.f32 %v781_v49, %v789_v56  ;;  %vm888_vm4 = vcmp.le.f32.partialorder %v803_v55, %v855_v19 }
  0xf5   : > { %vm887_vm5 = vcmp.le.f32.partialorder %v802_v58, %v850_v17  ;;  %v796_v63 = vsub.f32 %v780_v51, %v788_v59  ;;  %v2078_v0 = vpop.f32.mrb[8].mxu1  ;;  %vm2597_vm6 = vmand %vm840_vm2, %vm888_vm4  ;;  %vm846_vm4 = vcmp.eq.s32.totalorder %v834_v29, %v2589_v46 }
  0xf6   : > { %vm895_vm8 = vmand %vm839_vm3, %vm887_vm5  ;;  %v805_v3 = vmax.f32 %v797_v61, 0.0  ;;  %v791_v4 = vmul.f32 2.0, %v2078_v0  ;;  %v752_v5 = vpop.f32.mrb[9].mxu1  ;;  %v1932_v7 = vsel %vm2597_vm6, 1.0, %v2293_v6 }
  0xf7   : > { %v804_v8 = vmax.f32 %v796_v63, 0.0  ;;  %v790_v9 = vmul.f32 2.0, %v752_v5  ;;  %2157 = vmatprep.mubr.msk.f32.mxu0 %vm895_vm8, %v2294_v10  ;;  %1205 = vadd.xlane.f32.xlu0 %v1932_v7  ;;  %920 = vst [vmem:[#allocation2 + $0x8] sm:$0xff] %v1932_v7  ;;  %v1931_v11 = vsel %vm895_vm8, 1.0, %v2293_v6 }
  0xf8   : > { %v799_v14 = vsub.f32 %v783_v60, %v791_v4  ;;  %1203 = vadd.xlane.f32.xlu1 %v1931_v11  ;;  %919 = vst [vmem:[#allocation2] sm:$0xff] %v1931_v11  ;;  %vm890_vm10 = vcmp.le.f32.partialorder %v805_v3, %v2557_v28 }
  0xf9   : > { %v798_v17 = vsub.f32 %v782_v62, %v790_v9  ;;  %v2081_v18 = vpop.f32.mrb[10].mxu1  ;;  %vm889_vm11 = vcmp.le.f32.partialorder %v804_v8, %v2546_v23  ;;  %vm2619_vm12 = vmand %vm842_vm7, %vm890_vm10  ;;  %vm845_vm7 = vcmp.eq.s32.totalorder %v2601_v2, %v2589_v46  ;;  %v2052_v62 = vpop.f32.mrb[0].mxu0 }
  0xfa   : > { %v807_v16 = vmax.f32 %v799_v14, 0.0  ;;  %v793_v20 = vmul.f32 2.0, %v2081_v18  ;;  %v762_v22 = vpop.f32.mrb[11].mxu1  ;;  %vm2628_vm14 = vmand %vm841_vm9, %vm889_vm11  ;;  %v1934_v23 = vsel %vm2619_vm12, 1.0, %v2293_v6  ;;  %v2685_v0 = vadd.f32 %v2052_v62, %v2555_v27  ;;  %v598_v2 = vpop.f32.mrb[1].mxu0 }
  0xfb   : > { %v806_v25 = vmax.f32 %v798_v17, 0.0  ;;  %v792_v26 = vmul.f32 2.0, %v762_v22  ;;  %v1933_v28 = vsel %vm2628_vm14, 1.0, %v2293_v6  ;;  %922 = vst [vmem:[#allocation2 + $0x18] sm:$0xff] %v1934_v23  ;;  %v2688_v4 = vadd.f32 %v2555_v27, %v598_v2  ;;  %v2055_v5 = vpop.f32.mrb[2].mxu0 }
  0xfc   : > { %vm892_vm0 = vcmp.le.f32.partialorder %v807_v16, %v2593_v54  ;;  %v801_v21 = vsub.f32 %v785_v13, %v793_v20  ;;  %921 = vst [vmem:[#allocation2 + $0x10] sm:$0xff] %v1933_v28  ;;  %1207 = vadd.xlane.f32.xlu0 %v1933_v28  ;;  %1209 = vadd.xlane.f32.xlu1 %v1934_v23  ;;  %639 = vst.msk [vmem:[#allocation4 + $0x8] sm:$0xff] %vm637_vm1, %v2685_v0  ;;  %v608_v7 = vpop.f32.mrb[3].mxu0 }
  0xfd   : > { %v800_v30 = vsub.f32 %v784_v15, %v792_v26  ;;  %v2103_v32 = vpop.f32.mrb[12].mxu1  ;;  %vm891_vm2 = vcmp.le.f32.partialorder %v806_v25, %v2580_v40  ;;  %vm2645_vm3 = vmand %vm844_vm13, %vm892_vm0  ;;  %638 = vst.msk [vmem:[#allocation4] sm:$0xff] %vm637_vm1, %v2688_v4  ;;  %v2698_v9 = vadd.f32 %v2555_v27, %v608_v7 }
  0xfe   : > { %v1124_v38 = vpop.f32.mrb[13].mxu1  ;;  %vm2653_vm5 = vmand %vm843_vm15, %vm891_vm2  ;;  %v1936_v40 = vsel %vm2645_vm3, 1.0, %v2293_v6  ;;  %v809_v42 = vmax.f32 %v801_v21, 0.0 }
  0xff   : > { %v808_v43 = vmax.f32 %v800_v30, 0.0  ;;  %v2201_v44 = vpack.c.bf16 %v2103_v32, %v1124_v38  ;;  %v1935_v45 = vsel %vm2653_vm5, 1.0, %v2293_v6  ;;  %924 = vst [vmem:[#allocation2 + $0x28] sm:$0xff] %v1936_v40  ;;  %640 = vst.msk [vmem:[#allocation4 + $0x10] sm:$0xff] %vm637_vm1, %v2698_v9 }
 0x100   : > { %1211 = vadd.xlane.f32.xlu0 %v1935_v45  ;;  %923 = vst [vmem:[#allocation2 + $0x20] sm:$0xff] %v1935_v45  ;;  %1213 = vadd.xlane.f32.xlu1 %v1936_v40  ;;  %vm894_vm8 = vcmp.le.f32.partialorder %v809_v42, %v885_v35 }
 0x101   : > { %vm893_vm9 = vcmp.le.f32.partialorder %v808_v43, %v880_v12  ;;  %v2106_v36 = vpop.f32.mrb[14].mxu1  ;;  %2202 = vmatprep.subr.bf16.mxu0 %v2201_v44  ;;  %vm2667_vm10 = vmand %vm846_vm4, %vm894_vm8 }
 0x102   : > { %v1134_v48 = vpop.f32.mrb[15].mxu1  ;;  %2204 = vmatpush3.bf16.msra.mxu0 %v2201_v44  ;;  %vm2674_vm11 = vmand %vm845_vm7, %vm893_vm9  ;;  %v1938_v50 = vsel %vm2667_vm10, 1.0, %v2293_v6 }
 0x103   : > { %v2205_v51 = vpack.c.bf16 %v2106_v36, %v1134_v48  ;;  %v1937_v52 = vsel %vm2674_vm11, 1.0, %v2293_v6  ;;  %926 = vst [vmem:[#allocation2 + $0x38] sm:$0xff] %v1938_v50  ;;  %v2693_v6 = vadd.f32 %v2055_v5, %v2555_v27  ;;  %v2092_v27 = vpop.f32.mrb[4].mxu0 }
 0x104   : > { %1215 = vadd.xlane.f32.xlu0 %v1937_v52  ;;  %925 = vst [vmem:[#allocation2 + $0x30] sm:$0xff] %v1937_v52  ;;  %1217 = vadd.xlane.f32.xlu1 %v1938_v50  ;;  %1009 = vst [vmem:[#allocation3 + $0x8] sm:$0xff] %v2092_v27  ;;  %v999_v1 = vpop.f32.mrb[5].mxu0 }
 0x105   : > { %v2109_v53 = vpop.f32.mrb[16].mxu1  ;;  %2206 = vmatprep.subr.bf16.mxu0 %v2205_v51  ;;  %641 = vst.msk [vmem:[#allocation4 + $0x18] sm:$0xff] %vm637_vm1, %v2693_v6  ;;  %1008 = vst [vmem:[#allocation3] sm:$0xff] %v999_v1 }
 0x106   : > { %v1144_v46 = vpop.f32.mrb[17].mxu1  ;;  %2208 = vmatpush3.bf16.msra.mxu0 %v2205_v51 }
 0x107   : > { %v2209_v54 = vpack.c.bf16 %v2109_v53, %v1144_v46 }
 0x109   : > { %v2112_v55 = vpop.f32.mrb[18].mxu1  ;;  %2210 = vmatprep.subr.bf16.mxu0 %v2209_v54 }
 0x10a   : > { %v1154_v56 = vpop.f32.mrb[19].mxu1  ;;  %2212 = vmatpush3.bf16.msra.mxu0 %v2209_v54 }
 0x10b   : > { %v2213_v57 = vpack.c.bf16 %v2112_v55, %v1154_v56 }
 0x10d   : > { %v2115_v58 = vpop.f32.mrb[20].mxu1  ;;  %2214 = vmatprep.subr.bf16.mxu0 %v2213_v57 }
 0x10e   : > { %v1164_v59 = vpop.f32.mrb[21].mxu1  ;;  %2216 = vmatpush3.bf16.msra.mxu0 %v2213_v57 }
 0x10f   : > { %v2217_v60 = vpack.c.bf16 %v2115_v58, %v1164_v59 }
 0x111   : > { %v2118_v61 = vpop.f32.mrb[22].mxu1  ;;  %2218 = vmatprep.subr.bf16.mxu0 %v2217_v60 }
 0x112   : > { %v1174_v63 = vpop.f32.mrb[23].mxu1  ;;  %2220 = vmatpush3.bf16.msra.mxu0 %v2217_v60 }
 0x113   : > { %v2221_v3 = vpack.c.bf16 %v2118_v61, %v1174_v63 }
 0x115   : > { %v2121_v8 = vpop.f32.mrb[24].mxu1  ;;  %2222 = vmatprep.subr.bf16.mxu0 %v2221_v3 }
 0x116   : > { %v1184_v11 = vpop.f32.mrb[25].mxu1  ;;  %2224 = vmatpush3.bf16.msra.mxu0 %v2221_v3 }
 0x117   : > { %v2225_v12 = vpack.c.bf16 %v2121_v8, %v1184_v11 }
 0x119   : > { %v2124_v13 = vpop.f32.mrb[26].mxu1  ;;  %2226 = vmatprep.subr.bf16.mxu0 %v2225_v12 }
 0x11a   : > { %v1194_v14 = vpop.f32.mrb[27].mxu1  ;;  %2228 = vmatpush3.bf16.msra.mxu0 %v2225_v12 }
 0x11b   : > { %v2229_v15 = vpack.c.bf16 %v2124_v13, %v1194_v14 }
 0x11d   : > { %2230 = vmatprep.subr.bf16.mxu0 %v2229_v15 }
 0x11e   : > { %2232 = vmatpush3.bf16.msra.mxu0 %v2229_v15 }
 0x121   : > { %2158 = vmatmul.mubr.msk.f32.vlgmr.msra.gmra.mrb[6].mxu0 %vm2597_vm6, %v2294_v10 }
 0x122   : > { %2160 = vmatprep.mubr.msk.f32.mxu0 %vm2628_vm14, %v2294_v10 }
 0x125   : > { %2161 = vmatmul.mubr.msk.f32.gmra.mrb[8].mxu0 %vm2619_vm12, %v2294_v10 }
 0x126   : > { %2163 = vmatprep.mubr.msk.f32.mxu0 %vm2653_vm5, %v2294_v10 }
 0x129   : > { %2164 = vmatmul.mubr.msk.f32.gmra.mrb[10].mxu0 %vm2645_vm3, %v2294_v10 }
 0x12a   : > { %2166 = vmatprep.mubr.msk.f32.mxu0 %vm2674_vm11, %v2294_v10 }
 0x12d   : > { %2167 = vmatmul.mubr.msk.f32.gmra.mrb[12].mxu0 %vm2667_vm10, %v2294_v10 }
 0x184   : > { %v2725_v17 = vpop.xlane.xlu0 %1205 }
 0x185   : > { %v2727_v18 = vpop.xlane.xlu1 %1203 }
 0x189   : > { %v2729_v19 = vpop.xlane.xlu1 %1209  ;;  %v2731_v16 = vpop.xlane.xlu0 %1207 }
 0x18d   : > { %v2733_v20 = vpop.xlane.xlu1 %1213  ;;  %v2735_v22 = vpop.xlane.xlu0 %1211 }
 0x191   : > { %v2737_v24 = vpop.xlane.xlu1 %1217  ;;  %v2739_v23 = vpop.xlane.xlu0 %1215 }
 0x1f4   : > { %v2741_v10 = vpop.f32.mrb[6].mxu0 }
 0x1f5   : > { %v2743_v25 = vpop.f32.mrb[7].mxu0 }
 0x1f8   : > { %v2745_v26 = vpop.f32.mrb[8].mxu0 }
 0x1f9   : > { %v2747_v28 = vpop.f32.mrb[9].mxu0 }
 0x1fc   : > { %v2749_v29 = vpop.f32.mrb[10].mxu0 }
 0x1fd   : > { %v2751_v21 = vpop.f32.mrb[11].mxu0 }
 0x200   : > { %v2753_v30 = vpop.f32.mrb[12].mxu0 }
 0x201   : > { %v2755_v32 = vpop.f32.mrb[13].mxu0 }
 0x202 LB: >> { %v1345_v34 = vlaneseq  ;;  %s2763_s15 = sshll.u32 %s2290_s14, 3  ;;  %v2295_v55 = vmov 1966171168   ;;  %v2782_v63 = vld [vmem:[#allocation3] sm:$0xff]  ;;  %v2787_v12 = vld [vmem:[#allocation3 + $0x8] sm:$0xff]  ;;  %vm1646_vm6 = vcmask 130112   ;;  %s2290_s14 = sphi %s2757_s14, %s1337_s14  }
 0x203   : >> { %s1339_s18 = scalar_lea.vmem [#allocation4], %s2763_s15  ;;  %v1468_v56 = vunpack.c.l.s4 %v2295_v55  ;;  %s1343_s19 = scalar_lea.vmem [#allocation2], %s2763_s15  ;;  %vm1711_vm12 = vcmask 1041409   ;;  %vm1713_vm13 = vcmask 1042434   ;;  %vm1715_vm14 = vcmask 1043459  }
 0x204   : >> { %v2766_v35 = vshrl.u32 %v1345_v34, 7  ;;  %v1340_v38 = vld [vmem:[%s1339_s18] sm:$0xff]  ;;  %vm1717_vm15 = vcmask 1044484   ;;  %vm1719_vm0 = vcmask 1045509   ;;  %vm1721_vm2 = vcmask 1046534   ;;  %s1726_s21 = scalar_lea.vmem [#allocation5], %s2763_s15 }
 0x205   : >> { %v1469_v57 = vunpack.c.0.s8 %v1468_v56  ;;  %v1344_v59 = vld [vmem:[%s1343_s19] sm:$0xff]  ;;  %vm1723_vm3 = vcmask 1047559   ;;  %s1337_s14 = sadd.s32 1, %s2290_s14  }
 0x206   : >> { %v2770_v41 = vsub.s32 0, %v2766_v35  ;;  %v1358_v40 = vsub.s32 1, %v2766_v35  ;;  %v1369_v44 = vsub.s32 2, %v2766_v35  ;;  %v1380_v36 = vsub.s32 3, %v2766_v35  ;;  %p1334_p4 = scmp.ge.s32.totalorder %s1337_s14, 8  }
 0x207   : >> { %v1391_v48 = vsub.s32 4, %v2766_v35  ;;  %v1402_v50 = vsub.s32 5, %v2766_v35  ;;  %v1413_v52 = vsub.s32 6, %v2766_v35  ;;  %v1424_v46 = vsub.s32 7, %v2766_v35 }
 0x208   : >> { %v1348_v42 = vrot.slane %v1340_v38, %v2770_v41  ;;  %v1359_v43 = vrot.slane %v1340_v38, %v1358_v40  ;;  %v1370_v45 = vrot.slane %v1340_v38, %v1369_v44  ;;  %v1381_v47 = vrot.slane %v1340_v38, %v1380_v36 }
 0x209   : >> { %v1392_v49 = vrot.slane %v1340_v38, %v1391_v48  ;;  %v1403_v51 = vrot.slane %v1340_v38, %v1402_v50  ;;  %v1414_v53 = vrot.slane %v1340_v38, %v1413_v52  ;;  %v1425_v54 = vrot.slane %v1340_v38, %v1424_v46 }
 0x20a   : >> { %1350 = vbcast.lane.b32.xlu0 %v1348_v42, 256  ;;  %1361 = vbcast.lane.b32.xlu1 %v1359_v43, 256  ;;  %v1472_v58 = vsub.s32 %v1469_v57, %v2766_v35  ;;  %v1466_v40 = vcombine.high %v1344_v59, %v1344_v59 }
 0x20c   : >> { %v1473_v60 = vrot.slane %v1344_v59, %v1472_v58 }
 0x20e   : >> { %1354 = vbcast.lane.b32.xlu0 %v1348_v42, 264  ;;  %1365 = vbcast.lane.b32.xlu1 %v1359_v43, 264  ;;  %v1481_v61 = vcombine.high %v1473_v60, %v1473_v60  ;;  %v1489_v62 = vrot.slane %v1473_v60, %v1472_v58 }
 0x210   : >> { %v1503_v2 = vrot.slane %v1481_v61, %v1472_v58  ;;  %v1518_v11 = vrot.slane %v1489_v62, %v2770_v41  ;;  %v1511_v38 = vcombine.high %v1489_v62, %v1489_v62 }
 0x212   : >> { %1376 = vbcast.lane.b32.xlu1 %v1370_v45, 264  ;;  %1372 = vbcast.lane.b32.xlu0 %v1370_v45, 256  ;;  %v1522_v15 = vrot.slane %v1503_v2, %v2770_v41  ;;  %v1526_v50 = vrot.slane %v1511_v38, %v2770_v41 }
 0x216   : >> { %1387 = vbcast.lane.b32.xlu1 %v1381_v47, 264  ;;  %1383 = vbcast.lane.b32.xlu0 %v1381_v47, 256 }
 0x21a   : >> { %1398 = vbcast.lane.b32.xlu1 %v1392_v49, 264  ;;  %1394 = vbcast.lane.b32.xlu0 %v1392_v49, 256 }
 0x21e   : >> { %1409 = vbcast.lane.b32.xlu1 %v1403_v51, 264  ;;  %1405 = vbcast.lane.b32.xlu0 %v1403_v51, 256  ;;  %v1480_v51 = vrot.slane %v1466_v40, %v1472_v58 }
 0x220   : >> { %v1496_v61 = vrot.slane %v1480_v51, %v1472_v58  ;;  %v1482_v62 = vcombine.high %v1480_v51, %v1480_v51 }
 0x222   : >> { %1420 = vbcast.lane.b32.xlu1 %v1414_v53, 264  ;;  %1416 = vbcast.lane.b32.xlu0 %v1414_v53, 256 }
 0x226   : >> { %1431 = vbcast.lane.b32.xlu1 %v1425_v54, 264  ;;  %1427 = vbcast.lane.b32.xlu0 %v1425_v54, 256  ;;  %v1513_v54 = vcombine.high %v1503_v2, %v1503_v2 }
 0x27c   : >> { %v1351_v3 = vpop.permute.xlu0 %1350  ;;  %v1362_v5 = vpop.permute.xlu1 %1361 }
 0x27d   : >> { %v1433_v7 = vadd.f32 %v1351_v3, %v2782_v63  ;;  %v1435_v8 = vadd.f32 %v1362_v5, %v2782_v63 }
 0x27f   : >> { %v1449_v13 = vmax.f32 %v1433_v7, 0.0  ;;  %v1451_v14 = vmax.f32 %v1435_v8, 0.0  ;;  %v1530_v8 = vrot.slane %v1513_v54, %v2770_v41 }
 0x280   : >> { %v1355_v27 = vpop.permute.xlu0 %1354  ;;  %v1366_v1 = vpop.permute.xlu1 %1365 }
 0x281   : >> { %v1434_v42 = vadd.f32 %v1355_v27, %v2787_v12  ;;  %v1555_v43 = vmul.f32 %v1518_v11, %v1449_v13  ;;  %v1436_v44 = vadd.f32 %v1366_v1, %v2787_v12  ;;  %v1557_v47 = vmul.f32 %v1522_v15, %v1451_v14 }
 0x283   : >> { %v1450_v45 = vmax.f32 %v1434_v42, 0.0  ;;  %1571 = vadd.xlane.f32.xlu0 %v1555_v43  ;;  %v1452_v36 = vmax.f32 %v1436_v44, 0.0  ;;  %v1510_v42 = vrot.slane %v1482_v62, %v1472_v58 }
 0x284   : >> { %v1377_v48 = vpop.permute.xlu1 %1376  ;;  %v1373_v49 = vpop.permute.xlu0 %1372 }
 0x285   : >> { %v1556_v52 = vmul.f32 %v1518_v11, %v1450_v45  ;;  %v1438_v53 = vadd.f32 %v1377_v48, %v2787_v12  ;;  %v1437_v46 = vadd.f32 %v1373_v49, %v2782_v63  ;;  %v1558_v57 = vmul.f32 %v1522_v15, %v1452_v36 }
 0x286   : >> { %v1534_v15 = vrot.slane %v1496_v61, %v2770_v41  ;;  %v1512_v48 = vcombine.high %v1496_v61, %v1496_v61  ;;  %v1514_v61 = vcombine.high %v1510_v42, %v1510_v42 }
 0x287   : >> { %1575 = vadd.xlane.f32.xlu0 %v1557_v47  ;;  %1573 = vadd.xlane.f32.xlu1 %v1556_v52  ;;  %v1454_v55 = vmax.f32 %v1438_v53, 0.0  ;;  %v1453_v56 = vmax.f32 %v1437_v46, 0.0  ;;  %v1538_v52 = vrot.slane %v1510_v42, %v2770_v41 }
 0x288   : >> { %v1388_v59 = vpop.permute.xlu1 %1387  ;;  %v1384_v60 = vpop.permute.xlu0 %1383 }
 0x289   : >> { %v1440_v3 = vadd.f32 %v1388_v59, %v2787_v12  ;;  %v1439_v5 = vadd.f32 %v1384_v60, %v2782_v63  ;;  %v1559_v7 = vmul.f32 %v1526_v50, %v1453_v56  ;;  %v1560_v2 = vmul.f32 %v1526_v50, %v1454_v55 }
 0x28a   : >> { %v1542_v56 = vrot.slane %v1512_v48, %v2770_v41 }
 0x28b   : >> { %1577 = vadd.xlane.f32.xlu0 %v1558_v57  ;;  %v1456_v11 = vmax.f32 %v1440_v3, 0.0  ;;  %v1455_v13 = vmax.f32 %v1439_v5, 0.0  ;;  %1579 = vadd.xlane.f32.xlu1 %v1559_v7 }
 0x28c   : >> { %v1399_v14 = vpop.permute.xlu1 %1398  ;;  %v1395_v27 = vpop.permute.xlu0 %1394 }
 0x28d   : >> { %v1442_v1 = vadd.f32 %v1399_v14, %v2787_v12  ;;  %v1441_v38 = vadd.f32 %v1395_v27, %v2782_v63  ;;  %v1561_v40 = vmul.f32 %v1530_v8, %v1455_v13  ;;  %v1562_v45 = vmul.f32 %v1530_v8, %v1456_v11 }
 0x28e   : >> { %v1546_v14 = vrot.slane %v1514_v61, %v2770_v41 }
 0x28f   : >> { %1581 = vadd.xlane.f32.xlu0 %v1560_v2  ;;  %v1458_v43 = vmax.f32 %v1442_v1, 0.0  ;;  %v1457_v44 = vmax.f32 %v1441_v38, 0.0  ;;  %1583 = vadd.xlane.f32.xlu1 %v1561_v40 }
 0x290   : >> { %v1410_v36 = vpop.permute.xlu1 %1409  ;;  %v1406_v47 = vpop.permute.xlu0 %1405 }
 0x291   : >> { %v1444_v49 = vadd.f32 %v1410_v36, %v2787_v12  ;;  %v1443_v50 = vadd.f32 %v1406_v47, %v2782_v63  ;;  %v1563_v51 = vmul.f32 %v1534_v15, %v1457_v44  ;;  %v1564_v54 = vmul.f32 %v1534_v15, %v1458_v43 }
 0x292   : >> { %v1636_v47 = vand.u32 127, %v1345_v34 }
 0x293   : >> { %1585 = vadd.xlane.f32.xlu0 %v1562_v45  ;;  %v1460_v53 = vmax.f32 %v1444_v49, 0.0  ;;  %v1459_v46 = vmax.f32 %v1443_v50, 0.0  ;;  %1587 = vadd.xlane.f32.xlu1 %v1563_v51 }
 0x294   : >> { %v1421_v58 = vpop.permute.xlu1 %1420  ;;  %v1417_v55 = vpop.permute.xlu0 %1416  ;;  %v1641_v49 = vadd.s32 4294967288, %v1636_v47 }
 0x295   : >> { %v1446_v57 = vadd.f32 %v1421_v58, %v2787_v12  ;;  %v1445_v59 = vadd.f32 %v1417_v55, %v2782_v63  ;;  %v1565_v60 = vmul.f32 %v1538_v52, %v1459_v46  ;;  %v1566_v5 = vmul.f32 %v1538_v52, %v1460_v53 }
 0x296   : >> { %v1644_v52 = vsub.s32 %v1641_v49, %v2766_v35  ;;  %v1639_v53 = vsub.s32 %v1636_v47, %v2766_v35 }
 0x297   : >> { %1589 = vadd.xlane.f32.xlu0 %v1564_v54  ;;  %v1462_v62 = vmax.f32 %v1446_v57, 0.0  ;;  %v1461_v3 = vmax.f32 %v1445_v59, 0.0  ;;  %1591 = vadd.xlane.f32.xlu1 %v1565_v60 }
 0x298   : >> { %v1432_v7 = vpop.permute.xlu1 %1431  ;;  %v1428_v8 = vpop.permute.xlu0 %1427 }
 0x299   : >> { %v1448_v11 = vadd.f32 %v1432_v7, %v2787_v12  ;;  %v1447_v13 = vadd.f32 %v1428_v8, %v2782_v63  ;;  %v1567_v2 = vmul.f32 %v1542_v56, %v1461_v3  ;;  %v1568_v1 = vmul.f32 %v1542_v56, %v1462_v62 }
 0x29b   : >> { %1593 = vadd.xlane.f32.xlu0 %v1566_v5  ;;  %v1464_v27 = vmax.f32 %v1448_v11, 0.0  ;;  %v1463_v15 = vmax.f32 %v1447_v13, 0.0  ;;  %1595 = vadd.xlane.f32.xlu1 %v1567_v2 }
 0x29d   : >> { %v1569_v38 = vmul.f32 %v1546_v14, %v1463_v15  ;;  %v1570_v40 = vmul.f32 %v1546_v14, %v1464_v27 }
 0x29f   : >> { %1597 = vadd.xlane.f32.xlu0 %v1568_v1  ;;  %1599 = vadd.xlane.f32.xlu1 %v1569_v38 }
 0x2a3   : >> { %1601 = vadd.xlane.f32.xlu0 %v1570_v40 }
 0x310   : >> { %v1572_v42 = vpop.xlane.xlu0 %1571 }
 0x311   : >> { %v1640_v3 = vrot.slane %v1572_v42, %v1639_v53 }
 0x314   : >> { %v1574_v43 = vpop.xlane.xlu1 %1573  ;;  %v1576_v44 = vpop.xlane.xlu0 %1575 }
 0x315   : >> { %v1645_v57 = vrot.slane %v1574_v43, %v1644_v52  ;;  %v1651_v59 = vrot.slane %v1576_v44, %v1639_v53 }
 0x317   : >> { %v1647_v14 = vsel %vm1646_vm6, %v1645_v57, %v1640_v3 }
 0x318   : >> { %v1578_v45 = vpop.xlane.xlu0 %1577  ;;  %v1580_v12 = vpop.xlane.xlu1 %1579 }
 0x319   : >> { %v1655_v46 = vrot.slane %v1578_v45, %v1644_v52  ;;  %v1660_v54 = vrot.slane %v1580_v12, %v1639_v53 }
 0x31b   : >> { %v1656_v5 = vsel %vm1646_vm6, %v1655_v46, %v1651_v59  ;;  %v1745_v46 = vmul.f32 (%p1334_p4), %v2725_v17, %v2685_v0  ;;  %v1747_v0 = vmul.f32 (%p1334_p4), %v2729_v19, %v2693_v6  ;;  %v1733_v6 = vmax.f32 (%p1334_p4), %v2733_v20, 1.0 }
 0x31c   : >> { %v1582_v36 = vpop.xlane.xlu0 %1581  ;;  %v1584_v63 = vpop.xlane.xlu1 %1583  ;;  %v1712_v1 = vsel %vm1711_vm12, %v1656_v5, %v1647_v14 }
 0x31d   : >> { %v1664_v58 = vrot.slane %v1582_v36, %v1644_v52  ;;  %v1669_v60 = vrot.slane %v1584_v63, %v1639_v53  ;;  %v1753_v59 = vadd.f32 (%p1334_p4), %v2741_v10, %v1745_v46 }
 0x31f   : >> { %v1665_v35 = vsel %vm1646_vm6, %v1664_v58, %v1660_v54  ;;  %v1730_v58 = vmax.f32 (%p1334_p4), %v2731_v16, 1.0 }
 0x320   : >> { %v1586_v41 = vpop.xlane.xlu0 %1585  ;;  %v1588_v48 = vpop.xlane.xlu1 %1587  ;;  %v1714_v40 = vsel %vm1713_vm13, %v1665_v35, %v1712_v1  ;;  %v1749_v35 = vmul.f32 (%p1334_p4), %v2733_v20, %v2560_v31  ;;  %v1751_v31 = vmul.f32 (%p1334_p4), %v2737_v24, %v2575_v37 }
 0x321   : >> { %v1673_v61 = vrot.slane %v1586_v41, %v1644_v52  ;;  %v1678_v34 = vrot.slane %v1588_v48, %v1639_v53 }
 0x322   : > { %v1757_v14 = vadd.f32 (%p1334_p4), %v2749_v29, %v1749_v35 }
 0x323   : >> { %v1674_v27 = vsel %vm1646_vm6, %v1673_v61, %v1669_v60  ;;  %v1731_v60 = vmax.f32 (%p1334_p4), %v2729_v19, 1.0 }
 0x324   : >> { %v1590_v50 = vpop.xlane.xlu0 %1589  ;;  %v1592_v51 = vpop.xlane.xlu1 %1591  ;;  %v1716_v44 = vsel %vm1715_vm14, %v1674_v27, %v1714_v40  ;;  %v1765_v40 = vmul.f32 (%p1334_p4), 0.01, %v1757_v14 }
 0x325   : >> { %v1682_v62 = vrot.slane %v1590_v50, %v1644_v52  ;;  %v1687_v7 = vrot.slane %v1592_v51, %v1639_v53  ;;  %v1728_v50 = vmax.f32 (%p1334_p4), %v2727_v18, 1.0  ;;  %v1744_v51 = vmul.f32 (%p1334_p4), %v2727_v18, %v2688_v4 }
 0x327   : >> { %v1683_v38 = vsel %vm1646_vm6, %v1682_v62, %v1678_v34  ;;  %2260 = vrcp.f32 (%p1334_p4), %v1728_v50 }
 0x328   : >> { %v1594_v55 = vpop.xlane.xlu0 %1593  ;;  %v1596_v56 = vpop.xlane.xlu1 %1595  ;;  %v1718_v36 = vsel %vm1717_vm15, %v1683_v38, %v1716_v44 }
 0x329   : >> { %v1691_v8 = vrot.slane %v1594_v55, %v1644_v52  ;;  %v1696_v11 = vrot.slane %v1596_v56, %v1639_v53  ;;  %v1746_v55 = vmul.f32 (%p1334_p4), %v2731_v16, %v2698_v9  ;;  %v1752_v56 = vadd.f32 (%p1334_p4), %v1744_v51, %v2743_v25 }
 0x32a   : > { %v1761_v9 = vmul.f32 (%p1334_p4), 0.01, %v1753_v59  ;;  %v1755_v16 = vadd.f32 (%p1334_p4), %v2745_v26, %v1747_v0  ;;  %v1732_v25 = vmax.f32 (%p1334_p4), %v2735_v22, 1.0  ;;  %v1734_v26 = vmax.f32 (%p1334_p4), %v2739_v23, 1.0 }
 0x32b   : >> { %v1692_v42 = vsel %vm1646_vm6, %v1691_v8, %v1687_v7  ;;  %v1754_v4 = vadd.f32 (%p1334_p4), %v1746_v55, %v2747_v28  ;;  %v1760_v61 = vmul.f32 (%p1334_p4), 0.01, %v1752_v56  ;;  %v1748_v28 = vmul.f32 (%p1334_p4), %v2735_v22, %v2563_v33 }
 0x32c   : >> { %v1598_v13 = vpop.xlane.xlu0 %1597  ;;  %v1600_v2 = vpop.xlane.xlu1 %1599  ;;  %v1720_v47 = vsel %vm1719_vm0, %v1692_v42, %v1718_v36  ;;  %v1763_v19 = vmul.f32 (%p1334_p4), 0.01, %v1755_v16  ;;  %v1750_v33 = vmul.f32 (%p1334_p4), %v2739_v23, %v2578_v39 }
 0x32d   : >> { %v1700_v15 = vrot.slane %v1598_v13, %v1644_v52  ;;  %v1705_v43 = vrot.slane %v1600_v2, %v1639_v53  ;;  %v1729_v53 = vmax.f32 (%p1334_p4), %v2725_v17, 1.0  ;;  %v1762_v7 = vmul.f32 (%p1334_p4), 0.01, %v1754_v4 }
 0x32e   : > { %v1756_v8 = vadd.f32 (%p1334_p4), %v1748_v28, %v2751_v21  ;;  %v1758_v1 = vadd.f32 (%p1334_p4), %v1750_v33, %v2755_v32 }
 0x32f   : >> { %v1701_v45 = vsel %vm1646_vm6, %v1700_v15, %v1696_v11  ;;  %1336 = sbr.rel (!%p1334_p4) target bundleno = 514 (0x202), region = 110  ;;  %2262 = vrcp.f32 (%p1334_p4), %v1729_v53  ;;  %v1735_v15 = vmax.f32 (%p1334_p4), %v2737_v24, 1.0 }
 0x330   : >> { %v1602_v12 = vpop.xlane.xlu0 %1601  ;;  %v1722_v41 = vsel %vm1721_vm2, %v1701_v45, %v1720_v47  ;;  %2264 = vrcp.f32 (%p1334_p4), %v1730_v58  ;;  %v1764_v22 = vmul.f32 (%p1334_p4), 0.01, %v1756_v8  ;;  %v1759_v45 = vadd.f32 (%p1334_p4), %v2753_v30, %v1751_v31 }
 0x331   : >> { %v1709_v63 = vrot.slane %v1602_v12, %v1644_v52  ;;  %2266 = vrcp.f32 (%p1334_p4), %v1731_v60  ;;  %v2261_v20 = vpop.eup (%p1334_p4), %2260 }
 0x332   : > { %2268 = vrcp.f32 (%p1334_p4), %v1732_v25 }
 0x333   : >> { %v1710_v48 = vsel %vm1646_vm6, %v1709_v63, %v1705_v43  ;;  %2270 = vrcp.f32 (%p1334_p4), %v1733_v6  ;;  %v1766_v43 = vmul.f32 (%p1334_p4), 0.01, %v1758_v1  ;;  %v1767_v63 = vmul.f32 (%p1334_p4), 0.01, %v1759_v45 }
 0x334   : >> { %v1724_v49 = vsel %vm1723_vm3, %v1710_v48, %v1722_v41  ;;  %2272 = vrcp.f32 (%p1334_p4), %v1734_v26 }
 0x335   : >> { %1727 = vst.msk [vmem:[%s1726_s21] sm:$0xff] %vm637_vm1, %v1724_v49  ;;  %2274 = vrcp.f32 (%p1334_p4), %v1735_v15 }
 0x339   : > { %v2263_v23 = vpop.eup %2262 }
 0x33a   : > { %v2265_v32 = vpop.eup %2264 }
 0x33b   : > { %v2267_v37 = vpop.eup %2266 }
 0x33c   : > { %v1768_v52 = vld [vmem:[#allocation5] sm:$0xff]  ;;  %v1769_v54 = vld [vmem:[#allocation5 + $0x8] sm:$0xff]  ;;  %v1770_v18 = vld [vmem:[#allocation5 + $0x10] sm:$0xff]  ;;  %v2269_v49 = vpop.eup %2268 }
 0x33d   : > { %v1776_v57 = vmul.f32 0.99, %v1768_v52  ;;  %v1771_v17 = vld [vmem:[#allocation5 + $0x18] sm:$0xff]  ;;  %v1777_v34 = vmul.f32 0.99, %v1769_v54  ;;  %v1772_v3 = vld [vmem:[#allocation5 + $0x20] sm:$0xff]  ;;  %v2271_v51 = vpop.eup %2270 }
 0x33e   : > { %v1778_v10 = vmul.f32 0.99, %v1770_v18  ;;  %v1779_v62 = vmul.f32 0.99, %v1771_v17  ;;  %v1780_v13 = vmul.f32 0.99, %v1772_v3  ;;  %v2273_v53 = vpop.eup %2272 }
 0x33f   : > { %v1784_v5 = vadd.f32 %v1776_v57, %v1760_v61  ;;  %v1785_v11 = vadd.f32 %v1777_v34, %v1761_v9  ;;  %v1773_v2 = vld [vmem:[#allocation5 + $0x28] sm:$0xff]  ;;  %v1774_v27 = vld [vmem:[#allocation5 + $0x30] sm:$0xff]  ;;  %v1775_v39 = vld [vmem:[#allocation5 + $0x38] sm:$0xff]  ;;  %v2275_v58 = vpop.eup %2274 }
 0x340   : > { %v1786_v21 = vadd.f32 %v1778_v10, %v1762_v7  ;;  %v1787_v38 = vadd.f32 %v1779_v62, %v1763_v19  ;;  %v1781_v42 = vmul.f32 0.99, %v1773_v2  ;;  %v1782_v44 = vmul.f32 0.99, %v1774_v27 }
 0x341   : > { %v1792_v29 = vmul.f32 %v2261_v20, %v1784_v5  ;;  %v1793_v12 = vmul.f32 %v2263_v23, %v1785_v11  ;;  %v1788_v36 = vadd.f32 %v1780_v13, %v1764_v22  ;;  %v1783_v47 = vmul.f32 0.99, %v1775_v39 }
 0x342   : > { %v1794_v24 = vmul.f32 %v2265_v32, %v1786_v21  ;;  %v1795_v41 = vmul.f32 %v2267_v37, %v1787_v38  ;;  %v1789_v48 = vadd.f32 %v1781_v42, %v1765_v40  ;;  %v1790_v30 = vadd.f32 %v1782_v44, %v1766_v43 }
 0x343   : > { %1800 = vst.msk [vmem:[%s2392_s20] sm:$0xff] %vm637_vm1, %v1792_v29  ;;  %1801 = vst.msk [vmem:[%s2392_s20 + $0x8] sm:$0xff] %vm637_vm1, %v1793_v12  ;;  %v1796_v50 = vmul.f32 %v2269_v49, %v1788_v36  ;;  %v1791_v52 = vadd.f32 %v1783_v47, %v1767_v63 }
 0x344   : > { %1802 = vst.msk [vmem:[%s2392_s20 + $0x10] sm:$0xff] %vm637_vm1, %v1794_v24  ;;  %1803 = vst.msk [vmem:[%s2392_s20 + $0x18] sm:$0xff] %vm637_vm1, %v1795_v41  ;;  %v1797_v46 = vmul.f32 %v2271_v51, %v1789_v48  ;;  %v1798_v54 = vmul.f32 %v2273_v53, %v1790_v30 }
 0x345   : > { %1804 = vst.msk [vmem:[%s2392_s20 + $0x20] sm:$0xff] %vm637_vm1, %v1796_v50  ;;  %v1799_v55 = vmul.f32 %v2275_v58, %v1791_v52 }
 0x346   : > { %1805 = vst.msk [vmem:[%s2392_s20 + $0x28] sm:$0xff] %vm637_vm1, %v1797_v46  ;;  %1806 = vst.msk [vmem:[%s2392_s20 + $0x30] sm:$0xff] %vm637_vm1, %v1798_v54 }
 0x347   : > { %1807 = vst.msk [vmem:[%s2392_s20 + $0x38] sm:$0xff] %vm637_vm1, %v1799_v55 }
 0x348 PF: > { %s21_s17 = sadd.s32 1, %s2286_s17  }
 0x349   : > { %p18_p5 = scmp.ge.s32.totalorder %s21_s17, 4  }
 0x34b   :  { %20 = sbr.rel (!%p18_p5) target bundleno = 1 (0x1), region = 121 }

// kernel: net_forward.9
= control target key start
LH: loop header
LB: loop body
LE: loop exit
PB: predicated region body
PF: predicated region fallthrough
CT: control target
= control target key end

     0   :  { %s3698_s20 = smov 0   ;;  %s4425_s0 = inlined_call_operand.vmem [shape: f32[128,16], index: 0, kind: input, shape index: {}]   ;;  %s4426_s1 = inlined_call_operand.vmem [shape: s32[128,1], index: 1, kind: input, shape index: {}]   ;;  %s4427_s2 = inlined_call_operand.vmem [shape: f32[128,1], index: 2, kind: input, shape index: {}]   ;;  %s4428_s3 = inlined_call_operand.vmem [shape: f32[1,128,16], index: 3, kind: input, shape index: {}]   ;;  %s4429_s4 = inlined_call_operand.vmem [shape: f32[1,16,128], index: 4, kind: input, shape index: {}]   ;;  %s4430_s5 = inlined_call_operand.vmem [shape: f32[1,1,128], index: 5, kind: input, shape index: {}]   ;;  %s4431_s6 = inlined_call_operand.vmem [shape: s32[1,1,128], index: 6, kind: input, shape index: {}]   ;;  %s4432_s7 = inlined_call_operand.vmem [shape: f32[16,32], index: 7, kind: input, shape index: {}]   ;;  %s4433_s8 = inlined_call_operand.vmem [shape: f32[16,32], index: 8, kind: input, shape index: {}]   ;;  %s4434_s9 = inlined_call_operand.vmem [shape: f32[32,16], index: 9, kind: input, shape index: {}]   ;;  %s4435_s10 = inlined_call_operand.vmem [shape: f32[1,32], index: 10, kind: input, shape index: {}]   ;;  %s4436_s11 = inlined_call_operand.vmem [shape: f32[32,64], index: 11, kind: input, shape index: {}]   ;;  %s4437_s12 = inlined_call_operand.vmem [shape: f32[1,64], index: 12, kind: input, shape index: {}]   ;;  %s4438_s13 = inlined_call_operand.vmem [shape: f32[64,32], index: 13, kind: input, shape index: {}]   ;;  %s4439_s14 = inlined_call_operand.vmem [shape: f32[1,32], index: 14, kind: input, shape index: {}]   ;;  %s4440_s15 = inlined_call_operand.vmem [shape: f32[32,4], index: 15, kind: input, shape index: {}]   ;;  %s4441_s16 = inlined_call_operand.vmem [shape: f32[1,4], index: 16, kind: input, shape index: {}]   ;;  %s4442_s17 = inlined_call_operand.vmem [shape: f32[4,1], index: 17, kind: input, shape index: {}]   ;;  %s4443_s18 = inlined_call_operand.<no memory space> [shape: f32[1,1], index: 18, kind: input, shape index: {}]   ;;  %s4444_s19 = inlined_call_operand.vmem [shape: f32[128,1], index: 19, kind: output, shape index: {}]  }
   0x1   :  { %4446 = sst [smem:[#allocation7_spill]] %s4425_s0  ;;  %v24_v0 = vstv %s4443_s18 }
   0x2   :  { %4447 = sst [smem:[#allocation8_spill]] %s4426_s1  ;;  %25 = vst [vmem:[#allocation6] sm:$0x1] %v24_v0 }
   0x3   :  { %4448 = sst [smem:[#allocation9_spill]] %s4427_s2 }
   0x4   :  { %4449 = sst [smem:[#allocation10_spill]] %s4428_s3 }
   0x5 LB: > { %s3033_s21 = sadd.s32 4294967295, %s3585_s20   ;;  %p3037_p0 = scmp.ge.s32.totalorder %s3585_s20, 1  ;;  %s3585_s20 = sphi %s3698_s20, %s31_s20  }
   0x6   : > { %p562_p1 = scmp.lt.s32.totalorder %s3585_s20, 3 }
   0x8   : > { %p563_p2 = pnand %p3037_p0, %p562_p1 }
   0x9   : > { %v715_v1 = vld [vmem:[%s4432_s7] sm:$0xff] (!%p563_p2)  ;;  %v716_v2 = vld [vmem:[%s4432_s7 + $0x8] sm:$0xff] (!%p563_p2)  ;;  %s3038_s23 = sshll.u32 (!%p563_p2), %s3033_s21, 3  ;;  %v3591_v6 = vmov (!%p563_p2), 0   ;;  %vm690_vm0 = vcmask (!%p563_p2), 130048   ;;  %s4450_s22 = sld [smem:[#allocation7_spill]] (!%p563_p2) }
   0xa   : > { %566 = sbr.rel (%p563_p2) target bundleno = 1757 (0x6dd), region = 96  ;;  %v862_v3 = vld [vmem:[%s4429_s4] sm:$0xff] (!%p563_p2)  ;;  %v3454_v4 = vpack.c.bf16 (!%p563_p2), %v716_v2, %v715_v1  ;;  %p629_p3 = scmp.lt.s32.totalorder (!%p563_p2), %s3038_s23, 15  ;;  %v863_v5 = vld [vmem:[%s4429_s4 + $0x8] sm:$0xff] (!%p563_p2)  ;;  %3557 = vset.pattern.permute.xlu1 (!%p563_p2), %v3591_v6  ;;  %3556 = vset.pattern.permute.xlu0 (!%p563_p2), %v3591_v6  ;;  %v681_v6 = vld [vmem:[%s4434_s9 + $0x18] sm:$0xff] (!%p563_p2)  ;;  %vm853_vm1 = vcmask (!%p563_p2), 261120  }
   0xb   : > { %v3458_v7 = vpack.c.bf16 (!%p563_p2), %v863_v5, %v862_v3  ;;  %v676_v8 = vld [vmem:[%s4433_s8] sm:$0xff] (!%p563_p2)  ;;  %v677_v9 = vld [vmem:[%s4433_s8 + $0x8] sm:$0xff] (!%p563_p2)  ;;  %s4451_s26 = sld [smem:[#allocation10_spill]] (!%p563_p2)  ;;  %v680_v5 = vld [vmem:[%s4434_s9 + $0x10] sm:$0xff] (!%p563_p2)  ;;  %s4083_s21 = smov (!%p563_p2), 0  }
   0xc   : > { %3534 = vmatprep.subr.bf16.mxu1 (!%p563_p2), %v3454_v4  ;;  %3455 = vmatprep.subr.bf16.mxu0 (!%p563_p2), %v3454_v4  ;;  %v3466_v13 = vpack.c.bf16 (!%p563_p2), %v677_v9, %v676_v8  ;;  %v678_v3 = vld [vmem:[%s4434_s9] sm:$0xff] (!%p563_p2) }
   0xd   : > { %3535 = vmatpush3.bf16.msra.mxu1 (!%p563_p2), %v3454_v4  ;;  %3457 = vmatpush3.bf16.msra.mxu0 (!%p563_p2), %v3454_v4  ;;  %v679_v4 = vld [vmem:[%s4434_s9 + $0x8] sm:$0xff] (!%p563_p2) }
   0xe   : > { %3459 = vmatprep.subr.bf16.mxu1 (!%p563_p2), %v3458_v7  ;;  %3463 = vmatprep.subr.bf16.mxu0 (!%p563_p2), %v3458_v7 }
  0x11   : > { %s4469_s23 = smov (!%p629_p3, %s3038_s23), 15  ;;  %v864_v35 = vld [vmem:[%s4451_s26] sm:$0xff]  ;;  %v865_v36 = vld [vmem:[%s4451_s26 + $0x8] sm:$0xff]  ;;  %v866_v37 = vld [vmem:[%s4451_s26 + $0x10] sm:$0xff] }
  0x12   : > { %s3724_s30 = sshll.u32 %s4469_s23, 3  ;;  %v867_v38 = vld [vmem:[%s4451_s26 + $0x18] sm:$0xff]  ;;  %v868_v39 = vld [vmem:[%s4451_s26 + $0x20] sm:$0xff]  ;;  %s4452_s23 = sld [smem:[#allocation9_spill]]  ;;  %v869_v40 = vld [vmem:[%s4451_s26 + $0x28] sm:$0xff] }
  0x13   : > { %s632_s18 = scalar_lea.vmem %s4450_s22, %s3724_s30  ;;  %s3734_s25 = scalar_lea.vmem %s4444_s19, %s3724_s30  ;;  %v870_v41 = vld [vmem:[%s4451_s26 + $0x30] sm:$0xff]  ;;  %v871_v43 = vld [vmem:[%s4451_s26 + $0x38] sm:$0xff]  ;;  %v872_v44 = vld [vmem:[%s4451_s26 + $0x40] sm:$0xff] }
  0x14   : > { %v656_v10 = vld [vmem:[%s632_s18 + $0x20] sm:$0xff]  ;;  %v657_v11 = vld [vmem:[%s632_s18 + $0x28] sm:$0xff]  ;;  %v658_v12 = vld [vmem:[%s632_s18 + $0x30] sm:$0xff]  ;;  %s4453_s22 = sld [smem:[#allocation8_spill]] }
  0x15   : > { %3268 = vmatprep.mubr.msk.f32.mxu1 %vm690_vm0, %v656_v10  ;;  %v652_v14 = vld [vmem:[%s632_s18] sm:$0xff]  ;;  %v653_v15 = vld [vmem:[%s632_s18 + $0x8] sm:$0xff]  ;;  %v654_v16 = vld [vmem:[%s632_s18 + $0x10] sm:$0xff]  ;;  %v686_v26 = vmul.f32 %v656_v10, %v656_v10  ;;  %v687_v28 = vmul.f32 %v657_v11, %v657_v11  ;;  %v688_v30 = vmul.f32 %v658_v12, %v658_v12 }
  0x16   : > { %3269 = vmatmul.mubr.msk.f32.vlgmr.msra.gmra.mrb[0].mxu1 %vm690_vm0, %v657_v11  ;;  %v655_v17 = vld [vmem:[%s632_s18 + $0x18] sm:$0xff]  ;;  %v682_v18 = vmul.f32 %v652_v14, %v652_v14  ;;  %v683_v19 = vmul.f32 %v653_v15, %v653_v15  ;;  %3262 = vmatprep.mubr.msk.f32.mxu0 %vm690_vm0, %v652_v14  ;;  %v684_v21 = vmul.f32 %v654_v16, %v654_v16  ;;  %v873_v47 = vld [vmem:[%s4451_s26 + $0x48] sm:$0xff]  ;;  %v874_v48 = vld [vmem:[%s4451_s26 + $0x50] sm:$0xff] }
  0x17   : > { %3461 = vmatpush3.bf16.msra.mxu1 %v3458_v7  ;;  %3271 = vmatprep.mubr.msk.f32.mxu1 %vm690_vm0, %v658_v12  ;;  %v659_v20 = vld [vmem:[%s632_s18 + $0x38] sm:$0xff]  ;;  %v685_v22 = vmul.f32 %v655_v17, %v655_v17  ;;  %v703_v29 = vsel %vm690_vm0, %v686_v26, 0.0  ;;  %v706_v31 = vsel %vm690_vm0, %v687_v28, 0.0  ;;  %v709_v33 = vsel %vm690_vm0, %v688_v30, 0.0  ;;  %v876_v52 = vld [vmem:[%s4451_s26 + $0x60] sm:$0xff]  ;;  %v877_v55 = vld [vmem:[%s4451_s26 + $0x68] sm:$0xff] }
  0x18   : > { %3467 = vmatprep.subr.bf16.mxu1 %v3466_v13  ;;  %v691_v23 = vsel %vm690_vm0, %v682_v18, 0.0  ;;  %3263 = vmatmul.mubr.msk.f32.vlgmr.msra.gmra.mrb[0].mxu0 %vm690_vm0, %v653_v15  ;;  %v697_v24 = vsel %vm690_vm0, %v684_v21, 0.0  ;;  %v694_v25 = vsel %vm690_vm0, %v683_v19, 0.0  ;;  %v689_v32 = vmul.f32 %v659_v20, %v659_v20  ;;  %s3782_s3 = scalar_lea.vmem %s4452_s23, %s3724_s30  ;;  %v875_v51 = vld [vmem:[%s4451_s26 + $0x58] sm:$0xff]  ;;  %v878_v56 = vld [vmem:[%s4451_s26 + $0x70] sm:$0xff] }
  0x19   : > { %692 = vadd.xlane.f32.xlu0 %v691_v23  ;;  %3265 = vmatprep.mubr.msk.f32.mxu0 %vm690_vm0, %v654_v16  ;;  %v700_v27 = vsel %vm690_vm0, %v685_v22, 0.0  ;;  %v668_v42 = vld [vmem:[%s3782_s3] sm:$0xff]  ;;  %v669_v49 = vld [vmem:[%s3782_s3 + $0x8] sm:$0xff]  ;;  %v670_v57 = vld [vmem:[%s3782_s3 + $0x10] sm:$0xff] }
  0x1a   : > { %3272 = vmatmul.mubr.msk.f32.gmra.mrb[2].mxu1 %vm690_vm0, %v659_v20  ;;  %698 = vadd.xlane.f32.xlu1 %v697_v24  ;;  %v712_v34 = vsel %vm690_vm0, %v689_v32, 0.0  ;;  %s3797_s18 = scalar_lea.vmem %s4453_s22, %s3724_s30  ;;  %v672_v50 = vld [vmem:[%s3782_s3 + $0x20] sm:$0xff]  ;;  %v673_v54 = vld [vmem:[%s3782_s3 + $0x28] sm:$0xff]  ;;  %v674_v58 = vld [vmem:[%s3782_s3 + $0x30] sm:$0xff] }
  0x1b   : > { %3278 = vmatprep.mubr.msk.f32.mxu1 %vm690_vm0, %v652_v14  ;;  %3465 = vmatpush3.bf16.msra.mxu0 %v3458_v7  ;;  %v661_v45 = vld [vmem:[%s3797_s18 + $0x8] sm:$0xff]  ;;  %v660_v46 = vld [vmem:[%s3797_s18] sm:$0xff]  ;;  %v662_v53 = vld [vmem:[%s3797_s18 + $0x10] sm:$0xff] }
  0x1c   : > { %3266 = vmatmul.mubr.msk.f32.gmra.mrb[2].mxu0 %vm690_vm0, %v655_v17  ;;  %v879_v59 = vld [vmem:[%s4451_s26 + $0x78] sm:$0xff]  ;;  %v664_v63 = vld [vmem:[%s3797_s18 + $0x20] sm:$0xff]  ;;  %v665_v0 = vld [vmem:[%s3797_s18 + $0x28] sm:$0xff] }
  0x1d   : > { %695 = vadd.xlane.f32.xlu0 %v694_v25  ;;  %v663_v60 = vld [vmem:[%s3797_s18 + $0x18] sm:$0xff]  ;;  %v666_v1 = vld [vmem:[%s3797_s18 + $0x30] sm:$0xff]  ;;  %3294 = vmatprep.mubr.msk.f32.mxu0 %vm690_vm0, %v678_v3  ;;  %v3881_v21 = vld [vmem:[%s4435_s10] ss:$0 sm:$0xff] }
  0x1e   : > { %3279 = vmatmul.mubr.msk.f32.vlgmr.msra.gmra.mrb[4].mxu1 %vm690_vm0, %v653_v15  ;;  %701 = vadd.xlane.f32.xlu1 %v700_v27  ;;  %v675_v61 = vld [vmem:[%s3782_s3 + $0x38] sm:$0xff]  ;;  %v3063_v28 = vld [vmem:[%s4430_s5] ss:$0 sm:$0xff] }
  0x1f   : > { %3469 = vmatpush3.bf16.msra.mxu1 %v3466_v13  ;;  %3281 = vmatprep.mubr.msk.f32.mxu1 %vm690_vm0, %v654_v16  ;;  %v671_v62 = vld [vmem:[%s3782_s3 + $0x18] sm:$0xff] }
  0x20   : > { %v667_v2 = vld [vmem:[%s3797_s18 + $0x38] sm:$0xff]  ;;  %3295 = vmatmul.mubr.msk.f32.vlgmr.msra.gmra.mrb[4].mxu0 %vm690_vm0, %v679_v4  ;;  %v3593_v4 = vmov 1.0  }
  0x21   : > { %704 = vadd.xlane.f32.xlu0 %v703_v29  ;;  %3297 = vmatprep.mubr.msk.f32.mxu0 %vm690_vm0, %v680_v5 }
  0x22   : > { %3282 = vmatmul.mubr.msk.f32.gmra.mrb[6].mxu1 %vm690_vm0, %v655_v17  ;;  %707 = vadd.xlane.f32.xlu1 %v706_v31 }
  0x23   : > { %3284 = vmatprep.mubr.msk.f32.mxu1 %vm690_vm0, %v656_v10 }
  0x24   : > { %3298 = vmatmul.mubr.msk.f32.gmra.mrb[6].mxu0 %vm690_vm0, %v681_v6 }
  0x25   : > { %710 = vadd.xlane.f32.xlu0 %v709_v33 }
  0x26   : > { %3285 = vmatmul.mubr.msk.f32.gmra.mrb[8].mxu1 %vm690_vm0, %v657_v11  ;;  %713 = vadd.xlane.f32.xlu1 %v712_v34 }
  0x27   : > { %3287 = vmatprep.mubr.msk.f32.mxu1 %vm690_vm0, %v658_v12 }
  0x2a   : > { %3288 = vmatmul.mubr.msk.f32.gmra.mrb[10].mxu1 %vm690_vm0, %v659_v20 }
  0x2b   : > { %3304 = vmatprep.mubr.msk.f32.mxu1 %vm690_vm0, %v864_v35 }
  0x2e   : > { %3305 = vmatmul.mubr.msk.f32.vlgmr.msra.gmra.mrb[12].mxu1 %vm690_vm0, %v865_v36 }
  0x2f   : > { %3307 = vmatprep.mubr.msk.f32.mxu1 %vm690_vm0, %v866_v37 }
  0x32   : > { %3308 = vmatmul.mubr.msk.f32.gmra.mrb[14].mxu1 %vm690_vm0, %v867_v38 }
  0x33   : > { %3310 = vmatprep.mubr.msk.f32.mxu1 %vm690_vm0, %v868_v39 }
  0x36   : > { %3311 = vmatmul.mubr.msk.f32.gmra.mrb[16].mxu1 %vm690_vm0, %v869_v40  ;;  %v3915_v40 = vld [vmem:[%s4431_s6] ss:$0 sm:$0xff] }
  0x37   : > { %3313 = vmatprep.mubr.msk.f32.mxu1 %vm690_vm0, %v870_v41  ;;  %1063 = vperm.xlu1 %3557, %v668_v42  }
  0x3a   : > { %3314 = vmatmul.mubr.msk.f32.gmra.mrb[18].mxu1 %vm690_vm0, %v871_v43 }
  0x3b   : > { %3316 = vmatprep.mubr.msk.f32.mxu1 %vm690_vm0, %v872_v44  ;;  %1029 = vperm.xlu1 %3557, %v661_v45  }
  0x3c   : > { %1026 = vperm.xlu0 %3556, %v660_v46  }
  0x3e   : > { %3317 = vmatmul.mubr.msk.f32.gmra.mrb[20].mxu1 %vm690_vm0, %v873_v47 }
  0x3f   : > { %3319 = vmatprep.mubr.msk.f32.mxu1 %vm690_vm0, %v874_v48  ;;  %1068 = vperm.xlu1 %3557, %v669_v49  }
  0x40   : > { %1083 = vperm.xlu0 %3556, %v672_v50  }
  0x42   : > { %3320 = vmatmul.mubr.msk.f32.gmra.mrb[22].mxu1 %vm690_vm0, %v875_v51 }
  0x43   : > { %3322 = vmatprep.mubr.msk.f32.mxu1 %vm690_vm0, %v876_v52  ;;  %1032 = vperm.xlu1 %3557, %v662_v53  }
  0x44   : > { %1088 = vperm.xlu0 %3556, %v673_v54  }
  0x46   : > { %3323 = vmatmul.mubr.msk.f32.gmra.mrb[24].mxu1 %vm690_vm0, %v877_v55 }
  0x47   : > { %3325 = vmatprep.mubr.msk.f32.mxu1 %vm690_vm0, %v878_v56  ;;  %1073 = vperm.xlu1 %3557, %v670_v57  }
  0x48   : > { %1093 = vperm.xlu0 %3556, %v674_v58  }
  0x4a   : > { %3326 = vmatmul.mubr.msk.f32.gmra.mrb[26].mxu1 %vm690_vm0, %v879_v59 }
  0x4b   : > { %1035 = vperm.xlu1 %3557, %v663_v60  }
  0x4c   : > { %1098 = vperm.xlu0 %3556, %v675_v61  }
  0x4f   : > { %1078 = vperm.xlu1 %3557, %v671_v62  }
  0x53   : > { %1038 = vperm.xlu1 %3557, %v664_v63  }
  0x57   : > { %1041 = vperm.xlu1 %3557, %v665_v0   ;;  %v3592_v0 = vmov 0.0  }
  0x5b   : > { %1044 = vperm.xlu1 %3557, %v666_v1  }
  0x5f   : > { %1047 = vperm.xlu1 %3557, %v667_v2  }
  0xa6   : > { %v693_v14 = vpop.xlane.xlu0 %692 }
  0xa7   : > { %v699_v7 = vpop.xlane.xlu1 %698  ;;  %v992_v36 = vadd.f32 %v3063_v28, %v693_v14 }
  0xa8   : > { %v994_v45 = vadd.f32 %v3063_v28, %v699_v7 }
  0xaa   : > { %v696_v16 = vpop.xlane.xlu0 %695 }
  0xab   : > { %v702_v8 = vpop.xlane.xlu1 %701  ;;  %v993_v35 = vadd.f32 %v3063_v28, %v696_v16 }
  0xac   : > { %v995_v43 = vadd.f32 %v3063_v28, %v702_v8 }
  0xae   : > { %v705_v18 = vpop.xlane.xlu0 %704 }
  0xaf   : > { %v708_v9 = vpop.xlane.xlu1 %707  ;;  %v996_v56 = vadd.f32 %v3063_v28, %v705_v18 }
  0xb0   : > { %v997_v54 = vadd.f32 %v3063_v28, %v708_v9 }
  0xb2   : > { %v3876_v20 = vpop.xlane.xlu0 %710 }
  0xb3   : > { %v3868_v10 = vpop.xlane.xlu1 %713  ;;  %v998_v9 = vadd.f32 %v3063_v28, %v3876_v20 }
  0xb4   : > { %v999_v7 = vadd.f32 %v3063_v28, %v3868_v10 }
  0xb7   : > { %v1064_v11 = vpop.permute.xlu1 %1063 }
  0xbb   : > { %v1030_v12 = vpop.permute.xlu1 %1029  ;;  %v1027_v24 = vpop.permute.xlu0 %1026 }
  0xbc   : > { %vm1054_vm2 = vcmp.eq.s32.totalorder %v1030_v12, %v3915_v40  ;;  %vm1053_vm3 = vcmp.eq.s32.totalorder %v1027_v24, %v3915_v40 }
  0xbf   : > { %v1069_v13 = vpop.permute.xlu1 %1068  ;;  %v3906_v34 = vpop.permute.xlu0 %1083 }
  0xc3   : > { %v3870_v15 = vpop.permute.xlu1 %1032  ;;  %v3919_v48 = vpop.permute.xlu0 %1088 }
  0xc4   : > { %vm1055_vm9 = vcmp.eq.s32.totalorder %v3870_v15, %v3915_v40 }
  0xc7   : > { %v3872_v17 = vpop.permute.xlu1 %1073  ;;  %v1094_v6 = vpop.permute.xlu0 %1093 }
  0xcb   : > { %v3874_v19 = vpop.permute.xlu1 %1035  ;;  %v1099_v28 = vpop.permute.xlu0 %1098 }
  0xcc   : > { %vm1056_vm7 = vcmp.eq.s32.totalorder %v3874_v19, %v3915_v40 }
  0xcf   : > { %v3883_v22 = vpop.permute.xlu1 %1078 }
  0xd3   : > { %v3898_v30 = vpop.permute.xlu1 %1038 }
  0xd4   : > { %vm1057_vm15 = vcmp.eq.s32.totalorder %v3898_v30, %v3915_v40 }
  0xd7   : > { %v3917_v42 = vpop.permute.xlu1 %1041 }
  0xd8   : > { %vm1058_vm13 = vcmp.eq.s32.totalorder %v3917_v42, %v3915_v40 }
  0xdb   : > { %v3927_v60 = vpop.permute.xlu1 %1044 }
  0xe9   : > { %v3270_v23 = vpop.f32.mrb[0].mxu1 }
  0xea   : > { %v3886_v25 = vadd.f32 %v3270_v23, %v3881_v21  ;;  %v834_v26 = vpop.f32.mrb[1].mxu1  ;;  %v1048_v23 = vpop.permute.xlu1 %1047 }
  0xeb   : > { %v3889_v27 = vadd.f32 %v3881_v21, %v834_v26 }
  0xec   : > { %859 = vst.msk [vmem:[#allocation4 + $0x28] sm:$0xff] %vm853_vm1, %v3886_v25 }
  0xed   : > { %858 = vst.msk [vmem:[#allocation4 + $0x20] sm:$0xff] %vm853_vm1, %v3889_v27  ;;  %v3273_v29 = vpop.f32.mrb[2].mxu1 }
  0xee   : > { %v3901_v31 = vadd.f32 %v3273_v29, %v3881_v21  ;;  %v844_v32 = vpop.f32.mrb[3].mxu1 }
  0xef   : > { %v3904_v33 = vadd.f32 %v3881_v21, %v844_v32 }
  0xf0   : > { %861 = vst.msk [vmem:[#allocation4 + $0x38] sm:$0xff] %vm853_vm1, %v3901_v31 }
  0xf1   : > { %860 = vst.msk [vmem:[#allocation4 + $0x30] sm:$0xff] %vm853_vm1, %v3904_v33  ;;  %v3280_v37 = vpop.f32.mrb[4].mxu1 }
  0xf2   : > { %v1001_v38 = vmul.f32 2.0, %v3280_v37  ;;  %v946_v39 = vpop.f32.mrb[5].mxu1 }
  0xf3   : > { %v1000_v41 = vmul.f32 2.0, %v946_v39 }
  0xf4   : > { %v1009_v44 = vsub.f32 %v993_v35, %v1001_v38 }
  0xf5   : > { %v1008_v46 = vsub.f32 %v992_v36, %v1000_v41  ;;  %v3283_v47 = vpop.f32.mrb[6].mxu1 }
  0xf6   : > { %v1017_v49 = vmax.f32 %v1009_v44, 0.0  ;;  %v1003_v50 = vmul.f32 2.0, %v3283_v47  ;;  %v956_v51 = vpop.f32.mrb[7].mxu1 }
  0xf7   : > { %v1016_v52 = vmax.f32 %v1008_v46, 0.0  ;;  %v1002_v53 = vmul.f32 2.0, %v956_v51 }
  0xf8   : > { %v1011_v55 = vsub.f32 %v995_v43, %v1003_v50  ;;  %vm1102_vm4 = vcmp.le.f32.partialorder %v1017_v49, %v1069_v13 }
  0xf9   : > { %vm1101_vm5 = vcmp.le.f32.partialorder %v1016_v52, %v1064_v11  ;;  %v1010_v57 = vsub.f32 %v994_v45, %v1002_v53  ;;  %v3286_v58 = vpop.f32.mrb[8].mxu1  ;;  %vm3923_vm6 = vmand %vm1054_vm2, %vm1102_vm4  ;;  %vm1060_vm4 = vcmp.eq.s32.totalorder %v1048_v23, %v3915_v40 }
  0xfa   : > { %vm1109_vm8 = vmand %vm1053_vm3, %vm1101_vm5  ;;  %v1019_v61 = vmax.f32 %v1011_v55, 0.0  ;;  %v1005_v62 = vmul.f32 2.0, %v3286_v58  ;;  %v966_v63 = vpop.f32.mrb[9].mxu1  ;;  %v3066_v1 = vsel %vm3923_vm6, 1.0, %v3592_v0 }
  0xfb   : > { %v1018_v2 = vmax.f32 %v1010_v57, 0.0  ;;  %v1004_v3 = vmul.f32 2.0, %v966_v63  ;;  %1437 = vadd.xlane.f32.xlu0 %v3066_v1  ;;  %1134 = vst [vmem:[#allocation2 + $0x8] sm:$0xff] %v3066_v1  ;;  %3360 = vmatprep.mubr.msk.f32.mxu0 %vm1109_vm8, %v3593_v4  ;;  %v3065_v5 = vsel %vm1109_vm8, 1.0, %v3592_v0 }
  0xfc   : > { %v1013_v8 = vsub.f32 %v997_v54, %v1005_v62  ;;  %1435 = vadd.xlane.f32.xlu1 %v3065_v5  ;;  %1133 = vst [vmem:[#allocation2] sm:$0xff] %v3065_v5  ;;  %vm1104_vm10 = vcmp.le.f32.partialorder %v1019_v61, %v3883_v22 }
  0xfd   : > { %v1012_v11 = vsub.f32 %v996_v56, %v1004_v3  ;;  %v3289_v12 = vpop.f32.mrb[10].mxu1  ;;  %vm1103_vm11 = vcmp.le.f32.partialorder %v1018_v2, %v3872_v17  ;;  %vm3945_vm12 = vmand %vm1056_vm7, %vm1104_vm10  ;;  %vm1059_vm7 = vcmp.eq.s32.totalorder %v3927_v60, %v3915_v40  ;;  %v3264_v56 = vpop.f32.mrb[0].mxu0 }
  0xfe   : > { %v1021_v10 = vmax.f32 %v1013_v8, 0.0  ;;  %v1007_v14 = vmul.f32 2.0, %v3289_v12  ;;  %v976_v16 = vpop.f32.mrb[11].mxu1  ;;  %vm3954_vm14 = vmand %vm1055_vm9, %vm1103_vm11  ;;  %v3068_v17 = vsel %vm3945_vm12, 1.0, %v3592_v0  ;;  %v4011_v58 = vadd.f32 %v3264_v56, %v3881_v21  ;;  %v814_v60 = vpop.f32.mrb[1].mxu0 }
  0xff   : > { %v1020_v19 = vmax.f32 %v1012_v11, 0.0  ;;  %v1006_v20 = vmul.f32 2.0, %v976_v16  ;;  %v3067_v22 = vsel %vm3954_vm14, 1.0, %v3592_v0  ;;  %1136 = vst [vmem:[#allocation2 + $0x18] sm:$0xff] %v3068_v17  ;;  %v4014_v62 = vadd.f32 %v3881_v21, %v814_v60  ;;  %v3267_v63 = vpop.f32.mrb[2].mxu0 }
 0x100   : > { %vm1106_vm0 = vcmp.le.f32.partialorder %v1021_v10, %v3919_v48  ;;  %v1015_v15 = vsub.f32 %v999_v7, %v1007_v14  ;;  %1135 = vst [vmem:[#allocation2 + $0x10] sm:$0xff] %v3067_v22  ;;  %1439 = vadd.xlane.f32.xlu0 %v3067_v22  ;;  %1441 = vadd.xlane.f32.xlu1 %v3068_v17  ;;  %855 = vst.msk [vmem:[#allocation4 + $0x8] sm:$0xff] %vm853_vm1, %v4011_v58  ;;  %v824_v1 = vpop.f32.mrb[3].mxu0 }
 0x101   : > { %v1014_v24 = vsub.f32 %v998_v9, %v1006_v20  ;;  %v3306_v26 = vpop.f32.mrb[12].mxu1  ;;  %vm1105_vm2 = vcmp.le.f32.partialorder %v1020_v19, %v3906_v34  ;;  %vm3971_vm3 = vmand %vm1058_vm13, %vm1106_vm0  ;;  %854 = vst.msk [vmem:[#allocation4] sm:$0xff] %vm853_vm1, %v4014_v62  ;;  %v4024_v3 = vadd.f32 %v3881_v21, %v824_v1 }
 0x102   : > { %v1356_v32 = vpop.f32.mrb[13].mxu1  ;;  %v1023_v35 = vmax.f32 %v1015_v15, 0.0  ;;  %vm3979_vm5 = vmand %vm1057_vm15, %vm1105_vm2  ;;  %v3070_v34 = vsel %vm3971_vm3, 1.0, %v3592_v0 }
 0x103   : > { %v1022_v37 = vmax.f32 %v1014_v24, 0.0  ;;  %v3470_v38 = vpack.c.bf16 %v3306_v26, %v1356_v32  ;;  %v3069_v39 = vsel %vm3979_vm5, 1.0, %v3592_v0  ;;  %1138 = vst [vmem:[#allocation2 + $0x28] sm:$0xff] %v3070_v34  ;;  %856 = vst.msk [vmem:[#allocation4 + $0x10] sm:$0xff] %vm853_vm1, %v4024_v3 }
 0x104   : > { %vm1108_vm8 = vcmp.le.f32.partialorder %v1023_v35, %v1099_v28  ;;  %1443 = vadd.xlane.f32.xlu0 %v3069_v39  ;;  %1137 = vst [vmem:[#allocation2 + $0x20] sm:$0xff] %v3069_v39  ;;  %1445 = vadd.xlane.f32.xlu1 %v3070_v34 }
 0x105   : > { %vm1107_vm9 = vcmp.le.f32.partialorder %v1022_v37, %v1094_v6  ;;  %v3309_v30 = vpop.f32.mrb[14].mxu1  ;;  %3471 = vmatprep.subr.bf16.mxu0 %v3470_v38  ;;  %vm3993_vm10 = vmand %vm1060_vm4, %vm1108_vm8 }
 0x106   : > { %v1366_v42 = vpop.f32.mrb[15].mxu1  ;;  %3473 = vmatpush3.bf16.msra.mxu0 %v3470_v38  ;;  %vm4000_vm11 = vmand %vm1059_vm7, %vm1107_vm9  ;;  %v3072_v44 = vsel %vm3993_vm10, 1.0, %v3592_v0 }
 0x107   : > { %v3474_v45 = vpack.c.bf16 %v3309_v30, %v1366_v42  ;;  %v3071_v46 = vsel %vm4000_vm11, 1.0, %v3592_v0  ;;  %1140 = vst [vmem:[#allocation2 + $0x38] sm:$0xff] %v3072_v44  ;;  %v4019_v0 = vadd.f32 %v3267_v63, %v3881_v21  ;;  %v3296_v21 = vpop.f32.mrb[4].mxu0 }
 0x108   : > { %1447 = vadd.xlane.f32.xlu0 %v3071_v46  ;;  %1139 = vst [vmem:[#allocation2 + $0x30] sm:$0xff] %v3071_v46  ;;  %1449 = vadd.xlane.f32.xlu1 %v3072_v44  ;;  %1239 = vst [vmem:[#allocation3 + $0x8] sm:$0xff] %v3296_v21  ;;  %v1219_v59 = vpop.f32.mrb[5].mxu0 }
 0x109   : > { %v3312_v47 = vpop.f32.mrb[16].mxu1  ;;  %3475 = vmatprep.subr.bf16.mxu0 %v3474_v45  ;;  %857 = vst.msk [vmem:[#allocation4 + $0x18] sm:$0xff] %vm853_vm1, %v4019_v0  ;;  %1238 = vst [vmem:[#allocation3] sm:$0xff] %v1219_v59  ;;  %v3299_v11 = vpop.f32.mrb[6].mxu0 }
 0x10a   : > { %v1376_v40 = vpop.f32.mrb[17].mxu1  ;;  %3477 = vmatpush3.bf16.msra.mxu0 %v3474_v45  ;;  %1241 = vst [vmem:[#allocation3 + $0x18] sm:$0xff] %v3299_v11  ;;  %v1229_v12 = vpop.f32.mrb[7].mxu0 }
 0x10b   : > { %v3478_v48 = vpack.c.bf16 %v3312_v47, %v1376_v40  ;;  %1240 = vst [vmem:[#allocation3 + $0x10] sm:$0xff] %v1229_v12 }
 0x10d   : > { %v3315_v49 = vpop.f32.mrb[18].mxu1  ;;  %3479 = vmatprep.subr.bf16.mxu0 %v3478_v48 }
 0x10e   : > { %v1386_v50 = vpop.f32.mrb[19].mxu1  ;;  %3481 = vmatpush3.bf16.msra.mxu0 %v3478_v48 }
 0x10f   : > { %v3482_v51 = vpack.c.bf16 %v3315_v49, %v1386_v50 }
 0x111   : > { %v3318_v52 = vpop.f32.mrb[20].mxu1  ;;  %3483 = vmatprep.subr.bf16.mxu0 %v3482_v51 }
 0x112   : > { %v1396_v53 = vpop.f32.mrb[21].mxu1  ;;  %3485 = vmatpush3.bf16.msra.mxu0 %v3482_v51 }
 0x113   : > { %v3486_v54 = vpack.c.bf16 %v3318_v52, %v1396_v53 }
 0x115   : > { %v3321_v55 = vpop.f32.mrb[22].mxu1  ;;  %3487 = vmatprep.subr.bf16.mxu0 %v3486_v54 }
 0x116   : > { %v1406_v57 = vpop.f32.mrb[23].mxu1  ;;  %3489 = vmatpush3.bf16.msra.mxu0 %v3486_v54 }
 0x117   : > { %v3490_v61 = vpack.c.bf16 %v3321_v55, %v1406_v57 }
 0x119   : > { %v3324_v2 = vpop.f32.mrb[24].mxu1  ;;  %3491 = vmatprep.subr.bf16.mxu0 %v3490_v61 }
 0x11a   : > { %v1416_v5 = vpop.f32.mrb[25].mxu1  ;;  %3493 = vmatpush3.bf16.msra.mxu0 %v3490_v61 }
 0x11b   : > { %v3494_v6 = vpack.c.bf16 %v3324_v2, %v1416_v5 }
 0x11d   : > { %v3327_v7 = vpop.f32.mrb[26].mxu1  ;;  %3495 = vmatprep.subr.bf16.mxu0 %v3494_v6 }
 0x11e   : > { %v1426_v8 = vpop.f32.mrb[27].mxu1  ;;  %3497 = vmatpush3.bf16.msra.mxu0 %v3494_v6 }
 0x11f   : > { %v3498_v9 = vpack.c.bf16 %v3327_v7, %v1426_v8 }
 0x121   : > { %3499 = vmatprep.subr.bf16.mxu0 %v3498_v9 }
 0x122   : > { %3501 = vmatpush3.bf16.msra.mxu0 %v3498_v9 }
 0x125   : > { %3361 = vmatmul.mubr.msk.f32.vlgmr.msra.gmra.mrb[8].mxu0 %vm3923_vm6, %v3593_v4 }
 0x126   : > { %3363 = vmatprep.mubr.msk.f32.mxu0 %vm3954_vm14, %v3593_v4 }
 0x129   : > { %3364 = vmatmul.mubr.msk.f32.gmra.mrb[10].mxu0 %vm3945_vm12, %v3593_v4 }
 0x12a   : > { %3366 = vmatprep.mubr.msk.f32.mxu0 %vm3979_vm5, %v3593_v4 }
 0x12d   : > { %3367 = vmatmul.mubr.msk.f32.gmra.mrb[12].mxu0 %vm3971_vm3, %v3593_v4 }
 0x12e   : > { %3369 = vmatprep.mubr.msk.f32.mxu0 %vm4000_vm11, %v3593_v4 }
 0x131   : > { %3370 = vmatmul.mubr.msk.f32.gmra.mrb[14].mxu0 %vm3993_vm10, %v3593_v4 }
 0x188   : > { %v4051_v13 = vpop.xlane.xlu0 %1437 }
 0x189   : > { %v4053_v10 = vpop.xlane.xlu1 %1435 }
 0x18d   : > { %v4055_v14 = vpop.xlane.xlu1 %1441  ;;  %v4057_v16 = vpop.xlane.xlu0 %1439 }
 0x191   : > { %v4059_v18 = vpop.xlane.xlu1 %1445  ;;  %v4061_v17 = vpop.xlane.xlu0 %1443 }
 0x195   : > { %v4063_v4 = vpop.xlane.xlu1 %1449  ;;  %v4065_v19 = vpop.xlane.xlu0 %1447 }
 0x1f8   : > { %v4067_v20 = vpop.f32.mrb[8].mxu0 }
 0x1f9   : > { %v4069_v22 = vpop.f32.mrb[9].mxu0 }
 0x1fc   : > { %v4071_v23 = vpop.f32.mrb[10].mxu0 }
 0x1fd   : > { %v4073_v15 = vpop.f32.mrb[11].mxu0 }
 0x200   : > { %v4075_v24 = vpop.f32.mrb[12].mxu0 }
 0x201   : > { %v4077_v26 = vpop.f32.mrb[13].mxu0 }
 0x204   : > { %v4079_v28 = vpop.f32.mrb[14].mxu0 }
 0x205   : > { %v4081_v29 = vpop.f32.mrb[15].mxu0 }
 0x206 LB: >> { %v1579_v32 = vlaneseq  ;;  %s4089_s1 = sshll.u32 %s3589_s21, 3  ;;  %v3594_v51 = vmov 1966171168   ;;  %v4115_v61 = vld [vmem:[#allocation3] sm:$0xff]  ;;  %v4123_v8 = vld [vmem:[#allocation3 + $0x8] sm:$0xff]  ;;  %vm2056_vm6 = vcmask 130112   ;;  %s3589_s21 = sphi %s4083_s21, %s1569_s21  }
 0x207   : >> { %s1571_s22 = scalar_lea.vmem [#allocation4], %s4089_s1  ;;  %v1798_v52 = vunpack.c.l.s4 %v3594_v51  ;;  %s1577_s3 = scalar_lea.vmem [#allocation2], %s4089_s1  ;;  %vm2063_vm12 = vcmask 195712   ;;  %vm2070_vm13 = vcmask 261312   ;;  %vm2205_vm14 = vcmask 1041409  }
 0x208   : >> { %v4092_v35 = vshrl.u32 %v1579_v32, 7  ;;  %v1572_v36 = vld [vmem:[%s1571_s22] sm:$0xff]  ;;  %vm2207_vm15 = vcmask 1042434   ;;  %vm2209_vm0 = vcmask 1043459   ;;  %vm2211_vm2 = vcmask 1044484   ;;  %s2220_s2 = scalar_lea.vmem [#allocation5], %s4089_s1 }
 0x209   : >> { %v1799_v53 = vunpack.c.0.s8 %v1798_v52  ;;  %v4110_v55 = vld [vmem:[%s1577_s3] sm:$0xff]  ;;  %vm2213_vm3 = vcmask 1045509   ;;  %vm2215_vm4 = vcmask 1046534   ;;  %vm2217_vm5 = vcmask 1047559   ;;  %s1569_s21 = sadd.s32 1, %s3589_s21  }
 0x20a   : >> { %v4096_v34 = vsub.s32 0, %v4092_v35  ;;  %v1600_v37 = vsub.s32 1, %v4092_v35  ;;  %v1619_v30 = vsub.s32 2, %v4092_v35  ;;  %v1638_v42 = vsub.s32 3, %v4092_v35  ;;  %p1566_p4 = scmp.ge.s32.totalorder %s1569_s21, 8  }
 0x20b   : >> { %v1657_v44 = vsub.s32 4, %v4092_v35  ;;  %v1676_v46 = vsub.s32 5, %v4092_v35  ;;  %v1695_v40 = vsub.s32 6, %v4092_v35  ;;  %v1714_v49 = vsub.s32 7, %v4092_v35 }
 0x20c   : >> { %v1582_v38 = vrot.slane %v1572_v36, %v4096_v34  ;;  %v1601_v39 = vrot.slane %v1572_v36, %v1600_v37  ;;  %v1620_v41 = vrot.slane %v1572_v36, %v1619_v30  ;;  %v1639_v43 = vrot.slane %v1572_v36, %v1638_v42 }
 0x20d   : >> { %v1658_v45 = vrot.slane %v1572_v36, %v1657_v44  ;;  %v1677_v47 = vrot.slane %v1572_v36, %v1676_v46  ;;  %v1696_v48 = vrot.slane %v1572_v36, %v1695_v40  ;;  %v1715_v50 = vrot.slane %v1572_v36, %v1714_v49 }
 0x20e   : >> { %1584 = vbcast.lane.b32.xlu0 %v1582_v38, 256  ;;  %1603 = vbcast.lane.b32.xlu1 %v1601_v39, 256  ;;  %v4107_v54 = vsub.s32 %v1799_v53, %v4092_v35  ;;  %vm2480_vm9 = vcmask (%p1566_p4), 523264  }
 0x210   : >> { %v1803_v56 = vrot.slane %v4110_v55, %v4107_v54 }
 0x212   : >> { %1588 = vbcast.lane.b32.xlu0 %v1582_v38, 264  ;;  %1607 = vbcast.lane.b32.xlu1 %v1601_v39, 264  ;;  %v1811_v57 = vcombine.high %v1803_v56, %v1803_v56  ;;  %v1819_v60 = vrot.slane %v1803_v56, %v4107_v54 }
 0x214   : >> { %v4118_v63 = vrot.slane %v1811_v57, %v4107_v54  ;;  %v1848_v7 = vrot.slane %v1819_v60, %v4096_v34  ;;  %v1841_v40 = vcombine.high %v1819_v60, %v1819_v60 }
 0x216   : >> { %1592 = vbcast.lane.b32.xlu0 %v1582_v38, 272  ;;  %1611 = vbcast.lane.b32.xlu1 %v1601_v39, 272  ;;  %v1852_v59 = vrot.slane %v4118_v63, %v4096_v34 }
 0x21a   : >> { %1622 = vbcast.lane.b32.xlu0 %v1620_v41, 256  ;;  %1626 = vbcast.lane.b32.xlu1 %v1620_v41, 264 }
 0x21e   : >> { %1596 = vbcast.lane.b32.xlu0 %v1582_v38, 280  ;;  %1615 = vbcast.lane.b32.xlu1 %v1601_v39, 280  ;;  %v4129_v39 = vld [vmem:[#allocation3 + $0x10] sm:$0xff] }
 0x222   : >> { %1630 = vbcast.lane.b32.xlu0 %v1620_v41, 272  ;;  %1641 = vbcast.lane.b32.xlu1 %v1639_v43, 256 }
 0x226   : >> { %1645 = vbcast.lane.b32.xlu0 %v1639_v43, 264  ;;  %1634 = vbcast.lane.b32.xlu1 %v1620_v41, 280 }
 0x22a   : >> { %1649 = vbcast.lane.b32.xlu0 %v1639_v43, 272  ;;  %1660 = vbcast.lane.b32.xlu1 %v1658_v45, 256 }
 0x22e   : >> { %1664 = vbcast.lane.b32.xlu0 %v1658_v45, 264  ;;  %1653 = vbcast.lane.b32.xlu1 %v1639_v43, 280 }
 0x232   : >> { %1668 = vbcast.lane.b32.xlu0 %v1658_v45, 272  ;;  %1679 = vbcast.lane.b32.xlu1 %v1677_v47, 256 }
 0x236   : >> { %1683 = vbcast.lane.b32.xlu0 %v1677_v47, 264  ;;  %1672 = vbcast.lane.b32.xlu1 %v1658_v45, 280 }
 0x23a   : >> { %1687 = vbcast.lane.b32.xlu0 %v1677_v47, 272  ;;  %1698 = vbcast.lane.b32.xlu1 %v1696_v48, 256 }
 0x23e   : >> { %1702 = vbcast.lane.b32.xlu0 %v1696_v48, 264  ;;  %1691 = vbcast.lane.b32.xlu1 %v1677_v47, 280 }
 0x242   : >> { %1706 = vbcast.lane.b32.xlu0 %v1696_v48, 272  ;;  %1717 = vbcast.lane.b32.xlu1 %v1715_v50, 256 }
 0x246   : >> { %1721 = vbcast.lane.b32.xlu0 %v1715_v50, 264  ;;  %1710 = vbcast.lane.b32.xlu1 %v1696_v48, 280 }
 0x24a   : >> { %1725 = vbcast.lane.b32.xlu0 %v1715_v50, 272  ;;  %1729 = vbcast.lane.b32.xlu1 %v1715_v50, 280 }
 0x280   : >> { %v1585_v1 = vpop.permute.xlu0 %1584  ;;  %v1604_v2 = vpop.permute.xlu1 %1603 }
 0x281   : >> { %v1731_v5 = vadd.f32 %v1585_v1, %v4115_v61  ;;  %v1735_v6 = vadd.f32 %v1604_v2, %v4115_v61  ;;  %v1856_v1 = vrot.slane %v1841_v40, %v4096_v34  ;;  %v4136_v2 = vld [vmem:[#allocation3 + $0x18] sm:$0xff] }
 0x283   : >> { %v1763_v9 = vmax.f32 %v1731_v5, 0.0  ;;  %v1767_v21 = vmax.f32 %v1735_v6, 0.0 }
 0x284   : >> { %v1589_v11 = vpop.permute.xlu0 %1588  ;;  %v1608_v12 = vpop.permute.xlu1 %1607 }
 0x285   : >> { %v1732_v36 = vadd.f32 %v1589_v11, %v4123_v8  ;;  %v1885_v37 = vmul.f32 %v1848_v7, %v1763_v9  ;;  %v1736_v38 = vadd.f32 %v1608_v12, %v4123_v8  ;;  %v1889_v42 = vmul.f32 %v1852_v59, %v1767_v21 }
 0x287   : >> { %v1764_v30 = vmax.f32 %v1732_v36, 0.0  ;;  %1917 = vadd.xlane.f32.xlu0 %v1885_v37  ;;  %v1768_v41 = vmax.f32 %v1736_v38, 0.0  ;;  %v1796_v37 = vcombine.high %v4110_v55, %v4110_v55 }
 0x288   : >> { %v1593_v43 = vpop.permute.xlu0 %1592  ;;  %v1612_v44 = vpop.permute.xlu1 %1611 }
 0x289   : >> { %v1733_v45 = vadd.f32 %v1593_v43, %v4129_v39  ;;  %v1886_v46 = vmul.f32 %v1848_v7, %v1764_v30  ;;  %v1737_v47 = vadd.f32 %v1612_v44, %v4129_v39  ;;  %v1890_v50 = vmul.f32 %v1852_v59, %v1768_v41 }
 0x28a   : >> { %v1810_v40 = vrot.slane %v1796_v37, %v4107_v54 }
 0x28b   : >> { %v1765_v48 = vmax.f32 %v1733_v45, 0.0  ;;  %1925 = vadd.xlane.f32.xlu0 %v1889_v42  ;;  %1919 = vadd.xlane.f32.xlu1 %v1886_v46  ;;  %v1769_v49 = vmax.f32 %v1737_v47, 0.0  ;;  %v1843_v42 = vcombine.high %v4118_v63, %v4118_v63 }
 0x28c   : >> { %v1623_v51 = vpop.permute.xlu0 %1622  ;;  %v1627_v52 = vpop.permute.xlu1 %1626 }
 0x28d   : >> { %v1739_v53 = vadd.f32 %v1623_v51, %v4115_v61  ;;  %v1887_v56 = vmul.f32 %v1848_v7, %v1765_v48  ;;  %v1740_v57 = vadd.f32 %v1627_v52, %v4123_v8  ;;  %v1891_v6 = vmul.f32 %v1852_v59, %v1769_v49 }
 0x28f   : >> { %v1771_v5 = vmax.f32 %v1739_v53, 0.0  ;;  %1927 = vadd.xlane.f32.xlu0 %v1890_v50  ;;  %1921 = vadd.xlane.f32.xlu1 %v1887_v56  ;;  %v1772_v60 = vmax.f32 %v1740_v57, 0.0  ;;  %v1860_v50 = vrot.slane %v1843_v42, %v4096_v34 }
 0x290   : >> { %v1597_v9 = vpop.permute.xlu0 %1596  ;;  %v1616_v21 = vpop.permute.xlu1 %1615 }
 0x291   : >> { %v1734_v11 = vadd.f32 %v1597_v9, %v4136_v2  ;;  %v1893_v12 = vmul.f32 %v1856_v1, %v1771_v5  ;;  %v1738_v36 = vadd.f32 %v1616_v21, %v4136_v2  ;;  %v1894_v41 = vmul.f32 %v1856_v1, %v1772_v60 }
 0x293   : >> { %v1766_v38 = vmax.f32 %v1734_v11, 0.0  ;;  %1929 = vadd.xlane.f32.xlu0 %v1891_v6  ;;  %1933 = vadd.xlane.f32.xlu1 %v1893_v12  ;;  %v1770_v30 = vmax.f32 %v1738_v36, 0.0 }
 0x294   : >> { %v1631_v43 = vpop.permute.xlu0 %1630  ;;  %v1642_v44 = vpop.permute.xlu1 %1641 }
 0x295   : >> { %v1741_v45 = vadd.f32 %v1631_v43, %v4129_v39  ;;  %v1888_v46 = vmul.f32 %v1848_v7, %v1766_v38  ;;  %v1743_v47 = vadd.f32 %v1642_v44, %v4115_v61  ;;  %v1892_v49 = vmul.f32 %v1852_v59, %v1770_v30 }
 0x296   : >> { %v1826_v7 = vrot.slane %v1810_v40, %v4107_v54  ;;  %v1812_v30 = vcombine.high %v1810_v40, %v1810_v40 }
 0x297   : >> { %v1773_v48 = vmax.f32 %v1741_v45, 0.0  ;;  %1935 = vadd.xlane.f32.xlu0 %v1894_v41  ;;  %1923 = vadd.xlane.f32.xlu1 %v1888_v46  ;;  %v1775_v55 = vmax.f32 %v1743_v47, 0.0 }
 0x298   : >> { %v1646_v51 = vpop.permute.xlu0 %1645  ;;  %v1635_v52 = vpop.permute.xlu1 %1634  ;;  %v1864_v12 = vrot.slane %v1826_v7, %v4096_v34 }
 0x299   : >> { %v1744_v63 = vadd.f32 %v1646_v51, %v4123_v8  ;;  %v1895_v53 = vmul.f32 %v1856_v1, %v1773_v48  ;;  %v1742_v56 = vadd.f32 %v1635_v52, %v4136_v2  ;;  %v1897_v60 = vmul.f32 %v1860_v50, %v1775_v55 }
 0x29a   : >> { %v1840_v55 = vrot.slane %v1812_v30, %v4107_v54 }
 0x29b   : >> { %v1776_v57 = vmax.f32 %v1744_v63, 0.0  ;;  %1931 = vadd.xlane.f32.xlu0 %v1892_v49  ;;  %1937 = vadd.xlane.f32.xlu1 %v1895_v53  ;;  %v1774_v5 = vmax.f32 %v1742_v56, 0.0 }
 0x29c   : >> { %v1650_v6 = vpop.permute.xlu0 %1649  ;;  %v1661_v9 = vpop.permute.xlu1 %1660 }
 0x29d   : >> { %v1745_v59 = vadd.f32 %v1650_v6, %v4129_v39  ;;  %v1898_v21 = vmul.f32 %v1860_v50, %v1776_v57  ;;  %v1747_v11 = vadd.f32 %v1661_v9, %v4115_v61  ;;  %v1896_v38 = vmul.f32 %v1856_v1, %v1774_v5 }
 0x29e   : >> { %v1868_v57 = vrot.slane %v1840_v55, %v4096_v34 }
 0x29f   : >> { %v1777_v36 = vmax.f32 %v1745_v59, 0.0  ;;  %1941 = vadd.xlane.f32.xlu0 %v1897_v60  ;;  %1943 = vadd.xlane.f32.xlu1 %v1898_v21  ;;  %v1779_v37 = vmax.f32 %v1747_v11, 0.0 }
 0x2a0   : >> { %v1665_v41 = vpop.permute.xlu0 %1664  ;;  %v1654_v42 = vpop.permute.xlu1 %1653 }
 0x2a1   : >> { %v1748_v43 = vadd.f32 %v1665_v41, %v4123_v8  ;;  %v1899_v44 = vmul.f32 %v1860_v50, %v1777_v36  ;;  %v1746_v45 = vadd.f32 %v1654_v42, %v4136_v2  ;;  %v1901_v48 = vmul.f32 %v1864_v12, %v1779_v37 }
 0x2a2   : >> { %v1842_v36 = vcombine.high %v1826_v7, %v1826_v7 }
 0x2a3   : >> { %v1780_v46 = vmax.f32 %v1748_v43, 0.0  ;;  %1939 = vadd.xlane.f32.xlu0 %v1896_v38  ;;  %1945 = vadd.xlane.f32.xlu1 %v1899_v44  ;;  %v1778_v47 = vmax.f32 %v1746_v45, 0.0 }
 0x2a4   : >> { %v1669_v49 = vpop.permute.xlu0 %1668  ;;  %v1680_v51 = vpop.permute.xlu1 %1679  ;;  %v1872_v45 = vrot.slane %v1842_v36, %v4096_v34 }
 0x2a5   : >> { %v1749_v52 = vadd.f32 %v1669_v49, %v4129_v39  ;;  %v1902_v1 = vmul.f32 %v1864_v12, %v1780_v46  ;;  %v1751_v40 = vadd.f32 %v1680_v51, %v4115_v61  ;;  %v1900_v56 = vmul.f32 %v1860_v50, %v1778_v47 }
 0x2a7   : >> { %v1781_v63 = vmax.f32 %v1749_v52, 0.0  ;;  %1949 = vadd.xlane.f32.xlu0 %v1901_v48  ;;  %1951 = vadd.xlane.f32.xlu1 %v1902_v1  ;;  %v1783_v53 = vmax.f32 %v1751_v40, 0.0  ;;  %v1844_v40 = vcombine.high %v1840_v55, %v1840_v55 }
 0x2a8   : >> { %v1684_v5 = vpop.permute.xlu0 %1683  ;;  %v1673_v60 = vpop.permute.xlu1 %1672 }
 0x2a9   : >> { %v1752_v6 = vadd.f32 %v1684_v5, %v4123_v8  ;;  %v1903_v9 = vmul.f32 %v1864_v12, %v1781_v63  ;;  %v1750_v54 = vadd.f32 %v1673_v60, %v4136_v2  ;;  %v1905_v11 = vmul.f32 %v1868_v57, %v1783_v53 }
 0x2ab   : >> { %v1784_v59 = vmax.f32 %v1752_v6, 0.0  ;;  %1947 = vadd.xlane.f32.xlu0 %v1900_v56  ;;  %1953 = vadd.xlane.f32.xlu1 %v1903_v9  ;;  %v1782_v21 = vmax.f32 %v1750_v54, 0.0  ;;  %v1876_v54 = vrot.slane %v1844_v40, %v4096_v34 }
 0x2ac   : >> { %v1688_v37 = vpop.permute.xlu0 %1687  ;;  %v1699_v38 = vpop.permute.xlu1 %1698 }
 0x2ad   : >> { %v1753_v30 = vadd.f32 %v1688_v37, %v4129_v39  ;;  %v1906_v50 = vmul.f32 %v1868_v57, %v1784_v59  ;;  %v1755_v41 = vadd.f32 %v1699_v38, %v4115_v61  ;;  %v1904_v44 = vmul.f32 %v1864_v12, %v1782_v21 }
 0x2af   : >> { %v1785_v42 = vmax.f32 %v1753_v30, 0.0  ;;  %1957 = vadd.xlane.f32.xlu0 %v1905_v11  ;;  %1959 = vadd.xlane.f32.xlu1 %v1906_v50  ;;  %v1787_v43 = vmax.f32 %v1755_v41, 0.0 }
 0x2b0   : >> { %v1703_v46 = vpop.permute.xlu0 %1702  ;;  %v1692_v47 = vpop.permute.xlu1 %1691 }
 0x2b1   : >> { %v1756_v48 = vadd.f32 %v1703_v46, %v4123_v8  ;;  %v1907_v49 = vmul.f32 %v1868_v57, %v1785_v42  ;;  %v1754_v7 = vadd.f32 %v1692_v47, %v4136_v2  ;;  %v1909_v1 = vmul.f32 %v1872_v45, %v1787_v43 }
 0x2b3   : >> { %v1788_v51 = vmax.f32 %v1756_v48, 0.0  ;;  %1955 = vadd.xlane.f32.xlu0 %v1904_v44  ;;  %1961 = vadd.xlane.f32.xlu1 %v1907_v49  ;;  %v1786_v52 = vmax.f32 %v1754_v7, 0.0 }
 0x2b4   : >> { %v1707_v63 = vpop.permute.xlu0 %1706  ;;  %v1718_v53 = vpop.permute.xlu1 %1717 }
 0x2b5   : >> { %v1757_v56 = vadd.f32 %v1707_v63, %v4129_v39  ;;  %v1910_v12 = vmul.f32 %v1872_v45, %v1788_v51  ;;  %v1759_v5 = vadd.f32 %v1718_v53, %v4115_v61  ;;  %v1908_v9 = vmul.f32 %v1868_v57, %v1786_v52 }
 0x2b7   : >> { %v1789_v60 = vmax.f32 %v1757_v56, 0.0  ;;  %1965 = vadd.xlane.f32.xlu0 %v1909_v1  ;;  %1967 = vadd.xlane.f32.xlu1 %v1910_v12  ;;  %v1791_v6 = vmax.f32 %v1759_v5, 0.0 }
 0x2b8   : >> { %v1722_v59 = vpop.permute.xlu0 %1721  ;;  %v1711_v21 = vpop.permute.xlu1 %1710 }
 0x2b9   : >> { %v1760_v11 = vadd.f32 %v1722_v59, %v4123_v8  ;;  %v1911_v36 = vmul.f32 %v1872_v45, %v1789_v60  ;;  %v1758_v55 = vadd.f32 %v1711_v21, %v4136_v2  ;;  %v1913_v30 = vmul.f32 %v1876_v54, %v1791_v6 }
 0x2bb   : >> { %v1792_v37 = vmax.f32 %v1760_v11, 0.0  ;;  %1963 = vadd.xlane.f32.xlu0 %v1908_v9  ;;  %1969 = vadd.xlane.f32.xlu1 %v1911_v36  ;;  %v1790_v38 = vmax.f32 %v1758_v55, 0.0 }
 0x2bc   : >> { %v1726_v61 = vpop.permute.xlu0 %1725  ;;  %v1730_v50 = vpop.permute.xlu1 %1729 }
 0x2bd   : >> { %v1761_v41 = vadd.f32 %v1726_v61, %v4129_v39  ;;  %v1914_v42 = vmul.f32 %v1876_v54, %v1792_v37  ;;  %v1762_v57 = vadd.f32 %v1730_v50, %v4136_v2  ;;  %v1912_v8 = vmul.f32 %v1872_v45, %v1790_v38 }
 0x2bf   : >> { %v1793_v34 = vmax.f32 %v1761_v41, 0.0  ;;  %1973 = vadd.xlane.f32.xlu0 %v1913_v30  ;;  %1975 = vadd.xlane.f32.xlu1 %v1914_v42  ;;  %v1794_v43 = vmax.f32 %v1762_v57, 0.0 }
 0x2c1   : >> { %v1915_v44 = vmul.f32 %v1876_v54, %v1793_v34  ;;  %v1916_v46 = vmul.f32 %v1876_v54, %v1794_v43  ;;  %v2046_v54 = vand.u32 127, %v1579_v32 }
 0x2c3   : >> { %1971 = vadd.xlane.f32.xlu0 %v1912_v8  ;;  %1977 = vadd.xlane.f32.xlu1 %v1915_v44  ;;  %v2051_v59 = vadd.s32 4294967288, %v2046_v54  ;;  %v2058_v21 = vadd.s32 4294967280, %v2046_v54  ;;  %v2065_v55 = vadd.s32 4294967272, %v2046_v54  ;;  %v4202_v50 = vsub.s32 %v2046_v54, %v4092_v35 }
 0x2c5   : >> { %v4192_v37 = vsub.s32 %v2051_v59, %v4092_v35  ;;  %v4195_v38 = vsub.s32 %v2058_v21, %v4092_v35  ;;  %v4205_v32 = vsub.s32 %v2065_v55, %v4092_v35 }
 0x2c7   : >> { %1979 = vadd.xlane.f32.xlu0 %v1916_v46 }
 0x314   : >> { %v1918_v47 = vpop.xlane.xlu0 %1917 }
 0x315   : >> { %v2050_v43 = vrot.slane %v1918_v47, %v4202_v50 }
 0x318   : >> { %v1920_v48 = vpop.xlane.xlu1 %1919  ;;  %v1926_v49 = vpop.xlane.xlu0 %1925 }
 0x319   : >> { %v2055_v41 = vrot.slane %v1920_v48, %v4192_v37  ;;  %v2075_v54 = vrot.slane %v1926_v49, %v4202_v50 }
 0x31b   : >> { %v2057_v35 = vsel %vm2056_vm6, %v2055_v41, %v2050_v43 }
 0x31c   : >> { %v1922_v7 = vpop.xlane.xlu1 %1921  ;;  %v1928_v51 = vpop.xlane.xlu0 %1927 }
 0x31d   : >> { %v2062_v42 = vrot.slane %v1922_v7, %v4195_v38  ;;  %v2079_v8 = vrot.slane %v1928_v51, %v4192_v37 }
 0x31f   : >> { %v2064_v59 = vsel %vm2063_vm12, %v2062_v42, %v2057_v35 }
 0x320   : >> { %v1934_v52 = vpop.xlane.xlu1 %1933  ;;  %v1930_v39 = vpop.xlane.xlu0 %1929 }
 0x321   : >> { %v2084_v44 = vrot.slane %v1930_v39, %v4195_v38  ;;  %v2094_v48 = vrot.slane %v1934_v52, %v4202_v50  ;;  %v2080_v39 = vsel %vm2056_vm6, %v2079_v8, %v2075_v54 }
 0x323   : >> { %v2085_v52 = vsel %vm2063_vm12, %v2084_v44, %v2080_v39 }
 0x324   : >> { %v1924_v1 = vpop.xlane.xlu1 %1923  ;;  %v1936_v40 = vpop.xlane.xlu0 %1935 }
 0x325   : >> { %v2069_v46 = vrot.slane %v1924_v1, %v4205_v32  ;;  %v2098_v7 = vrot.slane %v1936_v40, %v4192_v37 }
 0x327   : >> { %v2071_v40 = vsel %vm2070_vm13, %v2069_v46, %v2064_v59 }
 0x328   : >> { %v1938_v2 = vpop.xlane.xlu1 %1937  ;;  %v1932_v63 = vpop.xlane.xlu0 %1931 }
 0x329   : >> { %v2103_v47 = vrot.slane %v1938_v2, %v4195_v38  ;;  %v2089_v1 = vrot.slane %v1932_v63, %v4205_v32  ;;  %v2099_v2 = vsel %vm2056_vm6, %v2098_v7, %v2094_v48 }
 0x32c   : >> { %v1944_v53 = vpop.xlane.xlu1 %1943  ;;  %v1942_v56 = vpop.xlane.xlu0 %1941 }
 0x32d   : >> { %v2117_v55 = vrot.slane %v1944_v53, %v4192_v37  ;;  %v2113_v49 = vrot.slane %v1942_v56, %v4202_v50  ;;  %v2104_v53 = vsel %vm2063_vm12, %v2103_v47, %v2099_v2 }
 0x330   : >> { %v4174_v12 = vpop.xlane.xlu1 %1945  ;;  %v4176_v45 = vpop.xlane.xlu0 %1939 }
 0x331   : >> { %v2122_v41 = vrot.slane %v4174_v12, %v4195_v38  ;;  %v2108_v56 = vrot.slane %v4176_v45, %v4205_v32  ;;  %v2090_v12 = vsel %vm2070_vm13, %v2089_v1, %v2085_v52 }
 0x333   : >> { %v2109_v47 = vsel %vm2070_vm13, %v2108_v56, %v2104_v53 }
 0x334   : >> { %v4178_v5 = vpop.xlane.xlu1 %1951  ;;  %v4180_v60 = vpop.xlane.xlu0 %1949 }
 0x335   : >> { %v2136_v42 = vrot.slane %v4178_v5, %v4192_v37  ;;  %v2132_v63 = vrot.slane %v4180_v60, %v4202_v50  ;;  %v2118_v5 = vsel %vm2056_vm6, %v2117_v55, %v2113_v49 }
 0x336   : >> { %v2123_v48 = vsel %vm2063_vm12, %v2122_v41, %v2118_v5  ;;  %v2295_v5 = vld [vmem:[%s4436_s11 + $0x8] sm:$0xff] (%p1566_p4) }
 0x337   : >> { %v2137_v7 = vsel %vm2056_vm6, %v2136_v42, %v2132_v63 }
 0x338   : >> { %v4182_v6 = vpop.xlane.xlu1 %1953  ;;  %v4184_v9 = vpop.xlane.xlu0 %1947 }
 0x339   : >> { %v2141_v43 = vrot.slane %v4182_v6, %v4195_v38  ;;  %v2127_v8 = vrot.slane %v4184_v9, %v4205_v32 }
 0x33c   : >> { %v4187_v11 = vpop.xlane.xlu1 %1959  ;;  %v4189_v36 = vpop.xlane.xlu0 %1957 }
 0x33d   : >> { %v2155_v60 = vrot.slane %v4187_v11, %v4192_v37  ;;  %v2151_v35 = vrot.slane %v4189_v36, %v4202_v50  ;;  %v2206_v36 = vsel %vm2205_vm14, %v2090_v12, %v2071_v40 }
 0x33e   : >> { %v2208_v2 = vsel %vm2207_vm15, %v2109_v47, %v2206_v36  ;;  %v2225_v36 = vmax.f32 (%p1566_p4), %v4055_v14, 1.0  ;;  %vm2824_vm15 = vcmask (%p1566_p4), 1043456  }
 0x340   : >> { %v4197_v30 = vpop.xlane.xlu1 %1961  ;;  %v4199_v61 = vpop.xlane.xlu0 %1955 }
 0x341   : >> { %v2160_v45 = vrot.slane %v4197_v30, %v4195_v38  ;;  %v2146_v6 = vrot.slane %v4199_v61, %v4205_v32  ;;  %v2142_v30 = vsel %vm2063_vm12, %v2141_v43, %v2137_v7  ;;  %v2128_v61 = vsel %vm2070_vm13, %v2127_v8, %v2123_v48  ;;  %v2297_v48 = vld [vmem:[%s4436_s11 + $0x18] sm:$0xff] (%p1566_p4) }
 0x343   : >> { %v2147_v49 = vsel %vm2070_vm13, %v2146_v6, %v2142_v30  ;;  %v2223_v6 = vmax.f32 (%p1566_p4), %v4051_v13, 1.0 }
 0x344   : >> { %v1968_v57 = vpop.xlane.xlu1 %1967  ;;  %v1966_v34 = vpop.xlane.xlu0 %1965 }
 0x345   : >> { %v2174_v9 = vrot.slane %v1968_v57, %v4192_v37  ;;  %v2170_v54 = vrot.slane %v1966_v34, %v4202_v50  ;;  %v2156_v34 = vsel %vm2056_vm6, %v2155_v60, %v2151_v35  ;;  %v2296_v60 = vld [vmem:[%s4436_s11 + $0x10] sm:$0xff] (%p1566_p4)  ;;  %v2222_v35 = vmax.f32 (%p1566_p4), %v4053_v10, 1.0 }
 0x346   : > { %v3506_v47 = vpack.c.bf16 (%p1566_p4), %v2297_v48, %v2296_v60 }
 0x347   : >> { %v2175_v52 = vsel %vm2056_vm6, %v2174_v9, %v2170_v54  ;;  %v2239_v9 = vmul.f32 (%p1566_p4), %v4051_v13, %v4011_v58  ;;  %3559 = vrcp.f32 (%p1566_p4), %v2222_v35 }
 0x348   : >> { %v1970_v51 = vpop.xlane.xlu1 %1969  ;;  %v1964_v21 = vpop.xlane.xlu0 %1963  ;;  %3561 = vrcp.f32 (%p1566_p4), %v2223_v6 }
 0x349   : >> { %v2179_v59 = vrot.slane %v1970_v51, %v4195_v38  ;;  %v2165_v11 = vrot.slane %v1964_v21, %v4205_v32  ;;  %v2161_v21 = vsel %vm2063_vm12, %v2160_v45, %v2156_v34  ;;  %v2238_v45 = vmul.f32 (%p1566_p4), %v4053_v10, %v4014_v62 }
 0x34a   : > { %v2247_v13 = vadd.f32 (%p1566_p4), %v4067_v20, %v2239_v9  ;;  %v2242_v20 = vmul.f32 (%p1566_p4), %v4061_v17, %v3889_v27  ;;  %v2244_v27 = vmul.f32 (%p1566_p4), %v4065_v19, %v3904_v33  ;;  %v2245_v33 = vmul.f32 (%p1566_p4), %v4063_v4, %v3901_v31 }
 0x34b   : >> { %v2180_v41 = vsel %vm2063_vm12, %v2179_v59, %v2175_v52  ;;  %v2224_v59 = vmax.f32 (%p1566_p4), %v4057_v16, 1.0  ;;  %v2246_v62 = vadd.f32 (%p1566_p4), %v2238_v45, %v4069_v22  ;;  %v2227_v52 = vmax.f32 (%p1566_p4), %v4059_v18, 1.0 }
 0x34c   : >> { %v1976_v44 = vpop.xlane.xlu1 %1975  ;;  %v1974_v46 = vpop.xlane.xlu0 %1973 }
 0x34d   : >> { %v2193_v1 = vrot.slane %v1976_v44, %v4192_v37  ;;  %v2189_v55 = vrot.slane %v1974_v46, %v4202_v50  ;;  %v2166_v37 = vsel %vm2070_vm13, %v2165_v11, %v2161_v21  ;;  %v2210_v50 = vsel %vm2209_vm0, %v2128_v61, %v2208_v2 }
 0x34e   : >> { %v2212_v53 = vsel %vm2211_vm2, %v2147_v49, %v2210_v50  ;;  %v2240_v11 = vmul.f32 (%p1566_p4), %v4057_v16, %v4024_v3  ;;  %3563 = vrcp.f32 (%p1566_p4), %v2224_v59  ;;  %v2241_v3 = vmul.f32 (%p1566_p4), %v4055_v14, %v4019_v0 }
 0x34f   : >> { %v2194_v56 = vsel %vm2056_vm6, %v2193_v1, %v2189_v55  ;;  %v2214_v43 = vsel %vm2213_vm3, %v2166_v37, %v2212_v53  ;;  %3565 = vrcp.f32 (%p1566_p4), %v2225_v36  ;;  %v2250_v14 = vadd.f32 (%p1566_p4), %v2242_v20, %v4077_v26  ;;  %v2300_v37 = vld [vmem:[%s4438_s13 + $0x8] sm:$0xff] (%p1566_p4) }
 0x350   : >> { %v1978_v39 = vpop.xlane.xlu1 %1977  ;;  %v1972_v57 = vpop.xlane.xlu0 %1971  ;;  %v2248_v61 = vadd.f32 (%p1566_p4), %v2240_v11, %v4073_v15  ;;  %v2249_v55 = vadd.f32 (%p1566_p4), %v4071_v23, %v2241_v3  ;;  %v2229_v53 = vmax.f32 (%p1566_p4), %v4063_v4, 1.0  ;;  %v2304_v3 = vld [vmem:[%s4438_s13 + $0x28] sm:$0xff] (%p1566_p4) }
 0x351   : >> { %v2184_v51 = vrot.slane %v1972_v57, %v4205_v32  ;;  %v2198_v40 = vrot.slane %v1978_v39, %v4195_v38  ;;  %v2254_v39 = vmul.f32 (%p1566_p4), 0.01, %v2246_v62  ;;  %v2255_v57 = vmul.f32 (%p1566_p4), 0.01, %v2247_v13 }
 0x352   : > { %v2256_v1 = vmul.f32 (%p1566_p4), 0.01, %v2248_v61  ;;  %v2257_v0 = vmul.f32 (%p1566_p4), 0.01, %v2249_v55  ;;  %v2258_v50 = vmul.f32 (%p1566_p4), 0.01, %v2250_v14 }
 0x353   : >> { %v2185_v42 = vsel %vm2070_vm13, %v2184_v51, %v2180_v41  ;;  %v2199_v8 = vsel %vm2063_vm12, %v2198_v40, %v2194_v56  ;;  %1568 = sbr.rel (!%p1566_p4) target bundleno = 518 (0x206), region = 142  ;;  %v2226_v51 = vmax.f32 (%p1566_p4), %v4061_v17, 1.0  ;;  %v2243_v40 = vmul.f32 (%p1566_p4), %v4059_v18, %v3886_v25  ;;  %v2299_v17 = vld [vmem:[%s4438_s13] sm:$0xff] (%p1566_p4)  ;;  %v2302_v56 = vld [vmem:[%s4438_s13 + $0x18] sm:$0xff] (%p1566_p4)  ;;  %v2309_v55 = vld [vmem:[%s4440_s15 + $0x8] sm:$0xff] (%p1566_p4) }
 0x354   : >> { %v1980_v63 = vpop.xlane.xlu0 %1979  ;;  %v2216_v44 = vsel %vm2215_vm4, %v2185_v42, %v2214_v43  ;;  %v2228_v41 = vmax.f32 (%p1566_p4), %v4065_v19, 1.0  ;;  %v2252_v18 = vadd.f32 (%p1566_p4), %v2244_v27, %v4081_v29  ;;  %v2301_v19 = vld [vmem:[%s4438_s13 + $0x10] sm:$0xff] (%p1566_p4) }
 0x355   : >> { %v2203_v38 = vrot.slane %v1980_v63, %v4205_v32  ;;  %v2294_v32 = vld [vmem:[%s4436_s11] sm:$0xff] (%p1566_p4)  ;;  %3567 = vrcp.f32 (%p1566_p4), %v2226_v51  ;;  %v2251_v25 = vadd.f32 (%p1566_p4), %v4075_v24, %v2243_v40  ;;  %v3514_v35 = vpack.c.bf16 (%p1566_p4), %v2302_v56, %v2301_v19  ;;  %v2310_v51 = vld [vmem:[%s4440_s15 + $0x10] sm:$0xff] (%p1566_p4) }
 0x356   : > { %v3502_v54 = vpack.c.bf16 (%p1566_p4), %v2295_v5, %v2294_v32  ;;  %3569 = vrcp.f32 (%p1566_p4), %v2227_v52  ;;  %v2260_v5 = vmul.f32 (%p1566_p4), 0.01, %v2252_v18 }
 0x357   : >> { %v2204_v46 = vsel %vm2070_vm13, %v2203_v38, %v2199_v8  ;;  %3571 = vrcp.f32 (%p1566_p4), %v2228_v41  ;;  %v3560_v38 = vpop.eup (%p1566_p4), %3559  ;;  %v2259_v24 = vmul.f32 (%p1566_p4), 0.01, %v2251_v25 }
 0x358   : >> { %v2218_v12 = vsel %vm2217_vm5, %v2204_v46, %v2216_v44  ;;  %3503 = vmatprep.subr.bf16.mxu1 (%p1566_p4), %v3502_v54  ;;  %v3510_v44 = vpack.c.bf16 (%p1566_p4), %v2300_v37, %v2299_v17  ;;  %v3562_v29 = vpop.eup (%p1566_p4), %3561  ;;  %3573 = vrcp.f32 (%p1566_p4), %v2229_v53 }
 0x359   : >> { %2221 = vst.msk [vmem:[%s2220_s2] sm:$0xff] %vm853_vm1, %v2218_v12  ;;  %3505 = vmatpush3.bf16.msra.mxu1 (%p1566_p4), %v3502_v54  ;;  %v2253_v12 = vadd.f32 (%p1566_p4), %v4079_v28, %v2245_v33  ;;  %v3564_v31 = vpop.eup (%p1566_p4), %3563 }
 0x35a   : > { %3507 = vmatprep.subr.bf16.mxu1 %v3506_v47  ;;  %3511 = vmatprep.subr.bf16.mxu0 %v3510_v44  ;;  %v3566_v45 = vpop.eup %3565 }
 0x35b   : > { %3513 = vmatpush3.bf16.msra.mxu0 %v3510_v44 }
 0x35c   : > { %3515 = vmatprep.subr.bf16.mxu0 %v3514_v35 }
 0x35d   : > { %3509 = vmatpush3.bf16.msra.mxu1 %v3506_v47 }
 0x35f   : > { %v3568_v28 = vpop.eup %3567  ;;  %3517 = vmatpush3.bf16.msra.mxu0 %v3514_v35  ;;  %v3111_v35 = vld [vmem:[%s4439_s14] ss:$0 sm:$0xff] }
 0x360   : > { %v2262_v7 = vld [vmem:[#allocation5] sm:$0xff]  ;;  %v2263_v10 = vld [vmem:[#allocation5 + $0x8] sm:$0xff]  ;;  %v2264_v30 = vld [vmem:[#allocation5 + $0x10] sm:$0xff]  ;;  %v3570_v36 = vpop.eup %3569 }
 0x361   : > { %v2270_v58 = vmul.f32 0.99, %v2262_v7  ;;  %v2265_v16 = vld [vmem:[#allocation5 + $0x18] sm:$0xff]  ;;  %v2271_v34 = vmul.f32 0.99, %v2263_v10  ;;  %v2266_v49 = vld [vmem:[#allocation5 + $0x20] sm:$0xff] }
 0x362   : > { %v2272_v22 = vmul.f32 0.99, %v2264_v30  ;;  %v2273_v21 = vmul.f32 0.99, %v2265_v16  ;;  %v2267_v23 = vld [vmem:[#allocation5 + $0x28] sm:$0xff]  ;;  %v2268_v63 = vld [vmem:[#allocation5 + $0x30] sm:$0xff]  ;;  %v3572_v30 = vpop.eup %3571 }
 0x363   : > { %v2278_v15 = vadd.f32 %v2270_v58, %v2254_v39  ;;  %v2279_v2 = vadd.f32 %v2271_v34, %v2255_v57  ;;  %v2274_v42 = vmul.f32 0.99, %v2266_v49  ;;  %v2275_v8 = vmul.f32 0.99, %v2267_v23  ;;  %v2269_v32 = vld [vmem:[#allocation5 + $0x38] sm:$0xff]  ;;  %v3574_v13 = vpop.eup %3573  ;;  %v2303_v39 = vld [vmem:[%s4438_s13 + $0x20] sm:$0xff] }
 0x364   : > { %v2280_v26 = vadd.f32 %v2272_v22, %v2256_v1  ;;  %v2281_v43 = vadd.f32 %v2273_v21, %v2257_v0  ;;  %v2276_v60 = vmul.f32 0.99, %v2268_v63  ;;  %v2261_v7 = vmul.f32 0.01, %v2253_v12  ;;  %v2305_v57 = vld [vmem:[%s4438_s13 + $0x30] sm:$0xff]  ;;  %v2306_v34 = vld [vmem:[%s4438_s13 + $0x38] sm:$0xff] }
 0x365   : > { %v2286_v46 = vmul.f32 %v3560_v38, %v2278_v15  ;;  %v2287_v4 = vmul.f32 %v3562_v29, %v2279_v2  ;;  %v2282_v9 = vadd.f32 %v2274_v42, %v2258_v50  ;;  %v2283_v48 = vadd.f32 %v2275_v8, %v2259_v24  ;;  %v2308_v1 = vld [vmem:[%s4440_s15] sm:$0xff]  ;;  %v2311_v15 = vld [vmem:[%s4440_s15 + $0x18] sm:$0xff] }
 0x366   : > { %v2288_v6 = vmul.f32 %v3564_v31, %v2280_v26  ;;  %v2289_v54 = vmul.f32 %v3566_v45, %v2281_v43  ;;  %v2277_v59 = vmul.f32 0.99, %v2269_v32  ;;  %v2284_v11 = vadd.f32 %v2276_v60, %v2260_v5  ;;  %v3102_v49 = vld [vmem:[%s4437_s12] ss:$0 sm:$0xff] }
 0x367   : > { %3380 = vmatprep.mubr.msk.f32.mxu1 %vm853_vm1, %v2286_v46  ;;  %v2290_v47 = vmul.f32 %v3568_v28, %v2282_v9  ;;  %v2291_v62 = vmul.f32 %v3570_v36, %v2283_v48  ;;  %v3518_v16 = vpack.c.bf16 %v2304_v3, %v2303_v39  ;;  %v3522_v22 = vpack.c.bf16 %v2306_v34, %v2305_v57  ;;  %v2313_v60 = vld [vmem:[%s4442_s17] sm:$0xf] }
 0x368   : > { %3381 = vmatmul.mubr.msk.f32.vlgmr.msra.gmra.mrb[28].mxu1 %vm853_vm1, %v2287_v4  ;;  %v2285_v10 = vadd.f32 %v2277_v59, %v2261_v7  ;;  %v2292_v58 = vmul.f32 %v3572_v30, %v2284_v11  ;;  %v3526_v20 = vpack.c.bf16 %v2309_v55, %v2308_v1  ;;  %v3530_v21 = vpack.c.bf16 %v2311_v15, %v2310_v51 }
 0x369   : > { %3383 = vmatprep.mubr.msk.f32.mxu1 %vm853_vm1, %v2288_v6  ;;  %3519 = vmatprep.subr.bf16.mxu0 %v3518_v16 }
 0x36a   : > { %v2293_v61 = vmul.f32 %v3574_v13, %v2285_v10  ;;  %3521 = vmatpush3.bf16.msra.mxu0 %v3518_v16  ;;  %3527 = vmatprep.subr.bf16.mxu1 %v3526_v20 }
 0x36b   : > { %3523 = vmatprep.subr.bf16.mxu0 %v3522_v22  ;;  %3529 = vmatpush3.bf16.msra.mxu1 %v3526_v20 }
 0x36c   : > { %3384 = vmatmul.mubr.msk.f32.gmra.mrb[30].mxu1 %vm853_vm1, %v2289_v54  ;;  %3531 = vmatprep.subr.bf16.mxu1 %v3530_v21 }
 0x36d   : > { %3386 = vmatprep.mubr.msk.f32.mxu1 %vm853_vm1, %v2290_v47 }
 0x36e   : > { %3525 = vmatpush3.bf16.msra.mxu0 %v3522_v22 }
 0x36f   : > { %3533 = vmatpush3.bf16.msra.mxu1 %v3530_v21  ;;  %3440 = vmatprep.subr.msk.mxu0 %vm2824_vm15, %v2313_v60 }
 0x370   : > { %3387 = vmatmul.mubr.msk.f32.gmra.mrb[32].mxu1 %vm853_vm1, %v2291_v62 }
 0x371   : > { %3389 = vmatprep.mubr.msk.f32.mxu1 %vm853_vm1, %v2292_v58 }
 0x374   : > { %3390 = vmatmul.mubr.msk.f32.gmra.mrb[34].mxu1 %vm853_vm1, %v2293_v61 }
 0x43b   : > { %v3382_v52 = vpop.f32.mrb[28].mxu1 }
 0x43c   : > { %v2417_v0 = vadd.f32 %v3382_v52, %v3102_v49  ;;  %v2411_v14 = vpop.f32.mrb[29].mxu1 }
 0x43d   : > { %v2412_v40 = vadd.f32 %v3102_v49, %v2411_v14  ;;  %v3120_v14 = vld [vmem:[%s4441_s16] ss:$0 sm:$0xff] }
 0x43e   : > { %v2459_v2 = vmul.f32 0.01, %v2417_v0  ;;  %vm2451_vm7 = vcmp.gt.f32.partialorder %v2417_v0, 0.0 }
 0x43f   : > { %v3385_v23 = vpop.f32.mrb[30].mxu1  ;;  %vm2450_vm8 = vcmp.gt.f32.partialorder %v2412_v40, 0.0  ;;  %v2458_v41 = vmul.f32 0.01, %v2412_v40 }
 0x440   : > { %v2427_v27 = vadd.f32 %v3385_v23, %v3102_v49  ;;  %v2421_v17 = vpop.f32.mrb[31].mxu1  ;;  %v2467_v42 = vsel %vm2451_vm7, %v2417_v0, %v2459_v2 }
 0x441   : > { %v2422_v37 = vadd.f32 %v3102_v49, %v2421_v17  ;;  %v2466_v26 = vsel %vm2450_vm8, %v2412_v40, %v2458_v41 }
 0x442   : > { %v2461_v50 = vmul.f32 0.01, %v2427_v27  ;;  %3408 = vmatprep.mubr.msk.f32.mxu0 %vm2480_vm9, %v2466_v26  ;;  %vm2453_vm10 = vcmp.gt.f32.partialorder %v2427_v27, 0.0 }
 0x443   : > { %vm2452_vm11 = vcmp.gt.f32.partialorder %v2422_v37, 0.0  ;;  %v2460_v25 = vmul.f32 0.01, %v2422_v37  ;;  %v3388_v18 = vpop.f32.mrb[32].mxu1  ;;  %3409 = vmatmul.mubr.msk.f32.vlgmr.msra.gmra.mrb[16].mxu0 %vm2480_vm9, %v2467_v42 }
 0x444   : > { %v2437_v63 = vadd.f32 %v3388_v18, %v3102_v49  ;;  %v2431_v53 = vpop.f32.mrb[33].mxu1  ;;  %v2469_v38 = vsel %vm2453_vm10, %v2427_v27, %v2461_v50  ;;  %3441 = vmatpush3.msk.msra.mxu0 %vm2824_vm15, %v2313_v60 }
 0x445   : > { %v2432_v33 = vadd.f32 %v3102_v49, %v2431_v53  ;;  %v2468_v19 = vsel %vm2452_vm11, %v2422_v37, %v2460_v25 }
 0x446   : > { %v2463_v56 = vmul.f32 0.01, %v2437_v63  ;;  %3411 = vmatprep.mubr.msk.f32.mxu0 %vm2480_vm9, %v2468_v19  ;;  %vm2455_vm6 = vcmp.gt.f32.partialorder %v2437_v63, 0.0 }
 0x447   : > { %vm2454_vm12 = vcmp.gt.f32.partialorder %v2432_v33, 0.0  ;;  %v2462_v43 = vmul.f32 0.01, %v2432_v33  ;;  %v3391_v24 = vpop.f32.mrb[34].mxu1  ;;  %3412 = vmatmul.mubr.msk.f32.gmra.mrb[18].mxu0 %vm2480_vm9, %v2469_v38 }
 0x448   : > { %v2447_v8 = vadd.f32 %v3391_v24, %v3102_v49  ;;  %v2441_v44 = vpop.f32.mrb[35].mxu1  ;;  %v2471_v32 = vsel %vm2455_vm6, %v2437_v63, %v2463_v56  ;;  %vm2799_vm6 = vcmask 31744  }
 0x449   : > { %v2442_v29 = vadd.f32 %v3102_v49, %v2441_v44  ;;  %v2470_v46 = vsel %vm2454_vm12, %v2432_v33, %v2462_v43 }
 0x44a   : > { %v2465_v12 = vmul.f32 0.01, %v2447_v8  ;;  %3414 = vmatprep.mubr.msk.f32.mxu0 %vm2480_vm9, %v2470_v46  ;;  %vm2457_vm13 = vcmp.gt.f32.partialorder %v2447_v8, 0.0 }
 0x44b   : > { %vm2456_vm14 = vcmp.gt.f32.partialorder %v2442_v29, 0.0  ;;  %v2464_v31 = vmul.f32 0.01, %v2442_v29  ;;  %3415 = vmatmul.mubr.msk.f32.gmra.mrb[20].mxu0 %vm2480_vm9, %v2471_v32 }
 0x44c   : > { %v2473_v5 = vsel %vm2457_vm13, %v2447_v8, %v2465_v12 }
 0x44d   : > { %v2472_v4 = vsel %vm2456_vm14, %v2442_v29, %v2464_v31 }
 0x44e   : > { %3417 = vmatprep.mubr.msk.f32.mxu0 %vm2480_vm9, %v2472_v4 }
 0x44f   : > { %3418 = vmatmul.mubr.msk.f32.gmra.mrb[22].mxu0 %vm2480_vm9, %v2473_v5 }
 0x516   : > { %v3410_v45 = vpop.f32.mrb[16].mxu0 }
 0x517   : > { %v2577_v6 = vadd.f32 %v3410_v45, %v3111_v35  ;;  %v2571_v9 = vpop.f32.mrb[17].mxu0 }
 0x518   : > { %v2572_v54 = vadd.f32 %v3111_v35, %v2571_v9 }
 0x519   : > { %v2619_v48 = vmul.f32 0.01, %v2577_v6  ;;  %vm2611_vm0 = vcmp.gt.f32.partialorder %v2577_v6, 0.0 }
 0x51a   : > { %v2618_v7 = vmul.f32 0.01, %v2572_v54  ;;  %v3413_v59 = vpop.f32.mrb[18].mxu0  ;;  %vm2610_vm2 = vcmp.gt.f32.partialorder %v2572_v54, 0.0 }
 0x51b   : > { %v2587_v28 = vadd.f32 %v3413_v59, %v3111_v35  ;;  %v2581_v11 = vpop.f32.mrb[19].mxu0  ;;  %v2627_v62 = vsel %vm2611_vm0, %v2577_v6, %v2619_v48  ;;  %v3129_v6 = vld [vmem:[#allocation6] ss:$0 sm:$0xff] }
 0x51c   : > { %v2582_v36 = vadd.f32 %v3111_v35, %v2581_v11  ;;  %v2626_v47 = vsel %vm2610_vm2, %v2572_v54, %v2618_v7  ;;  %vm2933_vm2 = vcmask 7168  }
 0x51d   : > { %v2621_v10 = vmul.f32 0.01, %v2587_v28  ;;  %3428 = vmatprep.mubr.msk.f32.mxu1 %vm853_vm1, %v2626_v47  ;;  %vm2613_vm4 = vcmp.gt.f32.partialorder %v2587_v28, 0.0 }
 0x51e   : > { %v2620_v30 = vmul.f32 0.01, %v2582_v36  ;;  %v3416_v58 = vpop.f32.mrb[20].mxu0  ;;  %3429 = vmatmul.mubr.msk.f32.vlgmr.msra.gmra.mrb[36].mxu1 %vm853_vm1, %v2627_v62  ;;  %vm2612_vm3 = vcmp.gt.f32.partialorder %v2582_v36, 0.0 }
 0x51f   : > { %v2597_v13 = vadd.f32 %v3416_v58, %v3111_v35  ;;  %v2591_v61 = vpop.f32.mrb[21].mxu0  ;;  %v2629_v57 = vsel %vm2613_vm4, %v2587_v28, %v2621_v10 }
 0x520   : > { %v2592_v39 = vadd.f32 %v3111_v35, %v2591_v61  ;;  %v2628_v3 = vsel %vm2612_vm3, %v2582_v36, %v2620_v30 }
 0x521   : > { %v2623_v16 = vmul.f32 0.01, %v2597_v13  ;;  %3431 = vmatprep.mubr.msk.f32.mxu1 %vm853_vm1, %v2628_v3  ;;  %vm2615_vm7 = vcmp.gt.f32.partialorder %v2597_v13, 0.0 }
 0x522   : > { %v2622_v34 = vmul.f32 0.01, %v2592_v39  ;;  %v3419_v22 = vpop.f32.mrb[22].mxu0  ;;  %3432 = vmatmul.mubr.msk.f32.gmra.mrb[38].mxu1 %vm853_vm1, %v2629_v57  ;;  %vm2614_vm5 = vcmp.gt.f32.partialorder %v2592_v39, 0.0 }
 0x523   : > { %v2607_v1 = vadd.f32 %v3419_v22, %v3111_v35  ;;  %v2601_v55 = vpop.f32.mrb[23].mxu0  ;;  %v2631_v21 = vsel %vm2615_vm7, %v2597_v13, %v2623_v16 }
 0x524   : > { %v2602_v51 = vadd.f32 %v3111_v35, %v2601_v55  ;;  %v2630_v20 = vsel %vm2614_vm5, %v2592_v39, %v2622_v34 }
 0x525   : > { %v2625_v15 = vmul.f32 0.01, %v2607_v1  ;;  %3434 = vmatprep.mubr.msk.f32.mxu1 %vm853_vm1, %v2630_v20  ;;  %vm2617_vm9 = vcmp.gt.f32.partialorder %v2607_v1, 0.0 }
 0x526   : > { %v2624_v49 = vmul.f32 0.01, %v2602_v51  ;;  %3435 = vmatmul.mubr.msk.f32.gmra.mrb[40].mxu1 %vm853_vm1, %v2631_v21  ;;  %vm2616_vm8 = vcmp.gt.f32.partialorder %v2602_v51, 0.0 }
 0x527   : > { %v2633_v0 = vsel %vm2617_vm9, %v2607_v1, %v2625_v15 }
 0x528   : > { %v2632_v52 = vsel %vm2616_vm8, %v2602_v51, %v2624_v49 }
 0x529   : > { %3437 = vmatprep.mubr.msk.f32.mxu1 %vm853_vm1, %v2632_v52 }
 0x52a   : > { %3438 = vmatmul.mubr.msk.f32.gmra.mrb[42].mxu1 %vm853_vm1, %v2633_v0 }
 0x5f1   : > { %v3430_v40 = vpop.f32.mrb[36].mxu1 }
 0x5f2   : > { %v2736_v2 = vadd.f32 %v3430_v40, %v3120_v14  ;;  %v2730_v23 = vpop.f32.mrb[37].mxu1 }
 0x5f3   : > { %v2731_v41 = vadd.f32 %v3120_v14, %v2730_v23 }
 0x5f4   : > { %v2778_v27 = vmul.f32 0.01, %v2736_v2  ;;  %vm2770_vm10 = vcmp.gt.f32.partialorder %v2736_v2, 0.0 }
 0x5f5   : > { %vm2769_vm11 = vcmp.gt.f32.partialorder %v2731_v41, 0.0  ;;  %v2777_v17 = vmul.f32 0.01, %v2731_v41  ;;  %v3433_v37 = vpop.f32.mrb[38].mxu1 }
 0x5f6   : > { %v2746_v26 = vadd.f32 %v3433_v37, %v3120_v14  ;;  %v2740_v50 = vpop.f32.mrb[39].mxu1  ;;  %v2786_v18 = vsel %vm2770_vm10, %v2736_v2, %v2778_v27 }
 0x5f7   : > { %v2741_v42 = vadd.f32 %v3120_v14, %v2740_v50  ;;  %v2785_v25 = vsel %vm2769_vm11, %v2731_v41, %v2777_v17 }
 0x5f8   : > { %v2780_v63 = vmul.f32 0.01, %v2746_v26  ;;  %3442 = vmatprep.mubr.msk.f32.mxu0 %vm2799_vm6, %v2785_v25  ;;  %vm2772_vm1 = vcmp.gt.f32.partialorder %v2746_v26, 0.0 }
 0x5f9   : > { %vm2771_vm12 = vcmp.gt.f32.partialorder %v2741_v42, 0.0  ;;  %v2779_v53 = vmul.f32 0.01, %v2741_v42  ;;  %v3436_v33 = vpop.f32.mrb[40].mxu1  ;;  %3443 = vmatmul.mubr.msk.f32.vlgmr.msra.gmra.mrb[24].mxu0 %vm2799_vm6, %v2786_v18 }
 0x5fa   : > { %v2756_v19 = vadd.f32 %v3436_v33, %v3120_v14  ;;  %v2750_v56 = vpop.f32.mrb[41].mxu1  ;;  %v2788_v8 = vsel %vm2772_vm1, %v2746_v26, %v2780_v63 }
 0x5fb   : > { %v2751_v38 = vadd.f32 %v3120_v14, %v2750_v56  ;;  %v2787_v43 = vsel %vm2771_vm12, %v2741_v42, %v2779_v53 }
 0x5fc   : > { %v2782_v24 = vmul.f32 0.01, %v2756_v19  ;;  %3445 = vmatprep.mubr.msk.f32.mxu0 %vm2799_vm6, %v2787_v43  ;;  %vm2774_vm13 = vcmp.gt.f32.partialorder %v2756_v19, 0.0 }
 0x5fd   : > { %vm2773_vm14 = vcmp.gt.f32.partialorder %v2751_v38, 0.0  ;;  %v2781_v44 = vmul.f32 0.01, %v2751_v38  ;;  %v3439_v29 = vpop.f32.mrb[42].mxu1  ;;  %3446 = vmatmul.mubr.msk.f32.gmra.mrb[26].mxu0 %vm2799_vm6, %v2788_v8 }
 0x5fe   : > { %v2766_v46 = vadd.f32 %v3439_v29, %v3120_v14  ;;  %v2760_v12 = vpop.f32.mrb[43].mxu1  ;;  %v2790_v5 = vsel %vm2774_vm13, %v2756_v19, %v2782_v24 }
 0x5ff   : > { %v2761_v32 = vadd.f32 %v3120_v14, %v2760_v12  ;;  %v2789_v31 = vsel %vm2773_vm14, %v2751_v38, %v2781_v44 }
 0x600   : > { %v2784_v4 = vmul.f32 0.01, %v2766_v46  ;;  %3448 = vmatprep.mubr.msk.f32.mxu0 %vm2799_vm6, %v2789_v31  ;;  %vm2776_vm15 = vcmp.gt.f32.partialorder %v2766_v46, 0.0 }
 0x601   : > { %vm2775_vm0 = vcmp.gt.f32.partialorder %v2761_v32, 0.0  ;;  %v2783_v60 = vmul.f32 0.01, %v2761_v32  ;;  %3449 = vmatmul.mubr.msk.f32.gmra.mrb[28].mxu0 %vm2799_vm6, %v2790_v5 }
 0x602   : > { %v2792_v45 = vsel %vm2776_vm15, %v2766_v46, %v2784_v4 }
 0x603   : > { %v2791_v35 = vsel %vm2775_vm0, %v2761_v32, %v2783_v60 }
 0x604   : > { %3451 = vmatprep.mubr.msk.f32.mxu0 %vm2799_vm6, %v2791_v35 }
 0x605   : > { %3452 = vmatmul.mubr.msk.f32.gmra.mrb[30].mxu0 %vm2799_vm6, %v2792_v45 }
 0x6cc   : > { %v3444_v9 = vpop.f32.mrb[24].mxu0 }
 0x6cd   : > { %v2900_v54 = vadd.f32 %v3444_v9, %v3129_v6  ;;  %v2894_v48 = vpop.f32.mrb[25].mxu0 }
 0x6ce   : > { %v2895_v7 = vadd.f32 %v3129_v6, %v2894_v48 }
 0x6cf   : > { %2935 = vst.msk [vmem:[%s3734_s25 + $0x8] sm:$0xff] %vm2933_vm2, %v2900_v54 }
 0x6d0   : > { %2934 = vst.msk [vmem:[%s3734_s25] sm:$0xff] %vm2933_vm2, %v2895_v7  ;;  %v3447_v59 = vpop.f32.mrb[26].mxu0 }
 0x6d1   : > { %v2910_v28 = vadd.f32 %v3447_v59, %v3129_v6  ;;  %v2904_v11 = vpop.f32.mrb[27].mxu0 }
 0x6d2   : > { %v2905_v36 = vadd.f32 %v3129_v6, %v2904_v11 }
 0x6d3   : > { %2937 = vst.msk [vmem:[%s3734_s25 + $0x18] sm:$0xff] %vm2933_vm2, %v2910_v28 }
 0x6d4   : > { %2936 = vst.msk [vmem:[%s3734_s25 + $0x10] sm:$0xff] %vm2933_vm2, %v2905_v36  ;;  %v3450_v47 = vpop.f32.mrb[28].mxu0 }
 0x6d5   : > { %v2920_v62 = vadd.f32 %v3450_v47, %v3129_v6  ;;  %v2914_v10 = vpop.f32.mrb[29].mxu0 }
 0x6d6   : > { %v2915_v30 = vadd.f32 %v3129_v6, %v2914_v10 }
 0x6d7   : > { %2939 = vst.msk [vmem:[%s3734_s25 + $0x28] sm:$0xff] %vm2933_vm2, %v2920_v62 }
 0x6d8   : > { %2938 = vst.msk [vmem:[%s3734_s25 + $0x20] sm:$0xff] %vm2933_vm2, %v2915_v30  ;;  %v3453_v58 = vpop.f32.mrb[30].mxu0 }
 0x6d9   : > { %v2930_v13 = vadd.f32 %v3453_v58, %v3129_v6  ;;  %v2924_v61 = vpop.f32.mrb[31].mxu0 }
 0x6da   : > { %v2925_v39 = vadd.f32 %v3129_v6, %v2924_v61 }
 0x6db   : > { %2941 = vst.msk [vmem:[%s3734_s25 + $0x38] sm:$0xff] %vm2933_vm2, %v2930_v13 }
 0x6dc   : > { %2940 = vst.msk [vmem:[%s3734_s25 + $0x30] sm:$0xff] %vm2933_vm2, %v2925_v39 }
 0x6dd PF: > { %s31_s20 = sadd.s32 1, %s3585_s20  }
 0x6de   : > { %p28_p5 = scmp.ge.s32.totalorder %s31_s20, 4  }
 0x6e0   :  { %30 = sbr.rel (!%p28_p5) target bundleno = 5 (0x5), region = 153 }

</bundles_post_ra>
